<compile_context>
chip_gen: v7x
topology: tpu7x:2x2x1
jax: 0.10.0
libtpu: 0.0.40
codegen_flags: <defaults>
</compile_context>

<pallas_src>
import functools

import jax
import jax.numpy as jnp
from jax import lax
from jax.experimental import pallas as pl
from jax.experimental.pallas import tpu as pltpu


def _round_up(x, m):
    return ((x + m - 1) // m) * m


def _vmem_limit_bytes():
    """Generation-aware VMEM limit (v5e/v6e: 128 MiB parts, v7x: 64 MiB)."""
    cap = 64 * 1024 * 1024
    try:
        cap = int(pltpu.get_tpu_info().vmem_capacity_bytes)
    except Exception:
        pass
    return max(32 * 1024 * 1024, min(cap * 3 // 4, 112 * 1024 * 1024))


# ---------------------- flat-padded activation layout ------------------------
def make_geom(H, W):
    """Layout of one image: zero border of 1, W padded to mult-of-8, interior
    (row 1, col 1) lands on an 8-aligned flat row so stores are aligned."""
    Wp = _round_up(W + 2, 8)
    lead = (-(Wp + 1)) % 8
    R = _round_up(lead + (H + 2) * Wp + 2, 8)
    return dict(H=H, W=W, Wp=Wp, lead=lead, R=R)


def pack_nchw(x_nchw):
    N, C, H, W = x_nchw.shape
    g = make_geom(H, W)
    x_nhwc = jnp.transpose(x_nchw, (0, 2, 3, 1))
    xp = jnp.pad(x_nhwc, ((0, 0), (1, 1), (1, g["Wp"] - W - 1), (0, 0)))
    flat = xp.reshape(N, (H + 2) * g["Wp"], C)
    flat = jnp.pad(flat, ((0, 0),
                          (g["lead"], g["R"] - g["lead"] - (H + 2) * g["Wp"]),
                          (0, 0)))
    return flat.astype(jnp.bfloat16), g


def unpack_to_nchw(flat, g):
    N, _, C = flat.shape
    H, W, Wp, lead = g["H"], g["W"], g["Wp"], g["lead"]
    img = flat[:, lead:lead + (H + 2) * Wp, :].reshape(N, H + 2, Wp, C)
    img = img[:, 1:H + 1, 1:W + 1, :]
    return jnp.transpose(img, (0, 3, 1, 2)).astype(jnp.float32)


def pack_phases(flat, g):
    """2x2 phase split of the padded image so a stride-2 3x3 conv becomes the
    same stride-1 shift-matmul over 4 stacked phase slabs."""
    H, W, Wp, lead = g["H"], g["W"], g["Wp"], g["lead"]
    assert H % 2 == 0 and W % 2 == 0, "stride-2 path assumes even spatial dims"
    N, _, C = flat.shape
    g_out = make_geom(H // 2, W // 2)
    Wq = g_out["Wp"]                      # phase width == output layout width
    Ha = (H + 2) // 2
    R_ph = _round_up(Ha * Wq + 1, 8)
    img = flat[:, lead:lead + (H + 2) * Wp, :].reshape(N, H + 2, Wp, C)
    phases = []
    for r in (0, 1):
        for s in (0, 1):
            P = img[:, r::2, s::2, :]                       # (N, Ha, Wp//2, C)
            if P.shape[2] < Wq:
                P = jnp.pad(P, ((0, 0), (0, 0), (0, Wq - P.shape[2]), (0, 0)))
            else:
                P = P[:, :, :Wq, :]
            Pf = P.reshape(N, Ha * Wq, C)
            Pf = jnp.pad(Pf, ((0, 0), (0, R_ph - Ha * Wq), (0, 0)))
            phases.append(Pf)
    return jnp.concatenate(phases, axis=1), R_ph, g_out     # (N, 4*R_ph, C)


# ------------------------------ Pallas kernel ---------------------------------
def _conv_kernel(*refs, tap_offsets, center_idx, M, Wp_out, W_valid, out_off,
                 R_out, relu, has_res, has_sc):
    """One image: out = [relu]( sum_k taps_k @ Wk + bias [+ residual] ),
    optional fused 1x1-shortcut output from the center tap.  Taps are shifted
    row slices of the flat padded activation (formed in VMEM, no im2col)."""
    i = 0
    x_ref = refs[i]; i += 1
    w_ref = refs[i]; i += 1
    b_ref = refs[i]; i += 1
    ws_ref = bs_ref = r_ref = None
    if has_sc:
        ws_ref = refs[i]; i += 1
        bs_ref = refs[i]; i += 1
    if has_res:
        r_ref = refs[i]; i += 1
    o_ref = refs[i]; i += 1
    osc_ref = refs[i] if has_sc else None

    acc = None
    center = None
    for k, off in enumerate(tap_offsets):
        tap = x_ref[pl.ds(off, M), :]                      # (M, Cin) bf16
        if k == center_idx:
            center = tap
        part = jnp.dot(tap, w_ref[k], preferred_element_type=jnp.float32)
        acc = part if acc is None else acc + part

    out = acc + b_ref[...]
    if has_res:
        out = out + r_ref[pl.ds(out_off, M), :].astype(jnp.float32)
    if relu:
        out = jnp.maximum(out, 0.0)

    # zero the garbage columns (layout width Wp_out > W_valid) so the slab is a
    # valid zero-bordered input for the next conv.
    col = lax.broadcasted_iota(jnp.int32, (M, 1), 0) % Wp_out
    valid = col < W_valid
    out = jnp.where(valid, out, 0.0)

    tail = R_out - out_off - M

    def _store(ref, val):
        c = ref.shape[-1]
        ref[pl.ds(0, out_off), :] = jnp.zeros((out_off, c), ref.dtype)
        if tail > 0:
            ref[pl.ds(out_off + M, tail), :] = jnp.zeros((tail, c), ref.dtype)
        ref[pl.ds(out_off, M), :] = val.astype(ref.dtype)

    _store(o_ref, out)
    if has_sc:
        sc = jnp.dot(center, ws_ref[...], preferred_element_type=jnp.float32)
        sc = jnp.where(valid, sc + bs_ref[...], 0.0)
        _store(osc_ref, sc)


# ------------------------------ call wrapper ----------------------------------
def fused_conv(x_flat, g_in, w_taps, bias, *, stride, relu, res_flat=None,
               ws_mat=None, bs_vec=None):
    """One pallas_call: 3x3 conv (BN folded) [+fused 1x1 shortcut] [+residual]
    [+ReLU] on the flat-padded bf16 activation layout.  Returns (out, sc, geom)."""
    N, _, Cin = x_flat.shape
    Cout = w_taps.shape[-1]
    has_sc = ws_mat is not None
    has_res = res_flat is not None

    if stride == 1:
        g_out = g_in
        x_in = x_flat
        Wp_o = g_in["Wp"]
        M = g_in["H"] * Wp_o
        W_valid = g_in["W"]
        offs = tuple(g_in["lead"] + kh * Wp_o + kw
                     for kh in range(3) for kw in range(3))
    elif stride == 2:
        x_in, R_ph, g_out = pack_phases(x_flat, g_in)
        Wp_o = g_out["Wp"]
        M = g_out["H"] * Wp_o
        W_valid = g_out["W"]
        offs = tuple(((kh % 2) * 2 + (kw % 2)) * R_ph
                     + (kh // 2) * Wp_o + (kw // 2)
                     for kh in range(3) for kw in range(3))
    else:
        raise ValueError("stride must be 1 or 2")

    R_in = x_in.shape[1]
    R_out = g_out["R"]
    out_off = g_out["lead"] + Wp_o + 1
    assert out_off % 8 == 0 and M % 8 == 0

    bias2 = bias.reshape(1, Cout).astype(jnp.float32)
    in_specs = [
        pl.BlockSpec((None, R_in, Cin), lambda n: (n, 0, 0)),   # activation, streamed
        pl.BlockSpec((9, Cin, Cout), lambda n: (0, 0, 0)),      # folded weights, resident
        pl.BlockSpec((1, Cout), lambda n: (0, 0)),              # folded BN bias
    ]
    args = [x_in, w_taps, bias2]
    Csc = 0
    if has_sc:
        Csc = ws_mat.shape[-1]
        bs2 = bs_vec.reshape(1, Csc).astype(jnp.float32)
        in_specs += [pl.BlockSpec((Cin, Csc), lambda n: (0, 0)),
                     pl.BlockSpec((1, Csc), lambda n: (0, 0))]
        args += [ws_mat, bs2]
    if has_res:
        in_specs.append(pl.BlockSpec((None, R_out, Cout), lambda n: (n, 0, 0)))
        args.append(res_flat)

    out_shapes = [jax.ShapeDtypeStruct((N, R_out, Cout), jnp.bfloat16)]
    out_specs = [pl.BlockSpec((None, R_out, Cout), lambda n: (n, 0, 0))]
    if has_sc:
        out_shapes.append(jax.ShapeDtypeStruct((N, R_out, Csc), jnp.bfloat16))
        out_specs.append(pl.BlockSpec((None, R_out, Csc), lambda n: (n, 0, 0)))

    # VMEM budget: count double buffers for the streamed block AND the
    # constant-index_map operands, plus f32 accumulator / tap staging temps.
    limit = _vmem_limit_bytes()
    w_bytes = w_taps.size * 2 + (ws_mat.size * 2 if has_sc else 0)
    est = (2 * R_in * Cin * 2
           + len(out_shapes) * 2 * R_out * Cout * 2
           + (2 * R_out * Cout * 2 if has_res else 0)
           + 2 * w_bytes
           + 4 * M * Cout * 4 + 2 * M * Cin * 2)
    if est > limit:
        # TODO(synk): H-row tiling with halo DMA for very large spatial extents.
        raise ValueError(f"per-image working set {est} B exceeds VMEM budget {limit} B")

    flops = 2 * N * M * Cin * (9 * Cout + Csc)
    bytes_accessed = int(sum(a.size * a.dtype.itemsize for a in args)
                         + N * R_out * 2 * (Cout + Csc))

    kernel = functools.partial(
        _conv_kernel, tap_offsets=offs, center_idx=4, M=M, Wp_out=Wp_o,
        W_valid=W_valid, out_off=out_off, R_out=R_out, relu=relu,
        has_res=has_res, has_sc=has_sc)

    outs = pl.pallas_call(
        kernel,
        out_shape=tuple(out_shapes),
        grid_spec=pltpu.PrefetchScalarGridSpec(
            num_scalar_prefetch=0,
            grid=(N,),
            in_specs=in_specs,
            out_specs=tuple(out_specs)),
        compiler_params=pltpu.CompilerParams(
            dimension_semantics=("parallel",),
            vmem_limit_bytes=limit),
        cost_estimate=pl.CostEstimate(flops=flops, transcendentals=0,
                                      bytes_accessed=bytes_accessed),
    )(*args)
    if has_sc:
        return outs[0], outs[1], g_out
    return outs[0], None, g_out


# ------------------------------ BasicBlock ------------------------------------
def fold_bn(gamma, beta, mean, var, eps=1e-5):
    scale = gamma / jnp.sqrt(var + eps)
    return scale, beta - mean * scale


def conv3x3_taps(w_oihw, scale):
    """(Cout,Cin,3,3) * per-Cout BN scale (f32) -> (9, Cin, Cout) bf16."""
    w = w_oihw * scale[:, None, None, None]          # fold in f32, then cast
    w = jnp.transpose(w, (2, 3, 1, 0))               # (KH, KW, Cin, Cout)
    KH, KW, Cin, Cout = w.shape
    return w.reshape(KH * KW, Cin, Cout).astype(jnp.bfloat16)


def conv1x1_mat(w_oihw, scale):
    w = w_oihw * scale[:, None, None, None]          # (Cout, Cin, 1, 1)
    return jnp.transpose(w[:, :, 0, 0], (1, 0)).astype(jnp.bfloat16)   # (Cin, Cout)


def basic_block_forward(x_flat, g, params, stride):
    """relu(bn1(conv1 x)) -> bn2(conv2 .) -> + shortcut(x) -> relu, entirely on
    the flat-padded bf16 layout (two pallas_calls per block)."""
    s1, b1 = fold_bn(*params["bn1"])
    s2, b2 = fold_bn(*params["bn2"])
    w1 = conv3x3_taps(params["w1"], s1)
    w2 = conv3x3_taps(params["w2"], s2)

    if "ws" in params:                                   # projection shortcut, fused
        ss, bs = fold_bn(*params["bns"])
        ws = conv1x1_mat(params["ws"], ss)
        out1, shortcut, g1 = fused_conv(x_flat, g, w1, b1, stride=stride,
                                        relu=True, ws_mat=ws, bs_vec=bs)
    else:                                                # identity shortcut
        out1, _, g1 = fused_conv(x_flat, g, w1, b1, stride=stride, relu=True)
        shortcut = x_flat                                # same layout, already bf16

    out2, _, g2 = fused_conv(out1, g1, w2, b2, stride=1, relu=True,
                             res_flat=shortcut)
    return out2, g2


@functools.partial(jax.jit, static_argnames=("stride1", "stride2"))
def two_block_model(x, params1, params2, *, stride1, stride2):
    x_flat, g0 = pack_nchw(x)
    f1, g1 = basic_block_forward(x_flat, g0, params1, stride1)
    f2, g2 = basic_block_forward(f1, g1, params2, stride2)
    return unpack_to_nchw(f1, g1), unpack_to_nchw(f2, g2)


# --------------------------- pure-JAX reference -------------------------------
def reference_forward(x, params, stride, eps=1e-5):
    """Mirrors the kernel numerics: BN scale folded into bf16 conv weights,
    bf16 activations between layers, f32 accumulation."""
    def fold(p):
        g, b, m, v = p
        sc = g / jnp.sqrt(v + eps)
        return sc, b - m * sc

    def conv(inp, w, scale, s, p):
        wf = (w * scale[:, None, None, None]).astype(jnp.bfloat16)
        return lax.conv_general_dilated(
            inp.astype(jnp.bfloat16), wf, (s, s), [(p, p), (p, p)],
            dimension_numbers=("NCHW", "OIHW", "NCHW"),
            preferred_element_type=jnp.float32)

    s1, b1 = fold(params["bn1"])
    s2, b2 = fold(params["bn2"])
    out1 = jax.nn.relu(conv(x, params["w1"], s1, stride, 1)
                       + b1[None, :, None, None])
    out1 = out1.astype(jnp.bfloat16).astype(jnp.float32)
    out2 = conv(out1, params["w2"], s2, 1, 1) + b2[None, :, None, None]
    if "ws" in params:
        ss, bs = fold(params["bns"])
        sc = conv(x, params["ws"], ss, stride, 0) + bs[None, :, None, None]
        sc = sc.astype(jnp.bfloat16).astype(jnp.float32)
    else:
        sc = x.astype(jnp.bfloat16).astype(jnp.float32)
    return jax.nn.relu(out2 + sc)


# ------------------------------- params ---------------------------------------
def make_params(key, in_planes, planes, stride):
    ks = jax.random.split(key, 6)

    def bn_params(k, c):
        k0, k1, k2, k3 = jax.random.split(k, 4)
        gamma = 1.0 + 0.1 * jax.random.normal(k0, (c,), jnp.float32)
        beta = 0.1 * jax.random.normal(k1, (c,), jnp.float32)
        mean = 0.1 * jax.random.normal(k2, (c,), jnp.float32)
        var = jnp.abs(jax.random.normal(k3, (c,), jnp.float32)) + 0.5
        return (gamma, beta, mean, var)

    params = {
        "w1": 0.2 * jax.random.normal(ks[0], (planes, in_planes, 3, 3), jnp.float32),
        "bn1": bn_params(ks[1], planes),
        "w2": 0.2 * jax.random.normal(ks[2], (planes, planes, 3, 3), jnp.float32),
        "bn2": bn_params(ks[3], planes),
    }
    if stride != 1 or in_planes != planes:
        params["ws"] = 0.2 * jax.random.normal(ks[4], (planes, in_planes, 1, 1),
                                               jnp.float32)
        params["bns"] = bn_params(ks[5], planes)
    return params


# --------------------------------- main ----------------------------------------
if __name__ == "__main__":
    key = jax.random.PRNGKey(0)
    kx, kp1, kp2 = jax.random.split(key, 3)

    N, Cin, H, W = 2, 4, 16, 16
    planes = 8
    x = jax.random.normal(kx, (N, Cin, H, W), jnp.float32)
    params1 = make_params(kp1, Cin, planes, stride=2)    # downsampling block
    params2 = make_params(kp2, planes, planes, stride=1)  # identity-shortcut block

    out1, out2 = two_block_model(x, params1, params2, stride1=2, stride2=1)
    out1, out2 = jax.block_until_ready((out1, out2))

    ref1 = reference_forward(x, params1, stride=2)
    ref2 = reference_forward(ref1, params2, stride=1)

    assert out1.shape == (N, planes, H // 2, W // 2)
    assert out2.shape == (N, planes, H // 2, W // 2)
    err1 = float(jnp.max(jnp.abs(out1 - ref1)))
    err2 = float(jnp.max(jnp.abs(out2 - ref2)))
    # bf16 external I/O (by design): tolerance sized for bf16 activations/weights.
    assert jnp.allclose(out1, ref1, atol=1e-2, rtol=1e-2), err1
    assert jnp.allclose(out2, ref2, atol=1e-2, rtol=1e-2), err2

    print("KERNEL_OK")
</pallas_src>

<mosaic_0001>
module attributes {stable_mosaic.version = 11 : i64} {
  func.func @_conv_kernel(%arg0: i32, %arg1: memref<1x608x4xbf16, #tpu.memory_space<vmem>>, %arg2: memref<9x4x8xbf16, #tpu.memory_space<vmem>>, %arg3: memref<1x8xf32, #tpu.memory_space<vmem>>, %arg4: memref<4x8xbf16, #tpu.memory_space<vmem>>, %arg5: memref<1x8xf32, #tpu.memory_space<vmem>>, %arg6: memref<1x176x8xbf16, #tpu.memory_space<vmem>>, %arg7: memref<1x176x8xbf16, #tpu.memory_space<vmem>>) attributes {dimension_semantics = [#tpu.dimension_semantics<parallel>], iteration_bounds = array<i64: 2>, scalar_prefetch = 0 : i64, scratch_operands = 0 : i64, tpu.core_type = #tpu.core_type<tc>, window_params = [{transform_indices = @transform_0, window_bounds = array<i64: 1, 608, 4>}, {pipeline_mode = #tpu.pipeline_mode<synchronous>, transform_indices = @transform_1, window_bounds = array<i64: 9, 4, 8>}, {pipeline_mode = #tpu.pipeline_mode<synchronous>, transform_indices = @transform_2, window_bounds = array<i64: 1, 8>}, {pipeline_mode = #tpu.pipeline_mode<synchronous>, transform_indices = @transform_3, window_bounds = array<i64: 4, 8>}, {pipeline_mode = #tpu.pipeline_mode<synchronous>, transform_indices = @transform_4, window_bounds = array<i64: 1, 8>}, {transform_indices = @transform_5, window_bounds = array<i64: 1, 176, 8>}, {transform_indices = @transform_6, window_bounds = array<i64: 1, 176, 8>}]} {
    %c0 = arith.constant 0 : index
    %c0_0 = arith.constant 0 : index
    %c0_1 = arith.constant 0 : index
    %0 = vector.load %arg1[%c0, %c0_0, %c0_1] : memref<1x608x4xbf16, #tpu.memory_space<vmem>>, vector<1x128x4xbf16>
    %1 = vector.shape_cast %0 : vector<1x128x4xbf16> to vector<128x4xbf16>
    %c0_2 = arith.constant 0 : index
    %c0_3 = arith.constant 0 : index
    %c0_4 = arith.constant 0 : index
    %2 = vector.load %arg2[%c0_2, %c0_3, %c0_4] : memref<9x4x8xbf16, #tpu.memory_space<vmem>>, vector<1x4x8xbf16>
    %3 = vector.shape_cast %2 : vector<1x4x8xbf16> to vector<4x8xbf16>
    %cst = arith.constant dense<0.000000e+00> : vector<128x8xf32>
    %4 = tpu.matmul %1, %3, %cst {dimension_numbers = #tpu.dot_dimension_numbers<[1], [0], [0], [1], [0, 0, 1, 1], [], []>} : vector<128x4xbf16>, vector<4x8xbf16>, vector<128x8xf32> -> vector<128x8xf32>
    %c0_5 = arith.constant 0 : index
    %c152 = arith.constant 152 : index
    %c0_6 = arith.constant 0 : index
    %5 = vector.load %arg1[%c0_5, %c152, %c0_6] : memref<1x608x4xbf16, #tpu.memory_space<vmem>>, vector<1x128x4xbf16>
    %6 = vector.shape_cast %5 : vector<1x128x4xbf16> to vector<128x4xbf16>
    %c1 = arith.constant 1 : index
    %c0_7 = arith.constant 0 : index
    %c0_8 = arith.constant 0 : index
    %7 = vector.load %arg2[%c1, %c0_7, %c0_8] : memref<9x4x8xbf16, #tpu.memory_space<vmem>>, vector<1x4x8xbf16>
    %8 = vector.shape_cast %7 : vector<1x4x8xbf16> to vector<4x8xbf16>
    %cst_9 = arith.constant dense<0.000000e+00> : vector<128x8xf32>
    %9 = tpu.matmul %6, %8, %cst_9 {dimension_numbers = #tpu.dot_dimension_numbers<[1], [0], [0], [1], [0, 0, 1, 1], [], []>} : vector<128x4xbf16>, vector<4x8xbf16>, vector<128x8xf32> -> vector<128x8xf32>
    %10 = arith.addf %4, %9 : vector<128x8xf32>
    %c0_10 = arith.constant 0 : index
    %c1_11 = arith.constant 1 : index
    %c0_12 = arith.constant 0 : index
    %11 = vector.load %arg1[%c0_10, %c1_11, %c0_12] : memref<1x608x4xbf16, #tpu.memory_space<vmem>>, vector<1x128x4xbf16>
    %12 = vector.shape_cast %11 : vector<1x128x4xbf16> to vector<128x4xbf16>
    %c2 = arith.constant 2 : index
    %c0_13 = arith.constant 0 : index
    %c0_14 = arith.constant 0 : index
    %13 = vector.load %arg2[%c2, %c0_13, %c0_14] : memref<9x4x8xbf16, #tpu.memory_space<vmem>>, vector<1x4x8xbf16>
    %14 = vector.shape_cast %13 : vector<1x4x8xbf16> to vector<4x8xbf16>
    %cst_15 = arith.constant dense<0.000000e+00> : vector<128x8xf32>
    %15 = tpu.matmul %12, %14, %cst_15 {dimension_numbers = #tpu.dot_dimension_numbers<[1], [0], [0], [1], [0, 0, 1, 1], [], []>} : vector<128x4xbf16>, vector<4x8xbf16>, vector<128x8xf32> -> vector<128x8xf32>
    %16 = arith.addf %10, %15 : vector<128x8xf32>
    %c0_16 = arith.constant 0 : index
    %c304 = arith.constant 304 : index
    %c0_17 = arith.constant 0 : index
    %17 = vector.load %arg1[%c0_16, %c304, %c0_17] : memref<1x608x4xbf16, #tpu.memory_space<vmem>>, vector<1x128x4xbf16>
    %18 = vector.shape_cast %17 : vector<1x128x4xbf16> to vector<128x4xbf16>
    %c3 = arith.constant 3 : index
    %c0_18 = arith.constant 0 : index
    %c0_19 = arith.constant 0 : index
    %19 = vector.load %arg2[%c3, %c0_18, %c0_19] : memref<9x4x8xbf16, #tpu.memory_space<vmem>>, vector<1x4x8xbf16>
    %20 = vector.shape_cast %19 : vector<1x4x8xbf16> to vector<4x8xbf16>
    %cst_20 = arith.constant dense<0.000000e+00> : vector<128x8xf32>
    %21 = tpu.matmul %18, %20, %cst_20 {dimension_numbers = #tpu.dot_dimension_numbers<[1], [0], [0], [1], [0, 0, 1, 1], [], []>} : vector<128x4xbf16>, vector<4x8xbf16>, vector<128x8xf32> -> vector<128x8xf32>
    %22 = arith.addf %16, %21 : vector<128x8xf32>
    %c0_21 = arith.constant 0 : index
    %c456 = arith.constant 456 : index
    %c0_22 = arith.constant 0 : index
    %23 = vector.load %arg1[%c0_21, %c456, %c0_22] : memref<1x608x4xbf16, #tpu.memory_space<vmem>>, vector<1x128x4xbf16>
    %24 = vector.shape_cast %23 : vector<1x128x4xbf16> to vector<128x4xbf16>
    %c4 = arith.constant 4 : index
    %c0_23 = arith.constant 0 : index
    %c0_24 = arith.constant 0 : index
    %25 = vector.load %arg2[%c4, %c0_23, %c0_24] : memref<9x4x8xbf16, #tpu.memory_space<vmem>>, vector<1x4x8xbf16>
    %26 = vector.shape_cast %25 : vector<1x4x8xbf16> to vector<4x8xbf16>
    %cst_25 = arith.constant dense<0.000000e+00> : vector<128x8xf32>
    %27 = tpu.matmul %24, %26, %cst_25 {dimension_numbers = #tpu.dot_dimension_numbers<[1], [0], [0], [1], [0, 0, 1, 1], [], []>} : vector<128x4xbf16>, vector<4x8xbf16>, vector<128x8xf32> -> vector<128x8xf32>
    %28 = arith.addf %22, %27 : vector<128x8xf32>
    %c0_26 = arith.constant 0 : index
    %c305 = arith.constant 305 : index
    %c0_27 = arith.constant 0 : index
    %29 = vector.load %arg1[%c0_26, %c305, %c0_27] : memref<1x608x4xbf16, #tpu.memory_space<vmem>>, vector<1x128x4xbf16>
    %30 = vector.shape_cast %29 : vector<1x128x4xbf16> to vector<128x4xbf16>
    %c5 = arith.constant 5 : index
    %c0_28 = arith.constant 0 : index
    %c0_29 = arith.constant 0 : index
    %31 = vector.load %arg2[%c5, %c0_28, %c0_29] : memref<9x4x8xbf16, #tpu.memory_space<vmem>>, vector<1x4x8xbf16>
    %32 = vector.shape_cast %31 : vector<1x4x8xbf16> to vector<4x8xbf16>
    %cst_30 = arith.constant dense<0.000000e+00> : vector<128x8xf32>
    %33 = tpu.matmul %30, %32, %cst_30 {dimension_numbers = #tpu.dot_dimension_numbers<[1], [0], [0], [1], [0, 0, 1, 1], [], []>} : vector<128x4xbf16>, vector<4x8xbf16>, vector<128x8xf32> -> vector<128x8xf32>
    %34 = arith.addf %28, %33 : vector<128x8xf32>
    %c0_31 = arith.constant 0 : index
    %c16 = arith.constant 16 : index
    %c0_32 = arith.constant 0 : index
    %35 = vector.load %arg1[%c0_31, %c16, %c0_32] : memref<1x608x4xbf16, #tpu.memory_space<vmem>>, vector<1x128x4xbf16>
    %36 = vector.shape_cast %35 : vector<1x128x4xbf16> to vector<128x4xbf16>
    %c6 = arith.constant 6 : index
    %c0_33 = arith.constant 0 : index
    %c0_34 = arith.constant 0 : index
    %37 = vector.load %arg2[%c6, %c0_33, %c0_34] : memref<9x4x8xbf16, #tpu.memory_space<vmem>>, vector<1x4x8xbf16>
    %38 = vector.shape_cast %37 : vector<1x4x8xbf16> to vector<4x8xbf16>
    %cst_35 = arith.constant dense<0.000000e+00> : vector<128x8xf32>
    %39 = tpu.matmul %36, %38, %cst_35 {dimension_numbers = #tpu.dot_dimension_numbers<[1], [0], [0], [1], [0, 0, 1, 1], [], []>} : vector<128x4xbf16>, vector<4x8xbf16>, vector<128x8xf32> -> vector<128x8xf32>
    %40 = arith.addf %34, %39 : vector<128x8xf32>
    %c0_36 = arith.constant 0 : index
    %c168 = arith.constant 168 : index
    %c0_37 = arith.constant 0 : index
    %41 = vector.load %arg1[%c0_36, %c168, %c0_37] : memref<1x608x4xbf16, #tpu.memory_space<vmem>>, vector<1x128x4xbf16>
    %42 = vector.shape_cast %41 : vector<1x128x4xbf16> to vector<128x4xbf16>
    %c7 = arith.constant 7 : index
    %c0_38 = arith.constant 0 : index
    %c0_39 = arith.constant 0 : index
    %43 = vector.load %arg2[%c7, %c0_38, %c0_39] : memref<9x4x8xbf16, #tpu.memory_space<vmem>>, vector<1x4x8xbf16>
    %44 = vector.shape_cast %43 : vector<1x4x8xbf16> to vector<4x8xbf16>
    %cst_40 = arith.constant dense<0.000000e+00> : vector<128x8xf32>
    %45 = tpu.matmul %42, %44, %cst_40 {dimension_numbers = #tpu.dot_dimension_numbers<[1], [0], [0], [1], [0, 0, 1, 1], [], []>} : vector<128x4xbf16>, vector<4x8xbf16>, vector<128x8xf32> -> vector<128x8xf32>
    %46 = arith.addf %40, %45 : vector<128x8xf32>
    %c0_41 = arith.constant 0 : index
    %c17 = arith.constant 17 : index
    %c0_42 = arith.constant 0 : index
    %47 = vector.load %arg1[%c0_41, %c17, %c0_42] : memref<1x608x4xbf16, #tpu.memory_space<vmem>>, vector<1x128x4xbf16>
    %48 = vector.shape_cast %47 : vector<1x128x4xbf16> to vector<128x4xbf16>
    %c8 = arith.constant 8 : index
    %c0_43 = arith.constant 0 : index
    %c0_44 = arith.constant 0 : index
    %49 = vector.load %arg2[%c8, %c0_43, %c0_44] : memref<9x4x8xbf16, #tpu.memory_space<vmem>>, vector<1x4x8xbf16>
    %50 = vector.shape_cast %49 : vector<1x4x8xbf16> to vector<4x8xbf16>
    %cst_45 = arith.constant dense<0.000000e+00> : vector<128x8xf32>
    %51 = tpu.matmul %48, %50, %cst_45 {dimension_numbers = #tpu.dot_dimension_numbers<[1], [0], [0], [1], [0, 0, 1, 1], [], []>} : vector<128x4xbf16>, vector<4x8xbf16>, vector<128x8xf32> -> vector<128x8xf32>
    %52 = arith.addf %46, %51 : vector<128x8xf32>
    %c0_46 = arith.constant 0 : index
    %c0_47 = arith.constant 0 : index
    %53 = vector.load %arg3[%c0_46, %c0_47] : memref<1x8xf32, #tpu.memory_space<vmem>>, vector<1x8xf32>
    %54 = vector.broadcast %53 : vector<1x8xf32> to vector<128x8xf32>
    %55 = arith.addf %52, %54 : vector<128x8xf32>
    %cst_48 = arith.constant 0.000000e+00 : f32
    %56 = vector.broadcast %cst_48 : f32 to vector<128x8xf32>
    %57 = arith.maximumf %55, %56 : vector<128x8xf32>
    %58 = tpu.iota {dimensions = array<i32: 0>} : vector<128x1xi32>
    %c16_i32 = arith.constant 16 : i32
    %c0_i32 = arith.constant 0 : i32
    %59 = arith.cmpi eq, %c16_i32, %c0_i32 : i32
    %c1_i32 = arith.constant 1 : i32
    %60 = arith.select %59, %c1_i32, %c16_i32 : i32
    %61 = vector.broadcast %60 : i32 to vector<128x1xi32>
    %62 = arith.remsi %58, %61 : vector<128x1xi32>
    %c0_i32_49 = arith.constant 0 : i32
    %63 = vector.broadcast %c0_i32_49 : i32 to vector<128x1xi32>
    %64 = arith.cmpi ne, %62, %63 : vector<128x1xi32>
    %c0_i32_50 = arith.constant 0 : i32
    %65 = vector.broadcast %c0_i32_50 : i32 to vector<128x1xi32>
    %66 = arith.cmpi slt, %62, %65 : vector<128x1xi32>
    %c0_i32_51 = arith.constant 0 : i32
    %67 = arith.cmpi slt, %60, %c0_i32_51 : i32
    %68 = vector.broadcast %67 : i1 to vector<128x1xi1>
    %69 = vector.broadcast %68 : vector<128x1xi1> to vector<128x1xi1>
    %70 = arith.xori %66, %69 : vector<128x1xi1>
    %71 = arith.andi %70, %64 : vector<128x1xi1>
    %72 = vector.broadcast %60 : i32 to vector<128x1xi32>
    %73 = arith.addi %62, %72 : vector<128x1xi32>
    %74 = arith.select %71, %73, %62 : vector<128x1xi1>, vector<128x1xi32>
    %c8_i32 = arith.constant 8 : i32
    %75 = vector.broadcast %c8_i32 : i32 to vector<128x1xi32>
    %76 = arith.cmpi slt, %74, %75 : vector<128x1xi32>
    %cst_52 = arith.constant 0.000000e+00 : f32
    %77 = vector.shape_cast %76 : vector<128x1xi1> to vector<128x1xi1>
    %78 = vector.broadcast %77 : vector<128x1xi1> to vector<128x8xi1>
    %79 = vector.broadcast %cst_52 : f32 to vector<128x8xf32>
    %80 = arith.select %78, %57, %79 : vector<128x8xi1>, vector<128x8xf32>
    %cst_53 = arith.constant 0.000000e+00 : bf16
    %81 = vector.broadcast %cst_53 : bf16 to vector<24x8xbf16>
    %c0_54 = arith.constant 0 : index
    %c0_55 = arith.constant 0 : index
    %c0_56 = arith.constant 0 : index
    %82 = vector.load %arg6[%c0_54, %c0_55, %c0_56] : memref<1x176x8xbf16, #tpu.memory_space<vmem>>, vector<1x24x8xbf16>
    %83 = vector.shape_cast %82 : vector<1x24x8xbf16> to vector<24x8xbf16>
    %84 = vector.shape_cast %81 : vector<24x8xbf16> to vector<1x24x8xbf16>
    tpu.vector_store %arg6[%c0_54, %c0_55, %c0_56], %84 {strides = array<i32>} : memref<1x176x8xbf16, #tpu.memory_space<vmem>>, vector<1x24x8xbf16>,
    %cst_57 = arith.constant 0.000000e+00 : bf16
    %85 = vector.broadcast %cst_57 : bf16 to vector<24x8xbf16>
    %c0_58 = arith.constant 0 : index
    %c152_59 = arith.constant 152 : index
    %c0_60 = arith.constant 0 : index
    %86 = vector.load %arg6[%c0_58, %c152_59, %c0_60] : memref<1x176x8xbf16, #tpu.memory_space<vmem>>, vector<1x24x8xbf16>
    %87 = vector.shape_cast %86 : vector<1x24x8xbf16> to vector<24x8xbf16>
    %88 = vector.shape_cast %85 : vector<24x8xbf16> to vector<1x24x8xbf16>
    tpu.vector_store %arg6[%c0_58, %c152_59, %c0_60], %88 {strides = array<i32>} : memref<1x176x8xbf16, #tpu.memory_space<vmem>>, vector<1x24x8xbf16>,
    %89 = arith.truncf %80 : vector<128x8xf32> to vector<128x8xbf16>
    %c0_61 = arith.constant 0 : index
    %c24 = arith.constant 24 : index
    %c0_62 = arith.constant 0 : index
    %90 = vector.load %arg6[%c0_61, %c24, %c0_62] : memref<1x176x8xbf16, #tpu.memory_space<vmem>>, vector<1x128x8xbf16>
    %91 = vector.shape_cast %90 : vector<1x128x8xbf16> to vector<128x8xbf16>
    %92 = vector.shape_cast %89 : vector<128x8xbf16> to vector<1x128x8xbf16>
    tpu.vector_store %arg6[%c0_61, %c24, %c0_62], %92 {strides = array<i32>} : memref<1x176x8xbf16, #tpu.memory_space<vmem>>, vector<1x128x8xbf16>,
    %c0_63 = arith.constant 0 : index
    %c0_64 = arith.constant 0 : index
    %93 = vector.load %arg4[%c0_63, %c0_64] : memref<4x8xbf16, #tpu.memory_space<vmem>>, vector<4x8xbf16>
    %cst_65 = arith.constant dense<0.000000e+00> : vector<128x8xf32>
    %94 = tpu.matmul %24, %93, %cst_65 {dimension_numbers = #tpu.dot_dimension_numbers<[1], [0], [0], [1], [0, 0, 1, 1], [], []>} : vector<128x4xbf16>, vector<4x8xbf16>, vector<128x8xf32> -> vector<128x8xf32>
    %c0_66 = arith.constant 0 : index
    %c0_67 = arith.constant 0 : index
    %95 = vector.load %arg5[%c0_66, %c0_67] : memref<1x8xf32, #tpu.memory_space<vmem>>, vector<1x8xf32>
    %96 = vector.broadcast %95 : vector<1x8xf32> to vector<128x8xf32>
    %97 = arith.addf %94, %96 : vector<128x8xf32>
    %cst_68 = arith.constant 0.000000e+00 : f32
    %98 = vector.shape_cast %76 : vector<128x1xi1> to vector<128x1xi1>
    %99 = vector.broadcast %98 : vector<128x1xi1> to vector<128x8xi1>
    %100 = vector.broadcast %cst_68 : f32 to vector<128x8xf32>
    %101 = arith.select %99, %97, %100 : vector<128x8xi1>, vector<128x8xf32>
    %cst_69 = arith.constant 0.000000e+00 : bf16
    %102 = vector.broadcast %cst_69 : bf16 to vector<24x8xbf16>
    %c0_70 = arith.constant 0 : index
    %c0_71 = arith.constant 0 : index
    %c0_72 = arith.constant 0 : index
    %103 = vector.load %arg7[%c0_70, %c0_71, %c0_72] : memref<1x176x8xbf16, #tpu.memory_space<vmem>>, vector<1x24x8xbf16>
    %104 = vector.shape_cast %103 : vector<1x24x8xbf16> to vector<24x8xbf16>
    %105 = vector.shape_cast %102 : vector<24x8xbf16> to vector<1x24x8xbf16>
    tpu.vector_store %arg7[%c0_70, %c0_71, %c0_72], %105 {strides = array<i32>} : memref<1x176x8xbf16, #tpu.memory_space<vmem>>, vector<1x24x8xbf16>,
    %cst_73 = arith.constant 0.000000e+00 : bf16
    %106 = vector.broadcast %cst_73 : bf16 to vector<24x8xbf16>
    %c0_74 = arith.constant 0 : index
    %c152_75 = arith.constant 152 : index
    %c0_76 = arith.constant 0 : index
    %107 = vector.load %arg7[%c0_74, %c152_75, %c0_76] : memref<1x176x8xbf16, #tpu.memory_space<vmem>>, vector<1x24x8xbf16>
    %108 = vector.shape_cast %107 : vector<1x24x8xbf16> to vector<24x8xbf16>
    %109 = vector.shape_cast %106 : vector<24x8xbf16> to vector<1x24x8xbf16>
    tpu.vector_store %arg7[%c0_74, %c152_75, %c0_76], %109 {strides = array<i32>} : memref<1x176x8xbf16, #tpu.memory_space<vmem>>, vector<1x24x8xbf16>,
    %110 = arith.truncf %101 : vector<128x8xf32> to vector<128x8xbf16>
    %c0_77 = arith.constant 0 : index
    %c24_78 = arith.constant 24 : index
    %c0_79 = arith.constant 0 : index
    %111 = vector.load %arg7[%c0_77, %c24_78, %c0_79] : memref<1x176x8xbf16, #tpu.memory_space<vmem>>, vector<1x128x8xbf16>
    %112 = vector.shape_cast %111 : vector<1x128x8xbf16> to vector<128x8xbf16>
    %113 = vector.shape_cast %110 : vector<128x8xbf16> to vector<1x128x8xbf16>
    tpu.vector_store %arg7[%c0_77, %c24_78, %c0_79], %113 {strides = array<i32>} : memref<1x176x8xbf16, #tpu.memory_space<vmem>>, vector<1x128x8xbf16>,
    return
  }
  func.func @transform_0(%arg0: i32) -> (i32, i32, i32) {
    %c0_i32 = arith.constant 0 : i32
    %c0_i32_0 = arith.constant 0 : i32
    %c0_i32_1 = arith.constant 0 : i32
    return %arg0, %c0_i32, %c0_i32_0 : i32, i32, i32
  }
  func.func @transform_1(%arg0: i32) -> (i32, i32, i32) {
    %c0_i32 = arith.constant 0 : i32
    %c0_i32_0 = arith.constant 0 : i32
    %c0_i32_1 = arith.constant 0 : i32
    %c0_i32_2 = arith.constant 0 : i32
    return %c0_i32, %c0_i32_0, %c0_i32_1 : i32, i32, i32
  }
  func.func @transform_2(%arg0: i32) -> (i32, i32) {
    %c0_i32 = arith.constant 0 : i32
    %c0_i32_0 = arith.constant 0 : i32
    %c0_i32_1 = arith.constant 0 : i32
    return %c0_i32, %c0_i32_0 : i32, i32
  }
  func.func @transform_3(%arg0: i32) -> (i32, i32) {
    %c0_i32 = arith.constant 0 : i32
    %c0_i32_0 = arith.constant 0 : i32
    %c0_i32_1 = arith.constant 0 : i32
    return %c0_i32, %c0_i32_0 : i32, i32
  }
  func.func @transform_4(%arg0: i32) -> (i32, i32) {
    %c0_i32 = arith.constant 0 : i32
    %c0_i32_0 = arith.constant 0 : i32
    %c0_i32_1 = arith.constant 0 : i32
    return %c0_i32, %c0_i32_0 : i32, i32
  }
  func.func @transform_5(%arg0: i32) -> (i32, i32, i32) {
    %c0_i32 = arith.constant 0 : i32
    %c0_i32_0 = arith.constant 0 : i32
    %c0_i32_1 = arith.constant 0 : i32
    return %arg0, %c0_i32, %c0_i32_0 : i32, i32, i32
  }
  func.func @transform_6(%arg0: i32) -> (i32, i32, i32) {
    %c0_i32 = arith.constant 0 : i32
    %c0_i32_0 = arith.constant 0 : i32
    %c0_i32_1 = arith.constant 0 : i32
    return %arg0, %c0_i32, %c0_i32_0 : i32, i32, i32
  }
}

module attributes {stable_mosaic.version = 11 : i64} {
  func.func @_conv_kernel(%arg0: i32, %arg1: memref<1x176x8xbf16, #tpu.memory_space<vmem>>, %arg2: memref<9x8x8xbf16, #tpu.memory_space<vmem>>, %arg3: memref<1x8xf32, #tpu.memory_space<vmem>>, %arg4: memref<1x176x8xbf16, #tpu.memory_space<vmem>>, %arg5: memref<1x176x8xbf16, #tpu.memory_space<vmem>>) attributes {dimension_semantics = [#tpu.dimension_semantics<parallel>], iteration_bounds = array<i64: 2>, scalar_prefetch = 0 : i64, scratch_operands = 0 : i64, tpu.core_type = #tpu.core_type<tc>, window_params = [{transform_indices = @transform_0, window_bounds = array<i64: 1, 176, 8>}, {pipeline_mode = #tpu.pipeline_mode<synchronous>, transform_indices = @transform_1, window_bounds = array<i64: 9, 8, 8>}, {pipeline_mode = #tpu.pipeline_mode<synchronous>, transform_indices = @transform_2, window_bounds = array<i64: 1, 8>}, {transform_indices = @transform_3, window_bounds = array<i64: 1, 176, 8>}, {transform_indices = @transform_4, window_bounds = array<i64: 1, 176, 8>}]} {
    %c0 = arith.constant 0 : index
    %c7 = arith.constant 7 : index
    %c0_0 = arith.constant 0 : index
    %0 = vector.load %arg1[%c0, %c7, %c0_0] : memref<1x176x8xbf16, #tpu.memory_space<vmem>>, vector<1x128x8xbf16>
    %1 = vector.shape_cast %0 : vector<1x128x8xbf16> to vector<128x8xbf16>
    %c0_1 = arith.constant 0 : index
    %c0_2 = arith.constant 0 : index
    %c0_3 = arith.constant 0 : index
    %2 = vector.load %arg2[%c0_1, %c0_2, %c0_3] : memref<9x8x8xbf16, #tpu.memory_space<vmem>>, vector<1x8x8xbf16>
    %3 = vector.shape_cast %2 : vector<1x8x8xbf16> to vector<8x8xbf16>
    %cst = arith.constant dense<0.000000e+00> : vector<128x8xf32>
    %4 = tpu.matmul %1, %3, %cst {dimension_numbers = #tpu.dot_dimension_numbers<[1], [0], [0], [1], [0, 0, 1, 1], [], []>} : vector<128x8xbf16>, vector<8x8xbf16>, vector<128x8xf32> -> vector<128x8xf32>
    %c0_4 = arith.constant 0 : index
    %c8 = arith.constant 8 : index
    %c0_5 = arith.constant 0 : index
    %5 = vector.load %arg1[%c0_4, %c8, %c0_5] : memref<1x176x8xbf16, #tpu.memory_space<vmem>>, vector<1x128x8xbf16>
    %6 = vector.shape_cast %5 : vector<1x128x8xbf16> to vector<128x8xbf16>
    %c1 = arith.constant 1 : index
    %c0_6 = arith.constant 0 : index
    %c0_7 = arith.constant 0 : index
    %7 = vector.load %arg2[%c1, %c0_6, %c0_7] : memref<9x8x8xbf16, #tpu.memory_space<vmem>>, vector<1x8x8xbf16>
    %8 = vector.shape_cast %7 : vector<1x8x8xbf16> to vector<8x8xbf16>
    %cst_8 = arith.constant dense<0.000000e+00> : vector<128x8xf32>
    %9 = tpu.matmul %6, %8, %cst_8 {dimension_numbers = #tpu.dot_dimension_numbers<[1], [0], [0], [1], [0, 0, 1, 1], [], []>} : vector<128x8xbf16>, vector<8x8xbf16>, vector<128x8xf32> -> vector<128x8xf32>
    %10 = arith.addf %4, %9 : vector<128x8xf32>
    %c0_9 = arith.constant 0 : index
    %c9 = arith.constant 9 : index
    %c0_10 = arith.constant 0 : index
    %11 = vector.load %arg1[%c0_9, %c9, %c0_10] : memref<1x176x8xbf16, #tpu.memory_space<vmem>>, vector<1x128x8xbf16>
    %12 = vector.shape_cast %11 : vector<1x128x8xbf16> to vector<128x8xbf16>
    %c2 = arith.constant 2 : index
    %c0_11 = arith.constant 0 : index
    %c0_12 = arith.constant 0 : index
    %13 = vector.load %arg2[%c2, %c0_11, %c0_12] : memref<9x8x8xbf16, #tpu.memory_space<vmem>>, vector<1x8x8xbf16>
    %14 = vector.shape_cast %13 : vector<1x8x8xbf16> to vector<8x8xbf16>
    %cst_13 = arith.constant dense<0.000000e+00> : vector<128x8xf32>
    %15 = tpu.matmul %12, %14, %cst_13 {dimension_numbers = #tpu.dot_dimension_numbers<[1], [0], [0], [1], [0, 0, 1, 1], [], []>} : vector<128x8xbf16>, vector<8x8xbf16>, vector<128x8xf32> -> vector<128x8xf32>
    %16 = arith.addf %10, %15 : vector<128x8xf32>
    %c0_14 = arith.constant 0 : index
    %c23 = arith.constant 23 : index
    %c0_15 = arith.constant 0 : index
    %17 = vector.load %arg1[%c0_14, %c23, %c0_15] : memref<1x176x8xbf16, #tpu.memory_space<vmem>>, vector<1x128x8xbf16>
    %18 = vector.shape_cast %17 : vector<1x128x8xbf16> to vector<128x8xbf16>
    %c3 = arith.constant 3 : index
    %c0_16 = arith.constant 0 : index
    %c0_17 = arith.constant 0 : index
    %19 = vector.load %arg2[%c3, %c0_16, %c0_17] : memref<9x8x8xbf16, #tpu.memory_space<vmem>>, vector<1x8x8xbf16>
    %20 = vector.shape_cast %19 : vector<1x8x8xbf16> to vector<8x8xbf16>
    %cst_18 = arith.constant dense<0.000000e+00> : vector<128x8xf32>
    %21 = tpu.matmul %18, %20, %cst_18 {dimension_numbers = #tpu.dot_dimension_numbers<[1], [0], [0], [1], [0, 0, 1, 1], [], []>} : vector<128x8xbf16>, vector<8x8xbf16>, vector<128x8xf32> -> vector<128x8xf32>
    %22 = arith.addf %16, %21 : vector<128x8xf32>
    %c0_19 = arith.constant 0 : index
    %c24 = arith.constant 24 : index
    %c0_20 = arith.constant 0 : index
    %23 = vector.load %arg1[%c0_19, %c24, %c0_20] : memref<1x176x8xbf16, #tpu.memory_space<vmem>>, vector<1x128x8xbf16>
    %24 = vector.shape_cast %23 : vector<1x128x8xbf16> to vector<128x8xbf16>
    %c4 = arith.constant 4 : index
    %c0_21 = arith.constant 0 : index
    %c0_22 = arith.constant 0 : index
    %25 = vector.load %arg2[%c4, %c0_21, %c0_22] : memref<9x8x8xbf16, #tpu.memory_space<vmem>>, vector<1x8x8xbf16>
    %26 = vector.shape_cast %25 : vector<1x8x8xbf16> to vector<8x8xbf16>
    %cst_23 = arith.constant dense<0.000000e+00> : vector<128x8xf32>
    %27 = tpu.matmul %24, %26, %cst_23 {dimension_numbers = #tpu.dot_dimension_numbers<[1], [0], [0], [1], [0, 0, 1, 1], [], []>} : vector<128x8xbf16>, vector<8x8xbf16>, vector<128x8xf32> -> vector<128x8xf32>
    %28 = arith.addf %22, %27 : vector<128x8xf32>
    %c0_24 = arith.constant 0 : index
    %c25 = arith.constant 25 : index
    %c0_25 = arith.constant 0 : index
    %29 = vector.load %arg1[%c0_24, %c25, %c0_25] : memref<1x176x8xbf16, #tpu.memory_space<vmem>>, vector<1x128x8xbf16>
    %30 = vector.shape_cast %29 : vector<1x128x8xbf16> to vector<128x8xbf16>
    %c5 = arith.constant 5 : index
    %c0_26 = arith.constant 0 : index
    %c0_27 = arith.constant 0 : index
    %31 = vector.load %arg2[%c5, %c0_26, %c0_27] : memref<9x8x8xbf16, #tpu.memory_space<vmem>>, vector<1x8x8xbf16>
    %32 = vector.shape_cast %31 : vector<1x8x8xbf16> to vector<8x8xbf16>
    %cst_28 = arith.constant dense<0.000000e+00> : vector<128x8xf32>
    %33 = tpu.matmul %30, %32, %cst_28 {dimension_numbers = #tpu.dot_dimension_numbers<[1], [0], [0], [1], [0, 0, 1, 1], [], []>} : vector<128x8xbf16>, vector<8x8xbf16>, vector<128x8xf32> -> vector<128x8xf32>
    %34 = arith.addf %28, %33 : vector<128x8xf32>
    %c0_29 = arith.constant 0 : index
    %c39 = arith.constant 39 : index
    %c0_30 = arith.constant 0 : index
    %35 = vector.load %arg1[%c0_29, %c39, %c0_30] : memref<1x176x8xbf16, #tpu.memory_space<vmem>>, vector<1x128x8xbf16>
    %36 = vector.shape_cast %35 : vector<1x128x8xbf16> to vector<128x8xbf16>
    %c6 = arith.constant 6 : index
    %c0_31 = arith.constant 0 : index
    %c0_32 = arith.constant 0 : index
    %37 = vector.load %arg2[%c6, %c0_31, %c0_32] : memref<9x8x8xbf16, #tpu.memory_space<vmem>>, vector<1x8x8xbf16>
    %38 = vector.shape_cast %37 : vector<1x8x8xbf16> to vector<8x8xbf16>
    %cst_33 = arith.constant dense<0.000000e+00> : vector<128x8xf32>
    %39 = tpu.matmul %36, %38, %cst_33 {dimension_numbers = #tpu.dot_dimension_numbers<[1], [0], [0], [1], [0, 0, 1, 1], [], []>} : vector<128x8xbf16>, vector<8x8xbf16>, vector<128x8xf32> -> vector<128x8xf32>
    %40 = arith.addf %34, %39 : vector<128x8xf32>
    %c0_34 = arith.constant 0 : index
    %c40 = arith.constant 40 : index
    %c0_35 = arith.constant 0 : index
    %41 = vector.load %arg1[%c0_34, %c40, %c0_35] : memref<1x176x8xbf16, #tpu.memory_space<vmem>>, vector<1x128x8xbf16>
    %42 = vector.shape_cast %41 : vector<1x128x8xbf16> to vector<128x8xbf16>
    %c7_36 = arith.constant 7 : index
    %c0_37 = arith.constant 0 : index
    %c0_38 = arith.constant 0 : index
    %43 = vector.load %arg2[%c7_36, %c0_37, %c0_38] : memref<9x8x8xbf16, #tpu.memory_space<vmem>>, vector<1x8x8xbf16>
    %44 = vector.shape_cast %43 : vector<1x8x8xbf16> to vector<8x8xbf16>
    %cst_39 = arith.constant dense<0.000000e+00> : vector<128x8xf32>
    %45 = tpu.matmul %42, %44, %cst_39 {dimension_numbers = #tpu.dot_dimension_numbers<[1], [0], [0], [1], [0, 0, 1, 1], [], []>} : vector<128x8xbf16>, vector<8x8xbf16>, vector<128x8xf32> -> vector<128x8xf32>
    %46 = arith.addf %40, %45 : vector<128x8xf32>
    %c0_40 = arith.constant 0 : index
    %c41 = arith.constant 41 : index
    %c0_41 = arith.constant 0 : index
    %47 = vector.load %arg1[%c0_40, %c41, %c0_41] : memref<1x176x8xbf16, #tpu.memory_space<vmem>>, vector<1x128x8xbf16>
    %48 = vector.shape_cast %47 : vector<1x128x8xbf16> to vector<128x8xbf16>
    %c8_42 = arith.constant 8 : index
    %c0_43 = arith.constant 0 : index
    %c0_44 = arith.constant 0 : index
    %49 = vector.load %arg2[%c8_42, %c0_43, %c0_44] : memref<9x8x8xbf16, #tpu.memory_space<vmem>>, vector<1x8x8xbf16>
    %50 = vector.shape_cast %49 : vector<1x8x8xbf16> to vector<8x8xbf16>
    %cst_45 = arith.constant dense<0.000000e+00> : vector<128x8xf32>
    %51 = tpu.matmul %48, %50, %cst_45 {dimension_numbers = #tpu.dot_dimension_numbers<[1], [0], [0], [1], [0, 0, 1, 1], [], []>} : vector<128x8xbf16>, vector<8x8xbf16>, vector<128x8xf32> -> vector<128x8xf32>
    %52 = arith.addf %46, %51 : vector<128x8xf32>
    %c0_46 = arith.constant 0 : index
    %c0_47 = arith.constant 0 : index
    %53 = vector.load %arg3[%c0_46, %c0_47] : memref<1x8xf32, #tpu.memory_space<vmem>>, vector<1x8xf32>
    %54 = vector.broadcast %53 : vector<1x8xf32> to vector<128x8xf32>
    %55 = arith.addf %52, %54 : vector<128x8xf32>
    %c0_48 = arith.constant 0 : index
    %c24_49 = arith.constant 24 : index
    %c0_50 = arith.constant 0 : index
    %56 = vector.load %arg4[%c0_48, %c24_49, %c0_50] : memref<1x176x8xbf16, #tpu.memory_space<vmem>>, vector<1x128x8xbf16>
    %57 = vector.shape_cast %56 : vector<1x128x8xbf16> to vector<128x8xbf16>
    %58 = arith.extf %57 : vector<128x8xbf16> to vector<128x8xf32>
    %59 = arith.addf %55, %58 : vector<128x8xf32>
    %cst_51 = arith.constant 0.000000e+00 : f32
    %60 = vector.broadcast %cst_51 : f32 to vector<128x8xf32>
    %61 = arith.maximumf %59, %60 : vector<128x8xf32>
    %62 = tpu.iota {dimensions = array<i32: 0>} : vector<128x1xi32>
    %c16_i32 = arith.constant 16 : i32
    %c0_i32 = arith.constant 0 : i32
    %63 = arith.cmpi eq, %c16_i32, %c0_i32 : i32
    %c1_i32 = arith.constant 1 : i32
    %64 = arith.select %63, %c1_i32, %c16_i32 : i32
    %65 = vector.broadcast %64 : i32 to vector<128x1xi32>
    %66 = arith.remsi %62, %65 : vector<128x1xi32>
    %c0_i32_52 = arith.constant 0 : i32
    %67 = vector.broadcast %c0_i32_52 : i32 to vector<128x1xi32>
    %68 = arith.cmpi ne, %66, %67 : vector<128x1xi32>
    %c0_i32_53 = arith.constant 0 : i32
    %69 = vector.broadcast %c0_i32_53 : i32 to vector<128x1xi32>
    %70 = arith.cmpi slt, %66, %69 : vector<128x1xi32>
    %c0_i32_54 = arith.constant 0 : i32
    %71 = arith.cmpi slt, %64, %c0_i32_54 : i32
    %72 = vector.broadcast %71 : i1 to vector<128x1xi1>
    %73 = vector.broadcast %72 : vector<128x1xi1> to vector<128x1xi1>
    %74 = arith.xori %70, %73 : vector<128x1xi1>
    %75 = arith.andi %74, %68 : vector<128x1xi1>
    %76 = vector.broadcast %64 : i32 to vector<128x1xi32>
    %77 = arith.addi %66, %76 : vector<128x1xi32>
    %78 = arith.select %75, %77, %66 : vector<128x1xi1>, vector<128x1xi32>
    %c8_i32 = arith.constant 8 : i32
    %79 = vector.broadcast %c8_i32 : i32 to vector<128x1xi32>
    %80 = arith.cmpi slt, %78, %79 : vector<128x1xi32>
    %cst_55 = arith.constant 0.000000e+00 : f32
    %81 = vector.shape_cast %80 : vector<128x1xi1> to vector<128x1xi1>
    %82 = vector.broadcast %81 : vector<128x1xi1> to vector<128x8xi1>
    %83 = vector.broadcast %cst_55 : f32 to vector<128x8xf32>
    %84 = arith.select %82, %61, %83 : vector<128x8xi1>, vector<128x8xf32>
    %cst_56 = arith.constant 0.000000e+00 : bf16
    %85 = vector.broadcast %cst_56 : bf16 to vector<24x8xbf16>
    %c0_57 = arith.constant 0 : index
    %c0_58 = arith.constant 0 : index
    %c0_59 = arith.constant 0 : index
    %86 = vector.load %arg5[%c0_57, %c0_58, %c0_59] : memref<1x176x8xbf16, #tpu.memory_space<vmem>>, vector<1x24x8xbf16>
    %87 = vector.shape_cast %86 : vector<1x24x8xbf16> to vector<24x8xbf16>
    %88 = vector.shape_cast %85 : vector<24x8xbf16> to vector<1x24x8xbf16>
    tpu.vector_store %arg5[%c0_57, %c0_58, %c0_59], %88 {strides = array<i32>} : memref<1x176x8xbf16, #tpu.memory_space<vmem>>, vector<1x24x8xbf16>,
    %cst_60 = arith.constant 0.000000e+00 : bf16
    %89 = vector.broadcast %cst_60 : bf16 to vector<24x8xbf16>
    %c0_61 = arith.constant 0 : index
    %c152 = arith.constant 152 : index
    %c0_62 = arith.constant 0 : index
    %90 = vector.load %arg5[%c0_61, %c152, %c0_62] : memref<1x176x8xbf16, #tpu.memory_space<vmem>>, vector<1x24x8xbf16>
    %91 = vector.shape_cast %90 : vector<1x24x8xbf16> to vector<24x8xbf16>
    %92 = vector.shape_cast %89 : vector<24x8xbf16> to vector<1x24x8xbf16>
    tpu.vector_store %arg5[%c0_61, %c152, %c0_62], %92 {strides = array<i32>} : memref<1x176x8xbf16, #tpu.memory_space<vmem>>, vector<1x24x8xbf16>,
    %93 = arith.truncf %84 : vector<128x8xf32> to vector<128x8xbf16>
    %c0_63 = arith.constant 0 : index
    %c24_64 = arith.constant 24 : index
    %c0_65 = arith.constant 0 : index
    %94 = vector.load %arg5[%c0_63, %c24_64, %c0_65] : memref<1x176x8xbf16, #tpu.memory_space<vmem>>, vector<1x128x8xbf16>
    %95 = vector.shape_cast %94 : vector<1x128x8xbf16> to vector<128x8xbf16>
    %96 = vector.shape_cast %93 : vector<128x8xbf16> to vector<1x128x8xbf16>
    tpu.vector_store %arg5[%c0_63, %c24_64, %c0_65], %96 {strides = array<i32>} : memref<1x176x8xbf16, #tpu.memory_space<vmem>>, vector<1x128x8xbf16>,
    return
  }
  func.func @transform_0(%arg0: i32) -> (i32, i32, i32) {
    %c0_i32 = arith.constant 0 : i32
    %c0_i32_0 = arith.constant 0 : i32
    %c0_i32_1 = arith.constant 0 : i32
    return %arg0, %c0_i32, %c0_i32_0 : i32, i32, i32
  }
  func.func @transform_1(%arg0: i32) -> (i32, i32, i32) {
    %c0_i32 = arith.constant 0 : i32
    %c0_i32_0 = arith.constant 0 : i32
    %c0_i32_1 = arith.constant 0 : i32
    %c0_i32_2 = arith.constant 0 : i32
    return %c0_i32, %c0_i32_0, %c0_i32_1 : i32, i32, i32
  }
  func.func @transform_2(%arg0: i32) -> (i32, i32) {
    %c0_i32 = arith.constant 0 : i32
    %c0_i32_0 = arith.constant 0 : i32
    %c0_i32_1 = arith.constant 0 : i32
    return %c0_i32, %c0_i32_0 : i32, i32
  }
  func.func @transform_3(%arg0: i32) -> (i32, i32, i32) {
    %c0_i32 = arith.constant 0 : i32
    %c0_i32_0 = arith.constant 0 : i32
    %c0_i32_1 = arith.constant 0 : i32
    return %arg0, %c0_i32, %c0_i32_0 : i32, i32, i32
  }
  func.func @transform_4(%arg0: i32) -> (i32, i32, i32) {
    %c0_i32 = arith.constant 0 : i32
    %c0_i32_0 = arith.constant 0 : i32
    %c0_i32_1 = arith.constant 0 : i32
    return %arg0, %c0_i32, %c0_i32_0 : i32, i32, i32
  }
}

module attributes {stable_mosaic.version = 11 : i64} {
  func.func @_conv_kernel(%arg0: i32, %arg1: memref<1x176x8xbf16, #tpu.memory_space<vmem>>, %arg2: memref<9x8x8xbf16, #tpu.memory_space<vmem>>, %arg3: memref<1x8xf32, #tpu.memory_space<vmem>>, %arg4: memref<1x176x8xbf16, #tpu.memory_space<vmem>>) attributes {dimension_semantics = [#tpu.dimension_semantics<parallel>], iteration_bounds = array<i64: 2>, scalar_prefetch = 0 : i64, scratch_operands = 0 : i64, tpu.core_type = #tpu.core_type<tc>, window_params = [{transform_indices = @transform_0, window_bounds = array<i64: 1, 176, 8>}, {pipeline_mode = #tpu.pipeline_mode<synchronous>, transform_indices = @transform_1, window_bounds = array<i64: 9, 8, 8>}, {pipeline_mode = #tpu.pipeline_mode<synchronous>, transform_indices = @transform_2, window_bounds = array<i64: 1, 8>}, {transform_indices = @transform_3, window_bounds = array<i64: 1, 176, 8>}]} {
    %c0 = arith.constant 0 : index
    %c7 = arith.constant 7 : index
    %c0_0 = arith.constant 0 : index
    %0 = vector.load %arg1[%c0, %c7, %c0_0] : memref<1x176x8xbf16, #tpu.memory_space<vmem>>, vector<1x128x8xbf16>
    %1 = vector.shape_cast %0 : vector<1x128x8xbf16> to vector<128x8xbf16>
    %c0_1 = arith.constant 0 : index
    %c0_2 = arith.constant 0 : index
    %c0_3 = arith.constant 0 : index
    %2 = vector.load %arg2[%c0_1, %c0_2, %c0_3] : memref<9x8x8xbf16, #tpu.memory_space<vmem>>, vector<1x8x8xbf16>
    %3 = vector.shape_cast %2 : vector<1x8x8xbf16> to vector<8x8xbf16>
    %cst = arith.constant dense<0.000000e+00> : vector<128x8xf32>
    %4 = tpu.matmul %1, %3, %cst {dimension_numbers = #tpu.dot_dimension_numbers<[1], [0], [0], [1], [0, 0, 1, 1], [], []>} : vector<128x8xbf16>, vector<8x8xbf16>, vector<128x8xf32> -> vector<128x8xf32>
    %c0_4 = arith.constant 0 : index
    %c8 = arith.constant 8 : index
    %c0_5 = arith.constant 0 : index
    %5 = vector.load %arg1[%c0_4, %c8, %c0_5] : memref<1x176x8xbf16, #tpu.memory_space<vmem>>, vector<1x128x8xbf16>
    %6 = vector.shape_cast %5 : vector<1x128x8xbf16> to vector<128x8xbf16>
    %c1 = arith.constant 1 : index
    %c0_6 = arith.constant 0 : index
    %c0_7 = arith.constant 0 : index
    %7 = vector.load %arg2[%c1, %c0_6, %c0_7] : memref<9x8x8xbf16, #tpu.memory_space<vmem>>, vector<1x8x8xbf16>
    %8 = vector.shape_cast %7 : vector<1x8x8xbf16> to vector<8x8xbf16>
    %cst_8 = arith.constant dense<0.000000e+00> : vector<128x8xf32>
    %9 = tpu.matmul %6, %8, %cst_8 {dimension_numbers = #tpu.dot_dimension_numbers<[1], [0], [0], [1], [0, 0, 1, 1], [], []>} : vector<128x8xbf16>, vector<8x8xbf16>, vector<128x8xf32> -> vector<128x8xf32>
    %10 = arith.addf %4, %9 : vector<128x8xf32>
    %c0_9 = arith.constant 0 : index
    %c9 = arith.constant 9 : index
    %c0_10 = arith.constant 0 : index
    %11 = vector.load %arg1[%c0_9, %c9, %c0_10] : memref<1x176x8xbf16, #tpu.memory_space<vmem>>, vector<1x128x8xbf16>
    %12 = vector.shape_cast %11 : vector<1x128x8xbf16> to vector<128x8xbf16>
    %c2 = arith.constant 2 : index
    %c0_11 = arith.constant 0 : index
    %c0_12 = arith.constant 0 : index
    %13 = vector.load %arg2[%c2, %c0_11, %c0_12] : memref<9x8x8xbf16, #tpu.memory_space<vmem>>, vector<1x8x8xbf16>
    %14 = vector.shape_cast %13 : vector<1x8x8xbf16> to vector<8x8xbf16>
    %cst_13 = arith.constant dense<0.000000e+00> : vector<128x8xf32>
    %15 = tpu.matmul %12, %14, %cst_13 {dimension_numbers = #tpu.dot_dimension_numbers<[1], [0], [0], [1], [0, 0, 1, 1], [], []>} : vector<128x8xbf16>, vector<8x8xbf16>, vector<128x8xf32> -> vector<128x8xf32>
    %16 = arith.addf %10, %15 : vector<128x8xf32>
    %c0_14 = arith.constant 0 : index
    %c23 = arith.constant 23 : index
    %c0_15 = arith.constant 0 : index
    %17 = vector.load %arg1[%c0_14, %c23, %c0_15] : memref<1x176x8xbf16, #tpu.memory_space<vmem>>, vector<1x128x8xbf16>
    %18 = vector.shape_cast %17 : vector<1x128x8xbf16> to vector<128x8xbf16>
    %c3 = arith.constant 3 : index
    %c0_16 = arith.constant 0 : index
    %c0_17 = arith.constant 0 : index
    %19 = vector.load %arg2[%c3, %c0_16, %c0_17] : memref<9x8x8xbf16, #tpu.memory_space<vmem>>, vector<1x8x8xbf16>
    %20 = vector.shape_cast %19 : vector<1x8x8xbf16> to vector<8x8xbf16>
    %cst_18 = arith.constant dense<0.000000e+00> : vector<128x8xf32>
    %21 = tpu.matmul %18, %20, %cst_18 {dimension_numbers = #tpu.dot_dimension_numbers<[1], [0], [0], [1], [0, 0, 1, 1], [], []>} : vector<128x8xbf16>, vector<8x8xbf16>, vector<128x8xf32> -> vector<128x8xf32>
    %22 = arith.addf %16, %21 : vector<128x8xf32>
    %c0_19 = arith.constant 0 : index
    %c24 = arith.constant 24 : index
    %c0_20 = arith.constant 0 : index
    %23 = vector.load %arg1[%c0_19, %c24, %c0_20] : memref<1x176x8xbf16, #tpu.memory_space<vmem>>, vector<1x128x8xbf16>
    %24 = vector.shape_cast %23 : vector<1x128x8xbf16> to vector<128x8xbf16>
    %c4 = arith.constant 4 : index
    %c0_21 = arith.constant 0 : index
    %c0_22 = arith.constant 0 : index
    %25 = vector.load %arg2[%c4, %c0_21, %c0_22] : memref<9x8x8xbf16, #tpu.memory_space<vmem>>, vector<1x8x8xbf16>
    %26 = vector.shape_cast %25 : vector<1x8x8xbf16> to vector<8x8xbf16>
    %cst_23 = arith.constant dense<0.000000e+00> : vector<128x8xf32>
    %27 = tpu.matmul %24, %26, %cst_23 {dimension_numbers = #tpu.dot_dimension_numbers<[1], [0], [0], [1], [0, 0, 1, 1], [], []>} : vector<128x8xbf16>, vector<8x8xbf16>, vector<128x8xf32> -> vector<128x8xf32>
    %28 = arith.addf %22, %27 : vector<128x8xf32>
    %c0_24 = arith.constant 0 : index
    %c25 = arith.constant 25 : index
    %c0_25 = arith.constant 0 : index
    %29 = vector.load %arg1[%c0_24, %c25, %c0_25] : memref<1x176x8xbf16, #tpu.memory_space<vmem>>, vector<1x128x8xbf16>
    %30 = vector.shape_cast %29 : vector<1x128x8xbf16> to vector<128x8xbf16>
    %c5 = arith.constant 5 : index
    %c0_26 = arith.constant 0 : index
    %c0_27 = arith.constant 0 : index
    %31 = vector.load %arg2[%c5, %c0_26, %c0_27] : memref<9x8x8xbf16, #tpu.memory_space<vmem>>, vector<1x8x8xbf16>
    %32 = vector.shape_cast %31 : vector<1x8x8xbf16> to vector<8x8xbf16>
    %cst_28 = arith.constant dense<0.000000e+00> : vector<128x8xf32>
    %33 = tpu.matmul %30, %32, %cst_28 {dimension_numbers = #tpu.dot_dimension_numbers<[1], [0], [0], [1], [0, 0, 1, 1], [], []>} : vector<128x8xbf16>, vector<8x8xbf16>, vector<128x8xf32> -> vector<128x8xf32>
    %34 = arith.addf %28, %33 : vector<128x8xf32>
    %c0_29 = arith.constant 0 : index
    %c39 = arith.constant 39 : index
    %c0_30 = arith.constant 0 : index
    %35 = vector.load %arg1[%c0_29, %c39, %c0_30] : memref<1x176x8xbf16, #tpu.memory_space<vmem>>, vector<1x128x8xbf16>
    %36 = vector.shape_cast %35 : vector<1x128x8xbf16> to vector<128x8xbf16>
    %c6 = arith.constant 6 : index
    %c0_31 = arith.constant 0 : index
    %c0_32 = arith.constant 0 : index
    %37 = vector.load %arg2[%c6, %c0_31, %c0_32] : memref<9x8x8xbf16, #tpu.memory_space<vmem>>, vector<1x8x8xbf16>
    %38 = vector.shape_cast %37 : vector<1x8x8xbf16> to vector<8x8xbf16>
    %cst_33 = arith.constant dense<0.000000e+00> : vector<128x8xf32>
    %39 = tpu.matmul %36, %38, %cst_33 {dimension_numbers = #tpu.dot_dimension_numbers<[1], [0], [0], [1], [0, 0, 1, 1], [], []>} : vector<128x8xbf16>, vector<8x8xbf16>, vector<128x8xf32> -> vector<128x8xf32>
    %40 = arith.addf %34, %39 : vector<128x8xf32>
    %c0_34 = arith.constant 0 : index
    %c40 = arith.constant 40 : index
    %c0_35 = arith.constant 0 : index
    %41 = vector.load %arg1[%c0_34, %c40, %c0_35] : memref<1x176x8xbf16, #tpu.memory_space<vmem>>, vector<1x128x8xbf16>
    %42 = vector.shape_cast %41 : vector<1x128x8xbf16> to vector<128x8xbf16>
    %c7_36 = arith.constant 7 : index
    %c0_37 = arith.constant 0 : index
    %c0_38 = arith.constant 0 : index
    %43 = vector.load %arg2[%c7_36, %c0_37, %c0_38] : memref<9x8x8xbf16, #tpu.memory_space<vmem>>, vector<1x8x8xbf16>
    %44 = vector.shape_cast %43 : vector<1x8x8xbf16> to vector<8x8xbf16>
    %cst_39 = arith.constant dense<0.000000e+00> : vector<128x8xf32>
    %45 = tpu.matmul %42, %44, %cst_39 {dimension_numbers = #tpu.dot_dimension_numbers<[1], [0], [0], [1], [0, 0, 1, 1], [], []>} : vector<128x8xbf16>, vector<8x8xbf16>, vector<128x8xf32> -> vector<128x8xf32>
    %46 = arith.addf %40, %45 : vector<128x8xf32>
    %c0_40 = arith.constant 0 : index
    %c41 = arith.constant 41 : index
    %c0_41 = arith.constant 0 : index
    %47 = vector.load %arg1[%c0_40, %c41, %c0_41] : memref<1x176x8xbf16, #tpu.memory_space<vmem>>, vector<1x128x8xbf16>
    %48 = vector.shape_cast %47 : vector<1x128x8xbf16> to vector<128x8xbf16>
    %c8_42 = arith.constant 8 : index
    %c0_43 = arith.constant 0 : index
    %c0_44 = arith.constant 0 : index
    %49 = vector.load %arg2[%c8_42, %c0_43, %c0_44] : memref<9x8x8xbf16, #tpu.memory_space<vmem>>, vector<1x8x8xbf16>
    %50 = vector.shape_cast %49 : vector<1x8x8xbf16> to vector<8x8xbf16>
    %cst_45 = arith.constant dense<0.000000e+00> : vector<128x8xf32>
    %51 = tpu.matmul %48, %50, %cst_45 {dimension_numbers = #tpu.dot_dimension_numbers<[1], [0], [0], [1], [0, 0, 1, 1], [], []>} : vector<128x8xbf16>, vector<8x8xbf16>, vector<128x8xf32> -> vector<128x8xf32>
    %52 = arith.addf %46, %51 : vector<128x8xf32>
    %c0_46 = arith.constant 0 : index
    %c0_47 = arith.constant 0 : index
    %53 = vector.load %arg3[%c0_46, %c0_47] : memref<1x8xf32, #tpu.memory_space<vmem>>, vector<1x8xf32>
    %54 = vector.broadcast %53 : vector<1x8xf32> to vector<128x8xf32>
    %55 = arith.addf %52, %54 : vector<128x8xf32>
    %cst_48 = arith.constant 0.000000e+00 : f32
    %56 = vector.broadcast %cst_48 : f32 to vector<128x8xf32>
    %57 = arith.maximumf %55, %56 : vector<128x8xf32>
    %58 = tpu.iota {dimensions = array<i32: 0>} : vector<128x1xi32>
    %c16_i32 = arith.constant 16 : i32
    %c0_i32 = arith.constant 0 : i32
    %59 = arith.cmpi eq, %c16_i32, %c0_i32 : i32
    %c1_i32 = arith.constant 1 : i32
    %60 = arith.select %59, %c1_i32, %c16_i32 : i32
    %61 = vector.broadcast %60 : i32 to vector<128x1xi32>
    %62 = arith.remsi %58, %61 : vector<128x1xi32>
    %c0_i32_49 = arith.constant 0 : i32
    %63 = vector.broadcast %c0_i32_49 : i32 to vector<128x1xi32>
    %64 = arith.cmpi ne, %62, %63 : vector<128x1xi32>
    %c0_i32_50 = arith.constant 0 : i32
    %65 = vector.broadcast %c0_i32_50 : i32 to vector<128x1xi32>
    %66 = arith.cmpi slt, %62, %65 : vector<128x1xi32>
    %c0_i32_51 = arith.constant 0 : i32
    %67 = arith.cmpi slt, %60, %c0_i32_51 : i32
    %68 = vector.broadcast %67 : i1 to vector<128x1xi1>
    %69 = vector.broadcast %68 : vector<128x1xi1> to vector<128x1xi1>
    %70 = arith.xori %66, %69 : vector<128x1xi1>
    %71 = arith.andi %70, %64 : vector<128x1xi1>
    %72 = vector.broadcast %60 : i32 to vector<128x1xi32>
    %73 = arith.addi %62, %72 : vector<128x1xi32>
    %74 = arith.select %71, %73, %62 : vector<128x1xi1>, vector<128x1xi32>
    %c8_i32 = arith.constant 8 : i32
    %75 = vector.broadcast %c8_i32 : i32 to vector<128x1xi32>
    %76 = arith.cmpi slt, %74, %75 : vector<128x1xi32>
    %cst_52 = arith.constant 0.000000e+00 : f32
    %77 = vector.shape_cast %76 : vector<128x1xi1> to vector<128x1xi1>
    %78 = vector.broadcast %77 : vector<128x1xi1> to vector<128x8xi1>
    %79 = vector.broadcast %cst_52 : f32 to vector<128x8xf32>
    %80 = arith.select %78, %57, %79 : vector<128x8xi1>, vector<128x8xf32>
    %cst_53 = arith.constant 0.000000e+00 : bf16
    %81 = vector.broadcast %cst_53 : bf16 to vector<24x8xbf16>
    %c0_54 = arith.constant 0 : index
    %c0_55 = arith.constant 0 : index
    %c0_56 = arith.constant 0 : index
    %82 = vector.load %arg4[%c0_54, %c0_55, %c0_56] : memref<1x176x8xbf16, #tpu.memory_space<vmem>>, vector<1x24x8xbf16>
    %83 = vector.shape_cast %82 : vector<1x24x8xbf16> to vector<24x8xbf16>
    %84 = vector.shape_cast %81 : vector<24x8xbf16> to vector<1x24x8xbf16>
    tpu.vector_store %arg4[%c0_54, %c0_55, %c0_56], %84 {strides = array<i32>} : memref<1x176x8xbf16, #tpu.memory_space<vmem>>, vector<1x24x8xbf16>,
    %cst_57 = arith.constant 0.000000e+00 : bf16
    %85 = vector.broadcast %cst_57 : bf16 to vector<24x8xbf16>
    %c0_58 = arith.constant 0 : index
    %c152 = arith.constant 152 : index
    %c0_59 = arith.constant 0 : index
    %86 = vector.load %arg4[%c0_58, %c152, %c0_59] : memref<1x176x8xbf16, #tpu.memory_space<vmem>>, vector<1x24x8xbf16>
    %87 = vector.shape_cast %86 : vector<1x24x8xbf16> to vector<24x8xbf16>
    %88 = vector.shape_cast %85 : vector<24x8xbf16> to vector<1x24x8xbf16>
    tpu.vector_store %arg4[%c0_58, %c152, %c0_59], %88 {strides = array<i32>} : memref<1x176x8xbf16, #tpu.memory_space<vmem>>, vector<1x24x8xbf16>,
    %89 = arith.truncf %80 : vector<128x8xf32> to vector<128x8xbf16>
    %c0_60 = arith.constant 0 : index
    %c24_61 = arith.constant 24 : index
    %c0_62 = arith.constant 0 : index
    %90 = vector.load %arg4[%c0_60, %c24_61, %c0_62] : memref<1x176x8xbf16, #tpu.memory_space<vmem>>, vector<1x128x8xbf16>
    %91 = vector.shape_cast %90 : vector<1x128x8xbf16> to vector<128x8xbf16>
    %92 = vector.shape_cast %89 : vector<128x8xbf16> to vector<1x128x8xbf16>
    tpu.vector_store %arg4[%c0_60, %c24_61, %c0_62], %92 {strides = array<i32>} : memref<1x176x8xbf16, #tpu.memory_space<vmem>>, vector<1x128x8xbf16>,
    return
  }
  func.func @transform_0(%arg0: i32) -> (i32, i32, i32) {
    %c0_i32 = arith.constant 0 : i32
    %c0_i32_0 = arith.constant 0 : i32
    %c0_i32_1 = arith.constant 0 : i32
    return %arg0, %c0_i32, %c0_i32_0 : i32, i32, i32
  }
  func.func @transform_1(%arg0: i32) -> (i32, i32, i32) {
    %c0_i32 = arith.constant 0 : i32
    %c0_i32_0 = arith.constant 0 : i32
    %c0_i32_1 = arith.constant 0 : i32
    %c0_i32_2 = arith.constant 0 : i32
    return %c0_i32, %c0_i32_0, %c0_i32_1 : i32, i32, i32
  }
  func.func @transform_2(%arg0: i32) -> (i32, i32) {
    %c0_i32 = arith.constant 0 : i32
    %c0_i32_0 = arith.constant 0 : i32
    %c0_i32_1 = arith.constant 0 : i32
    return %c0_i32, %c0_i32_0 : i32, i32
  }
  func.func @transform_3(%arg0: i32) -> (i32, i32, i32) {
    %c0_i32 = arith.constant 0 : i32
    %c0_i32_0 = arith.constant 0 : i32
    %c0_i32_1 = arith.constant 0 : i32
    return %arg0, %c0_i32, %c0_i32_0 : i32, i32, i32
  }
}

</mosaic_0001>

<bundles_post_ra>
// kernel: two_block_model.6
= control target key start
LH: loop header
LB: loop body
LE: loop exit
PB: predicated region body
PF: predicated region fallthrough
CT: control target
= control target key end

     0   :  { %s3277_s12 = smov 0   ;;  %s3833_s0 = inlined_call_operand.vmem [shape: bf16[2,176,8], index: 0, kind: input, shape index: {}]   ;;  %s3834_s1 = inlined_call_operand.vmem [shape: bf16[9,8,8], index: 1, kind: input, shape index: {}]   ;;  %s3835_s2 = inlined_call_operand.vmem [shape: f32[1,8], index: 2, kind: input, shape index: {}]   ;;  %s3836_s3 = inlined_call_operand.vmem [shape: bf16[2,176,8], index: 3, kind: output, shape index: {}]  }
   0x1 LB: > { %s2703_s13 = sadd.s32 4294967295, %s3253_s12   ;;  %p2707_p0 = scmp.ge.s32.totalorder %s3253_s12, 1  ;;  %s3253_s12 = sphi %s3277_s12, %s13_s12  }
   0x2   : > { %p137_p1 = scmp.lt.s32.totalorder %s3253_s12, 3 }
   0x4   : > { %p138_p2 = pnand %p2707_p0, %p137_p1 }
   0x5   : > { %v2710_v0 = vld [vmem:[%s3834_s1 + $0x4] sm:$0xf] (!%p138_p2)  ;;  %vm257_vm0 = vcmask (!%p138_p2), 1043456   ;;  %p161_p3 = scmp.lt.s32.totalorder (!%p138_p2), %s2703_s13, 1  ;;  %v189_v2 = vld [vmem:[%s3834_s1] sm:$0xf] (!%p138_p2) }
   0x6   : > { %141 = sbr.rel (%p138_p2) target bundleno = 384 (0x180), region = 32  ;;  %3149 = vmatprep.subr.msk.bf16.mxu1 (!%p138_p2), %vm257_vm0, %v2710_v0  ;;  %3148 = vmatprep.subr.msk.bf16.mxu0 (!%p138_p2), %vm257_vm0, %v2710_v0  ;;  %v259_v1 = vsel (!%p138_p2), %vm257_vm0, %v2710_v0, 0  ;;  %v2744_v3 = vld [vmem:[%s3834_s1 + $0x8] sm:$0xf] (!%p138_p2)  ;;  %vm232_vm1 = vcmask (!%p138_p2), 64512   ;;  %v475_v29 = vsel (!%p138_p2), %vm257_vm0, %v189_v2, 0 }
   0x7   : > { %3147 = vmatpush3.bf16.msra.mxu1 (!%p138_p2), %v259_v1  ;;  %2985 = vmatpush3.bf16.msra.mxu0 (!%p138_p2), %v259_v1  ;;  %v730_v16 = vsel (!%p138_p2), %vm257_vm0, %v2744_v3, 0  ;;  %v2780_v17 = vld [vmem:[%s3834_s1 + $0x10] sm:$0xf] (!%p138_p2)  ;;  %vm369_vm2 = vsmask.f32 (!%p138_p2), 4352  ;;  %vm2561_vm4 = vcmask (!%p138_p2), 60416  }
   0x8   : > { %3150 = vmatprep.subr.msk.bf16.mxu1 (!%p138_p2), %vm257_vm0, %v189_v2  ;;  %3151 = vmatprep.subr.msk.bf16.mxu0 (!%p138_p2), %vm257_vm0, %v2744_v3  ;;  %v3332_v35 = vld [vmem:[%s3834_s1 + $0xc] sm:$0xf] (!%p138_p2)  ;;  %vm636_vm3 = vsmask.f32 (!%p138_p2), 7424  ;;  %v1162_v50 = vsel (!%p138_p2), %vm257_vm0, %v2780_v17, 0 }
   0xd   : > { %s3838_s13 = smov (!%p161_p3, %s2703_s13), 1 }
   0xe   : > { %s3158_s20 = smul.u32 88, %s3838_s13 }
  0x10   : > { %s3307_s23 = scalar_lea.vmem %s3833_s0, %s3158_s20  ;;  %s3765_s11 = scalar_lea.vmem %s3836_s3, %s3158_s20 }
  0x11   : > { %v172_v4 = vld [vmem:[%s3307_s23] sm:$0x8]  ;;  %v173_v5 = vld [vmem:[%s3307_s23 + $0x4] sm:$0xf]  ;;  %v174_v6 = vld [vmem:[%s3307_s23 + $0x8] sm:$0xf] }
  0x12   : > { %v175_v7 = vld [vmem:[%s3307_s23 + $0xc] sm:$0xf]  ;;  %v176_v8 = vld [vmem:[%s3307_s23 + $0x10] sm:$0xf]  ;;  %v177_v9 = vld [vmem:[%s3307_s23 + $0x14] sm:$0xf]  ;;  %v2711_v10 = vcombine.low %v173_v5, %v174_v6  ;;  %v2727_v11 = vcombine.low %v172_v4, %v173_v5 }
  0x13   : > { %v2712_v12 = vcombine.low %v175_v7, %v176_v8  ;;  %v2728_v13 = vcombine.low %v174_v6, %v175_v7  ;;  %v2729_v14 = vcombine.low %v176_v8, %v177_v9  ;;  %v178_v15 = vld [vmem:[%s3307_s23 + $0x18] sm:$0xf]  ;;  %v181_v20 = vld [vmem:[%s3307_s23 + $0x24] sm:$0xf]  ;;  %v182_v21 = vld [vmem:[%s3307_s23 + $0x28] sm:$0xf] }
  0x14   : > { %2986 = vmatprep.mubr.msk.bf16.mxu0 %vm232_vm1, %v2711_v10  ;;  %v371_v18 = vshrl.u32 %v2727_v11, 16  ;;  %v374_v19 = vshll.u32 %v2727_v11, 16  ;;  %v179_v24 = vld [vmem:[%s3307_s23 + $0x1c] sm:$0xf]  ;;  %v183_v25 = vld [vmem:[%s3307_s23 + $0x2c] sm:$0xf]  ;;  %v2715_v27 = vcombine.low %v181_v20, %v182_v21  ;;  %v2713_v48 = vcombine.low %v177_v9, %v178_v15 }
  0x15   : > { %v379_v22 = vshrl.u32 %v2728_v13, 16  ;;  %v382_v23 = vshll.u32 %v2728_v13, 16  ;;  %2987 = vmatmul.mubr.msk.bf16.vlgmr.msra.gmra.mrb[0].mxu0 %vm232_vm1, %v2712_v12  ;;  %v184_v26 = vld [vmem:[%s3307_s23 + $0x30] sm:$0xf]  ;;  %v2730_v28 = vcombine.low %v178_v15, %v179_v24  ;;  %v388_v32 = vshrl.u32 %v2729_v14, 16  ;;  %v3186_v45 = vld [vmem:[%s3307_s23 + $0x4] sm:$0xff]  }
  0x16   : > { %3021 = vmatpush3.bf16.msra.mxu0 %v730_v16  ;;  %v373_v30 = vrot.slane %v371_v18, 3  ;;  %v376_v31 = vrot.slane %v374_v19, 4  ;;  %v391_v33 = vshll.u32 %v2729_v14, 16  ;;  %v180_v34 = vld [vmem:[%s3307_s23 + $0x20] sm:$0xf]  ;;  %v2716_v39 = vcombine.low %v183_v25, %v184_v26  ;;  %2994 = vmatprep.mubr.msk.bf16.mxu1 %vm232_vm1, %v2715_v27  ;;  %v3187_v46 = vld [vmem:[%s3307_s23 + $0xc] sm:$0xff]  }
  0x17   : > { %3153 = vmatprep.subr.msk.bf16.mxu0 %vm257_vm0, %v2780_v17  ;;  %v381_v36 = vrot.slane %v379_v22, 3  ;;  %v384_v37 = vrot.slane %v382_v23, 4  ;;  %v185_v38 = vld [vmem:[%s3307_s23 + $0x34] sm:$0xf]  ;;  %v3338_v40 = vld [vmem:[%s3307_s23 + $0x38] sm:$0xf]  ;;  %v2714_v43 = vcombine.low %v179_v24, %v180_v34  ;;  %v2731_v53 = vcombine.low %v180_v34, %v181_v20  ;;  %2990 = vmatprep.mubr.msk.bf16.mxu0 %vm232_vm1, %v2713_v48 }
  0x18   : > { %v3341_v41 = vld [vmem:[%s3307_s23 + $0x3c] sm:$0xf]  ;;  %v3344_v42 = vld [vmem:[%s3307_s23 + $0x40] sm:$0xf]  ;;  %v397_v44 = vshrl.u32 %v2730_v28, 16  ;;  %2995 = vmatmul.mubr.msk.bf16.vlgmr.msra.gmra.mrb[0].mxu1 %vm232_vm1, %v2716_v39  ;;  %v400_v47 = vshll.u32 %v2730_v28, 16  ;;  %v2717_v49 = vcombine.low %v185_v38, %v3338_v40  ;;  %v377_v55 = vor.u32 %v376_v31, %v373_v30 }
  0x19   : > { %3003 = vmatpush3.bf16.msra.mxu1 %v475_v29  ;;  %v390_v51 = vrot.slane %v388_v32, 3  ;;  %v393_v52 = vrot.slane %v391_v33, 4  ;;  %v2718_v54 = vcombine.low %v3341_v41, %v3344_v42  ;;  %v385_v56 = vor.u32 %v384_v37, %v381_v36  ;;  %v3188_v58 = vld [vmem:[%s3307_s23 + $0x14] sm:$0xff]   ;;  %v3189_v63 = vld [vmem:[%s3307_s23 + $0x1c] sm:$0xff]   ;;  %v3190_v0 = vld [vmem:[%s3307_s23 + $0x24] sm:$0xff]  }
  0x1a   : > { %3152 = vmatprep.subr.msk.bf16.mxu1 %vm257_vm0, %v3332_v35  ;;  %2998 = vmatprep.mubr.msk.bf16.mxu1 %vm232_vm1, %v2717_v49  ;;  %v638_v57 = vshrl.u32 %v3186_v45, 16  ;;  %v640_v59 = vshll.u32 %v3186_v45, 16  ;;  %v645_v60 = vshll.u32 %v3187_v46, 16  ;;  %v649_v61 = vshrl.u32 %v3187_v46, 16  ;;  %v3363_v13 = vld [vmem:[%s3307_s23 + $0x2c] sm:$0xff]   ;;  %v3192_v30 = vld [vmem:[%s3307_s23 + $0x34] sm:$0xff]  }
  0x1b   : > { %v399_v62 = vrot.slane %v397_v44, 3  ;;  %v2732_v1 = vcombine.low %v182_v21, %v183_v25  ;;  %v386_v2 = vsel %vm369_vm2, %v377_v55, %v385_v56  ;;  %v653_v3 = vshll.u32 %v3188_v58, 16  ;;  %v3378_v31 = vld [vmem:[%s3834_s1 + $0x18] sm:$0xf]  ;;  %v3394_v48 = vld [vmem:[%s3834_s1 + $0x14] sm:$0xf] }
  0x1c   : > { %v402_v4 = vrot.slane %v400_v47, 4  ;;  %v642_v5 = vrot.slane %v640_v59, 1  ;;  %v647_v6 = vrot.slane %v645_v60, 1  ;;  %v657_v7 = vshrl.u32 %v3188_v58, 16  ;;  %v845_v59 = vld [vmem:[%s3307_s23 + $0x8] sm:$0x8] }
  0x1d   : > { %2991 = vmatmul.mubr.msk.bf16.gmra.mrb[4].mxu0 %vm232_vm1, %v2714_v43  ;;  %v661_v8 = vshll.u32 %v3189_v63, 16  ;;  %v2733_v9 = vcombine.low %v184_v26, %v185_v38  ;;  %v406_v10 = vshrl.u32 %v2731_v53, 16  ;;  %v409_v11 = vshll.u32 %v2731_v53, 16  ;;  %v3386_v43 = vld [vmem:[%s3307_s23 + $0x3c] sm:$0xff]   ;;  %v3404_v60 = vld [vmem:[%s3307_s23 + $0xc] sm:$0xf] }
  0x1e   : > { %v655_v12 = vrot.slane %v653_v3, 1  ;;  %v643_v14 = vor.u32 %v642_v5, %v638_v57  ;;  %v651_v15 = vor.u32 %v649_v61, %v647_v6  ;;  %v669_v17 = vshll.u32 %v3190_v0, 16 }
  0x1f   : > { %v663_v16 = vrot.slane %v661_v8, 1  ;;  %v394_v18 = vor.u32 %v393_v52, %v390_v51  ;;  %v415_v19 = vshrl.u32 %v2732_v1, 16  ;;  %v665_v21 = vshrl.u32 %v3189_v63, 16  ;;  %v3409_v63 = vld [vmem:[%s3307_s23 + $0x10] sm:$0xf] }
  0x20   : > { %2999 = vmatmul.mubr.msk.bf16.gmra.mrb[4].mxu1 %vm232_vm1, %v2718_v54  ;;  %v659_v20 = vor.u32 %v657_v7, %v655_v12  ;;  %v418_v22 = vshll.u32 %v2732_v1, 16  ;;  %v648_v23 = vsel %vm636_vm3, %v643_v14, %v647_v6  ;;  %v656_v24 = vsel %vm636_vm3, %v651_v15, %v655_v12  ;;  %v3194_v8 = vld [vmem:[%s3307_s23 + $0x44] ss:$0 sps:$4 sm:$0x11]   ;;  %v3425_v12 = vld [vmem:[%s3307_s23 + $0x18] sm:$0xf] }
  0x21   : > { %3004 = vmatprep.mubr.msk.bf16.mxu1 %vm232_vm1, %v386_v2  ;;  %v403_v25 = vor.u32 %v402_v4, %v399_v62  ;;  %3022 = vmatprep.mubr.msk.bf16.mxu0 %vm232_vm1, %v648_v23  ;;  %v1012_v26 = vsel %vm257_vm0, %v3332_v35, 0  ;;  %v673_v28 = vshrl.u32 %v3190_v0, 16  ;;  %v677_v29 = vshll.u32 %v3363_v13, 16  ;;  %v3412_v0 = vld [vmem:[%s3307_s23 + $0x14] sm:$0xf] }
  0x22   : > { %v664_v27 = vsel %vm636_vm3, %v659_v20, %v663_v16  ;;  %v408_v32 = vrot.slane %v406_v10, 3  ;;  %v411_v33 = vrot.slane %v409_v11, 4  ;;  %v2734_v34 = vcombine.low %v3338_v40, %v3341_v41  ;;  %v3439_v23 = vld [vmem:[%s3307_s23 + $0x24] sm:$0xf] }
  0x23   : > { %v671_v35 = vrot.slane %v669_v17, 1  ;;  %v417_v36 = vrot.slane %v415_v19, 3  ;;  %v424_v37 = vshrl.u32 %v2733_v9, 16  ;;  %v395_v38 = vsel %vm369_vm2, %v385_v56, %v394_v18 }
  0x24   : > { %v667_v39 = vor.u32 %v665_v21, %v663_v16  ;;  %v420_v44 = vrot.slane %v418_v22, 4  ;;  %v404_v45 = vsel %vm369_vm2, %v394_v18, %v403_v25  ;;  %v679_v47 = vrot.slane %v677_v29, 1  ;;  %v3436_v22 = vld [vmem:[%s3307_s23 + $0x20] sm:$0xf]  ;;  %v3447_v29 = vld [vmem:[%s3307_s23 + $0x2c] sm:$0xf] }
  0x25   : > { %3023 = vmatmul.mubr.msk.bf16.vlgmr.msra.gmra.mrb[8].mxu0 %vm232_vm1, %v656_v24  ;;  %v675_v46 = vor.u32 %v673_v28, %v671_v35  ;;  %v427_v40 = vshll.u32 %v2733_v9, 16  ;;  %v685_v41 = vshll.u32 %v3192_v30, 16  ;;  %v412_v49 = vor.u32 %v411_v33, %v408_v32  ;;  %v3444_v28 = vld [vmem:[%s3307_s23 + $0x28] sm:$0xf] }
  0x26   : > { %3057 = vmatpush3.bf16.msra.mxu0 %v1162_v50  ;;  %3026 = vmatprep.mubr.msk.bf16.mxu0 %vm232_vm1, %v664_v27  ;;  %v681_v50 = vshrl.u32 %v3363_v13, 16  ;;  %v433_v51 = vshrl.u32 %v2734_v34, 16  ;;  %v672_v52 = vsel %vm636_vm3, %v667_v39, %v671_v35  ;;  %v436_v53 = vshll.u32 %v2734_v34, 16  ;;  %v3428_v13 = vld [vmem:[%s3307_s23 + $0x1c] sm:$0xf] }
  0x27   : > { %3155 = vmatprep.subr.msk.bf16.mxu0 %vm257_vm0, %v3378_v31  ;;  %v689_v54 = vshrl.u32 %v3192_v30, 16  ;;  %v693_v55 = vshll.u32 %v3386_v43, 16  ;;  %v421_v56 = vor.u32 %v420_v44, %v417_v36  ;;  %v680_v57 = vsel %vm636_vm3, %v675_v46, %v679_v47  ;;  %v3450_v30 = vld [vmem:[%s3307_s23 + $0x30] sm:$0xf] }
  0x28   : > { %3005 = vmatmul.mubr.msk.bf16.vlgmr.msra.gmra.mrb[8].mxu1 %vm232_vm1, %v395_v38  ;;  %v426_v58 = vrot.slane %v424_v37, 3  ;;  %v429_v61 = vrot.slane %v427_v40, 4  ;;  %v687_v62 = vrot.slane %v685_v41, 1  ;;  %v2735_v1 = vcombine.low %v3344_v42, %v3344_v42 }
  0x29   : > { %3039 = vmatpush3.bf16.msra.mxu1 %v1012_v26  ;;  %3008 = vmatprep.mubr.msk.bf16.mxu1 %vm232_vm1, %v404_v45  ;;  %v413_v2 = vsel %vm369_vm2, %v403_v25, %v412_v49  ;;  %v683_v3 = vor.u32 %v681_v50, %v679_v47  ;;  %v435_v4 = vrot.slane %v433_v51, 3  ;;  %v438_v5 = vrot.slane %v436_v53, 4  ;;  %v3470_v53 = vld [vmem:[%s3307_s23 + $0x3c] sm:$0xf] }
  0x2a   : > { %3154 = vmatprep.subr.msk.bf16.mxu1 %vm257_vm0, %v3394_v48  ;;  %v691_v6 = vor.u32 %v689_v54, %v687_v62  ;;  %v695_v7 = vrot.slane %v693_v55, 1  ;;  %v2763_v9 = vcombine.low %v845_v59, %v3404_v60  ;;  %v422_v10 = vsel %vm369_vm2, %v412_v49, %v421_v56 }
  0x2b   : > { %v2764_v42 = vcombine.low %v3409_v63, %v3412_v0  ;;  %v430_v11 = vor.u32 %v429_v61, %v426_v58  ;;  %v688_v14 = vsel %vm636_vm3, %v683_v3, %v687_v62  ;;  %v442_v15 = vshrl.u32 %v2735_v1, 16  ;;  %v3480_v58 = vld [vmem:[%s3307_s23 + $0x44] sm:$0xf] }
  0x2c   : > { %v445_v16 = vshll.u32 %v2735_v1, 16  ;;  %v697_v17 = vshrl.u32 %v3386_v43, 16  ;;  %v439_v18 = vor.u32 %v438_v5, %v435_v4  ;;  %v696_v19 = vsel %vm636_vm3, %v691_v6, %v695_v7  ;;  %v3459_v43 = vld [vmem:[%s3307_s23 + $0x34] sm:$0xf]  ;;  %v3483_v1 = vld [vmem:[%s3307_s23 + $0x18] sm:$0xf] }
  0x2d   : > { %3027 = vmatmul.mubr.msk.bf16.gmra.mrb[12].mxu0 %vm232_vm1, %v672_v52  ;;  %v701_v20 = vshll.u32 %v3194_v8, 16  ;;  %v908_v21 = vshrl.u32 %v2763_v9, 16  ;;  %v2765_v24 = vcombine.low %v3425_v12, %v3428_v13  ;;  %v911_v25 = vshll.u32 %v2763_v9, 16  ;;  %v3467_v52 = vld [vmem:[%s3307_s23 + $0x38] sm:$0xf] }
  0x2e   : > { %3030 = vmatprep.mubr.msk.bf16.mxu0 %vm232_vm1, %v680_v57  ;;  %v916_v26 = vshrl.u32 %v2764_v42, 16  ;;  %v919_v27 = vshll.u32 %v2764_v42, 16  ;;  %v431_v32 = vsel %vm369_vm2, %v421_v56, %v430_v11  ;;  %v444_v33 = vrot.slane %v442_v15, 3  ;;  %v3477_v57 = vld [vmem:[%s3307_s23 + $0x40] sm:$0xf] }
  0x2f   : > { %v447_v34 = vrot.slane %v445_v16, 4  ;;  %v2766_v35 = vcombine.low %v3436_v22, %v3439_v23  ;;  %v440_v36 = vsel %vm369_vm2, %v430_v11, %v439_v18  ;;  %v699_v37 = vor.u32 %v697_v17, %v695_v7  ;;  %v3489_v5 = vld [vmem:[%s3307_s23 + $0x20] sm:$0xf]  ;;  %v3493_v8 = vld [vmem:[%s3307_s23 + $0x24] sm:$0xf] }
  0x30   : > { %3009 = vmatmul.mubr.msk.bf16.gmra.mrb[12].mxu1 %vm232_vm1, %v413_v2  ;;  %v703_v38 = vrot.slane %v701_v20, 1  ;;  %v910_v39 = vrot.slane %v908_v21, 3  ;;  %v913_v44 = vrot.slane %v911_v25, 4  ;;  %v918_v45 = vrot.slane %v916_v26, 3  ;;  %v3486_v2 = vld [vmem:[%s3307_s23 + $0x1c] sm:$0xf] }
  0x31   : > { %3012 = vmatprep.mubr.msk.bf16.mxu1 %vm232_vm1, %v422_v10  ;;  %v921_v46 = vrot.slane %v919_v27, 4  ;;  %v925_v47 = vshrl.u32 %v2765_v24, 16  ;;  %v928_v40 = vshll.u32 %v2765_v24, 16  ;;  %v2767_v41 = vcombine.low %v3444_v28, %v3447_v29  ;;  %v3523_v26 = vld [vmem:[%s3834_s1 + $0x20] sm:$0xf] }
  0x32   : > { %v934_v49 = vshrl.u32 %v2766_v35, 16  ;;  %v937_v50 = vshll.u32 %v2766_v35, 16  ;;  %v2768_v51 = vcombine.low %v3450_v30, %v3459_v43  ;;  %v448_v54 = vor.u32 %v447_v34, %v444_v33  ;;  %v3526_v27 = vld [vmem:[%s3307_s23 + $0x28] sm:$0xf] }
  0x33   : > { %v704_v55 = vsel %vm636_vm3, %v699_v37, %v703_v38  ;;  %v2781_v56 = vcombine.low %v3404_v60, %v3409_v63  ;;  %v914_v59 = vor.u32 %v913_v44, %v910_v39  ;;  %v922_v61 = vor.u32 %v921_v46, %v918_v45  ;;  %v3532_v35 = vld [vmem:[%s3307_s23 + $0x48] sm:$0xf]  ;;  %v1547_v37 = vld [vmem:[%s3307_s23 + $0x10] sm:$0x8]  ;;  %v3536_v38 = vld [vmem:[%s3307_s23 + $0x14] sm:$0xf] }
  0x34   : > { %v927_v62 = vrot.slane %v925_v47, 3  ;;  %v930_v3 = vrot.slane %v928_v40, 4  ;;  %v943_v4 = vshrl.u32 %v2767_v41, 16  ;;  %v936_v6 = vrot.slane %v934_v49, 3  ;;  %v3543_v49 = vld [vmem:[%s3307_s23 + $0x30] sm:$0xf] }
  0x35   : > { %3031 = vmatmul.mubr.msk.bf16.gmra.mrb[16].mxu0 %vm232_vm1, %v688_v14  ;;  %v939_v60 = vrot.slane %v937_v50, 4  ;;  %v946_v63 = vshll.u32 %v2767_v41, 16  ;;  %v952_v7 = vshrl.u32 %v2768_v51, 16  ;;  %v449_v9 = vsel %vm369_vm2, %v439_v18, %v448_v54 }
  0x36   : > { %3034 = vmatprep.mubr.msk.bf16.mxu0 %vm232_vm1, %v696_v19  ;;  %v3499_v10 = vsel %vm257_vm0, %v3394_v48, 0  ;;  %v1714_v42 = vsel %vm257_vm0, %v3378_v31, 0  ;;  %v2769_v11 = vcombine.low %v3467_v52, %v3470_v53  ;;  %v923_v14 = vsel %vm369_vm2, %v914_v59, %v922_v61 }
  0x37   : > { %v2782_v15 = vcombine.low %v3412_v0, %v3425_v12  ;;  %v955_v16 = vshll.u32 %v2768_v51, 16  ;;  %v2770_v17 = vcombine.low %v3477_v57, %v3480_v58  ;;  %v931_v18 = vor.u32 %v930_v3, %v927_v62  ;;  %v3563_v3 = vld [vmem:[%s3307_s23 + $0x34] sm:$0xf] }
  0x38   : > { %3013 = vmatmul.mubr.msk.bf16.gmra.mrb[16].mxu1 %vm232_vm1, %v431_v32  ;;  %v2783_v48 = vcombine.low %v3428_v13, %v3436_v22  ;;  %v2817_v31 = vcombine.low %v3483_v1, %v3486_v2  ;;  %v2818_v19 = vcombine.low %v3489_v5, %v3493_v8  ;;  %v3517_v0 = vor.u32 %v939_v60, %v936_v6  ;;  %v3529_v32 = vld [vmem:[%s3307_s23 + $0x2c] sm:$0xf] }
  0x39   : > { %3016 = vmatprep.mubr.msk.bf16.mxu1 %vm232_vm1, %v440_v36  ;;  %v945_v12 = vrot.slane %v943_v4, 3  ;;  %v948_v20 = vrot.slane %v946_v63, 4  ;;  %v954_v21 = vrot.slane %v952_v7, 3  ;;  %v961_v24 = vshrl.u32 %v2769_v11, 16  ;;  %v3573_v7 = vld [vmem:[%s3307_s23 + $0x38] sm:$0xf] }
  0x3a   : > { %v964_v13 = vshll.u32 %v2769_v11, 16  ;;  %v1618_v22 = vshrl.u32 %v2817_v31, 16  ;;  %v1621_v25 = vshll.u32 %v2817_v31, 16  ;;  %v957_v33 = vrot.slane %v955_v16, 4 }
  0x3b   : > { %v970_v34 = vshrl.u32 %v2770_v17, 16  ;;  %v973_v36 = vshll.u32 %v2770_v17, 16  ;;  %v1627_v45 = vshrl.u32 %v2818_v19, 16  ;;  %v932_v46 = vsel %vm369_vm2, %v922_v61, %v931_v18 }
  0x3c   : > { %v1620_v39 = vrot.slane %v1618_v22, 3  ;;  %v1623_v44 = vrot.slane %v1621_v25, 4  ;;  %v949_v47 = vor.u32 %v948_v20, %v945_v12  ;;  %v2784_v40 = vcombine.low %v3439_v23, %v3444_v28 }
  0x3d   : > { %3035 = vmatmul.mubr.msk.bf16.gmra.mrb[20].mxu0 %vm232_vm1, %v704_v55  ;;  %v1630_v41 = vshll.u32 %v2818_v19, 16  ;;  %v941_v50 = vsel %vm369_vm2, %v931_v18, %v3517_v0  ;;  %v963_v51 = vrot.slane %v961_v24, 3  ;;  %v966_v54 = vrot.slane %v964_v13, 4  ;;  %v3549_v55 = vld [vmem:[%s3307_s23 + $0xc] sm:$0xff]  }
  0x3e   : > { %3058 = vmatprep.mubr.msk.bf16.mxu0 %vm232_vm1, %v2781_v56  ;;  %v3554_v56 = vld [vmem:[%s3834_s1 + $0x1c] sm:$0xf]  ;;  %v1629_v23 = vrot.slane %v1627_v45, 3  ;;  %v972_v28 = vrot.slane %v970_v34, 3  ;;  %v3556_v59 = vor.u32 %v1623_v44, %v1620_v39  ;;  %v2819_v62 = vcombine.low %v3526_v27, %v3529_v32  ;;  %v3615_v34 = vld [vmem:[%s3307_s23 + $0x14] sm:$0xff]  }
  0x3f   : > { %v1632_v61 = vrot.slane %v1630_v41, 4  ;;  %v3565_v4 = vor.u32 %v957_v33, %v954_v21  ;;  %v975_v6 = vrot.slane %v973_v36, 4  ;;  %v3569_v60 = vcombine.low %v3532_v35, %v3532_v35  ;;  %v3625_v41 = vld [vmem:[%s3307_s23 + $0x4c] sm:$0xf] }
  0x40   : > { %3017 = vmatmul.mubr.msk.bf16.gmra.mrb[20].mxu1 %vm232_vm1, %v449_v9  ;;  %v1340_v63 = vshrl.u32 %v3549_v55, 16  ;;  %v2816_v9 = vcombine.low %v1547_v37, %v3536_v38  ;;  %v1636_v11 = vshrl.u32 %v2819_v62, 16  ;;  %v2785_v16 = vcombine.low %v3447_v29, %v3450_v30  ;;  %v3600_v30 = vld [vmem:[%s3307_s23 + $0x44] sm:$0xf] }
  0x41   : > { %3040 = vmatprep.mubr.msk.bf16.mxu1 %vm232_vm1, %v923_v14  ;;  %v1639_v14 = vshll.u32 %v2819_v62, 16  ;;  %v2786_v17 = vcombine.low %v3459_v43, %v3467_v52  ;;  %v2820_v18 = vcombine.low %v3543_v49, %v3563_v3  ;;  %v2787_v31 = vcombine.low %v3470_v53, %v3477_v57 }
  0x42   : > { %v1638_v19 = vrot.slane %v1636_v11, 3  ;;  %v950_v43 = vsel %vm369_vm2, %v3517_v0, %v949_v47  ;;  %v959_v52 = vsel %vm369_vm2, %v949_v47, %v3565_v4  ;;  %v979_v57 = vshrl.u32 %v3569_v60, 16 }
  0x43   : > { %v1641_v29 = vrot.slane %v1639_v14, 4  ;;  %v1645_v12 = vshrl.u32 %v2820_v18, 16  ;;  %v1648_v53 = vshll.u32 %v2820_v18, 16  ;;  %v1610_v20 = vshrl.u32 %v2816_v9, 16 }
  0x44   : > { %v1613_v13 = vshll.u32 %v2816_v9, 16  ;;  %v982_v33 = vshll.u32 %v3569_v60, 16  ;;  %v967_v44 = vor.u32 %v966_v54, %v963_v51  ;;  %v1342_v45 = vshll.u32 %v3549_v55, 16  ;;  %v3629_v60 = vld [vmem:[%s3307_s23 + $0x50] sm:$0xf] }
  0x45   : > { %3059 = vmatmul.mubr.msk.bf16.vlgmr.msra.gmra.mrb[24].mxu0 %vm232_vm1, %v2782_v15  ;;  %v3578_v15 = vld [vmem:[%s3307_s23 + $0x3c] sm:$0xf]  ;;  %v1642_v21 = vor.u32 %v1641_v29, %v1638_v19  ;;  %v1647_v0 = vrot.slane %v1645_v12, 3  ;;  %v1650_v22 = vrot.slane %v1648_v53, 4  ;;  %v1612_v9 = vrot.slane %v1610_v20, 3 }
  0x46   : > { %3093 = vmatpush3.bf16.msra.mxu0 %v1714_v42  ;;  %3062 = vmatprep.mubr.msk.bf16.mxu0 %vm232_vm1, %v2783_v48  ;;  %v1633_v42 = vor.u32 %v1632_v61, %v1629_v23  ;;  %v3589_v48 = vld [vmem:[%s3307_s23 + $0x40] sm:$0xf]  ;;  %v2821_v24 = vcombine.low %v3573_v7, %v3578_v15  ;;  %v1615_v51 = vrot.slane %v1613_v13, 4  ;;  %v1347_v11 = vshll.u32 %v3615_v34, 16 }
  0x47   : > { %3157 = vmatprep.subr.msk.bf16.mxu0 %vm257_vm0, %v3523_v26  ;;  %v2822_v25 = vcombine.low %v3589_v48, %v3600_v30  ;;  %v981_v18 = vrot.slane %v979_v57, 3  ;;  %v984_v19 = vrot.slane %v982_v33, 4  ;;  %v2824_v29 = vcombine.low %v3629_v60, %v3629_v60  ;;  %v3218_v33 = vld [vmem:[%s3307_s23 + $0x1c] sm:$0xff]  }
  0x48   : > { %3041 = vmatmul.mubr.msk.bf16.vlgmr.msra.gmra.mrb[24].mxu1 %vm232_vm1, %v932_v46  ;;  %v3618_v36 = vsel %vm369_vm2, %v1633_v42, %v1642_v21  ;;  %v1654_v37 = vshrl.u32 %v2821_v24, 16  ;;  %v1657_v39 = vshll.u32 %v2821_v24, 16  ;;  %v1651_v46 = vor.u32 %v1650_v22, %v1647_v0 }
  0x49   : > { %3075 = vmatpush3.bf16.msra.mxu1 %v3499_v10  ;;  %3044 = vmatprep.mubr.msk.bf16.mxu1 %vm232_vm1, %v941_v50  ;;  %v3597_v10 = vsel %vm369_vm2, %v3556_v59, %v1633_v42  ;;  %v1663_v47 = vshrl.u32 %v2822_v25, 16  ;;  %v976_v50 = vor.u32 %v975_v6, %v972_v28  ;;  %v1666_v62 = vshll.u32 %v2822_v25, 16 }
  0x4a   : > { %3156 = vmatprep.subr.msk.bf16.mxu1 %vm257_vm0, %v3554_v56  ;;  %v1656_v23 = vrot.slane %v1654_v37, 3  ;;  %v1659_v61 = vrot.slane %v1657_v39, 4  ;;  %v3633_v54 = vsel %vm369_vm2, %v1642_v21, %v1651_v46  ;;  %v968_v6 = vsel %vm369_vm2, %v3565_v4, %v967_v44 }
  0x4b   : > { %v1665_v42 = vrot.slane %v1663_v47, 3  ;;  %v977_v20 = vsel %vm369_vm2, %v967_v44, %v976_v50  ;;  %v1344_v21 = vrot.slane %v1342_v45, 1  ;;  %v1616_v4 = vor.u32 %v1615_v51, %v1612_v9  ;;  %v3219_v47 = vld [vmem:[%s3307_s23 + $0x24] sm:$0xff]  }
  0x4c   : > { %v1660_v14 = vor.u32 %v1659_v61, %v1656_v23  ;;  %v1681_v57 = vshrl.u32 %v2824_v29, 16  ;;  %v1684_v0 = vshll.u32 %v2824_v29, 16  ;;  %v2788_v25 = vcombine.low %v3480_v58, %v3532_v35 }
  0x4d   : > { %3063 = vmatmul.mubr.msk.bf16.gmra.mrb[28].mxu0 %vm232_vm1, %v2784_v40  ;;  %v3622_v40 = vld [vmem:[%s3307_s23 + $0x48] sm:$0xf]  ;;  %v1349_v44 = vrot.slane %v1347_v11, 1  ;;  %v1345_v45 = vor.u32 %v1344_v21, %v1340_v63  ;;  %v1355_v58 = vshll.u32 %v3218_v33, 16  ;;  %v1351_v55 = vshrl.u32 %v3615_v34, 16  ;;  %v3223_v34 = vld [vmem:[%s3307_s23 + $0x34] sm:$0xff]  }
  0x4e   : > { %3066 = vmatprep.mubr.msk.bf16.mxu0 %vm232_vm1, %v2785_v16  ;;  %v1668_v16 = vrot.slane %v1666_v62, 4  ;;  %v2823_v28 = vcombine.low %v3622_v40, %v3625_v41  ;;  %v1683_v22 = vrot.slane %v1681_v57, 3  ;;  %v1686_v39 = vrot.slane %v1684_v0, 4 }
  0x4f   : > { %v1359_v63 = vshrl.u32 %v3218_v33, 16  ;;  %v1363_v9 = vshll.u32 %v3219_v47, 16  ;;  %v1357_v51 = vrot.slane %v1355_v58, 1  ;;  %v1353_v11 = vor.u32 %v1351_v55, %v1349_v44 }
  0x50   : > { %3045 = vmatmul.mubr.msk.bf16.gmra.mrb[28].mxu1 %vm232_vm1, %v950_v43  ;;  %v3644_v43 = vsel %vm369_vm2, %v1651_v46, %v1660_v14  ;;  %v1672_v12 = vshrl.u32 %v2823_v28, 16  ;;  %v1675_v53 = vshll.u32 %v2823_v28, 16  ;;  %v1625_v46 = vsel %vm369_vm2, %v1616_v4, %v3556_v59  ;;  %v3232_v4 = vld [vmem:[%s3307_s23 + $0x14] sm:$0xff]  }
  0x51   : > { %3048 = vmatprep.mubr.msk.bf16.mxu1 %vm232_vm1, %v959_v52  ;;  %v1669_v52 = vor.u32 %v1668_v16, %v1665_v42  ;;  %v1687_v61 = vor.u32 %v1686_v39, %v1683_v22  ;;  %v1350_v59 = vsel %vm636_vm3, %v1345_v45, %v1349_v44  ;;  %v3221_v42 = vld [vmem:[%s3307_s23 + $0x2c] sm:$0xff]   ;;  %v1365_v16 = vrot.slane %v1363_v9, 1 }
  0x52   : > { %v1674_v13 = vrot.slane %v1672_v12, 3  ;;  %v1371_v28 = vshll.u32 %v3221_v42, 16  ;;  %v1375_v29 = vshrl.u32 %v3221_v42, 16  ;;  %v3225_v12 = vld [vmem:[%s3307_s23 + $0x3c] sm:$0xff]   ;;  %v2044_v33 = vshll.u32 %v3232_v4, 16  ;;  %v3236_v9 = vld [vmem:[%s3307_s23 + $0x2c] sm:$0xff]  }
  0x53   : > { %v3649_v24 = vsel %vm369_vm2, %v1660_v14, %v1669_v52  ;;  %v2134_v14 = vsel %vm257_vm0, %v3523_v26, 0  ;;  %v1387_v57 = vshll.u32 %v3225_v12, 16  ;;  %v2042_v45 = vshrl.u32 %v3232_v4, 16 }
  0x55   : > { %3067 = vmatmul.mubr.msk.bf16.gmra.mrb[32].mxu0 %vm232_vm1, %v2786_v17  ;;  %v1677_v17 = vrot.slane %v1675_v53, 4 }
  0x56   : > { %3070 = vmatprep.mubr.msk.bf16.mxu0 %vm232_vm1, %v2787_v31  ;;  %v985_v31 = vor.u32 %v984_v19, %v981_v18  ;;  %v1367_v18 = vshrl.u32 %v3219_v47, 16  ;;  %v1864_v19 = vsel %vm257_vm0, %v3554_v56, 0  ;;  %v3234_v47 = vld [vmem:[%s3307_s23 + $0x24] sm:$0xff]  }
  0x57   : > { %v1678_v37 = vor.u32 %v1677_v17, %v1674_v13  ;;  %v1383_v13 = vshrl.u32 %v3223_v34, 16  ;;  %v1391_v17 = vshrl.u32 %v3225_v12, 16  ;;  %v2069_v12 = vshrl.u32 %v3236_v9, 16 }
  0x58   : > { %3049 = vmatmul.mubr.msk.bf16.gmra.mrb[32].mxu1 %vm232_vm1, %v968_v6  ;;  %v986_v62 = vsel %vm369_vm2, %v976_v50, %v985_v31  ;;  %v1361_v50 = vor.u32 %v1359_v63, %v1357_v51  ;;  %v1358_v6 = vsel %vm636_vm3, %v1353_v11, %v1357_v51  ;;  %v1369_v53 = vor.u32 %v1367_v18, %v1365_v16  ;;  %v3229_v31 = vld [vmem:[%s3307_s23 + $0x4c] ss:$0 sps:$4 sm:$0x11]  }
  0x59   : > { %3052 = vmatprep.mubr.msk.bf16.mxu1 %vm232_vm1, %v977_v20  ;;  %v3662_v23 = vsel %vm369_vm2, %v1669_v52, %v1678_v37  ;;  %v3666_v35 = vsel %vm369_vm2, %v1678_v37, %v1687_v61  ;;  %v1379_v52 = vshll.u32 %v3223_v34, 16  ;;  %v1389_v37 = vrot.slane %v1387_v57, 1  ;;  %v3238_v34 = vld [vmem:[%s3307_s23 + $0x34] sm:$0xff]  }
  0x5a   : > { %v1366_v26 = vsel %vm636_vm3, %v1361_v50, %v1365_v16  ;;  %v2057_v51 = vshll.u32 %v3234_v47, 16  ;;  %v2065_v50 = vshll.u32 %v3236_v9, 16 }
  0x5b   : > { %v1381_v21 = vrot.slane %v1379_v52, 1  ;;  %v2073_v52 = vshll.u32 %v3238_v34, 16 }
  0x5c   : > { %v2059_v16 = vrot.slane %v2057_v51, 1 }
  0x5d   : > { %3071 = vmatmul.mubr.msk.bf16.gmra.mrb[36].mxu0 %vm232_vm1, %v2788_v25  ;;  %v3233_v25 = vld [vmem:[%s3307_s23 + $0x1c] sm:$0xff]   ;;  %v1385_v39 = vor.u32 %v1383_v13, %v1381_v21  ;;  %v3244_v13 = vld [vmem:[%s3307_s23 + $0x4c] sm:$0xff]  }
  0x5e   : > { %3094 = vmatprep.mubr.msk.bf16.mxu0 %vm232_vm1, %v1625_v46  ;;  %v2049_v46 = vshll.u32 %v3233_v25, 16  ;;  %v2053_v11 = vshrl.u32 %v3233_v25, 16  ;;  %v2097_v25 = vshll.u32 %v3244_v13, 16 }
  0x5f   : > { %v1390_v61 = vsel %vm636_vm3, %v1385_v39, %v1389_v37  ;;  %v3246_v39 = vld [vmem:[%s3307_s23 + $0x54] ss:$0 sps:$4 sm:$0x11]  }
  0x60   : > { %3053 = vmatmul.mubr.msk.bf16.gmra.mrb[36].mxu1 %vm232_vm1, %v986_v62  ;;  %v1403_v62 = vshll.u32 %v3229_v31, 16  ;;  %v2051_v63 = vrot.slane %v2049_v46, 1  ;;  %v2099_v31 = vrot.slane %v2097_v25, 1 }
  0x61   : > { %3076 = vmatprep.mubr.msk.bf16.mxu1 %vm232_vm1, %v1350_v59 }
  0x62   : > { %v1405_v42 = vrot.slane %v1403_v62, 1  ;;  %v2055_v18 = vor.u32 %v2053_v11, %v2051_v63 }
  0x65   : > { %3095 = vmatmul.mubr.msk.bf16.vlgmr.msra.gmra.mrb[40].mxu0 %vm232_vm1, %v3597_v10  ;;  %v1373_v10 = vrot.slane %v1371_v28, 1 }
  0x66   : > { %3129 = vmatpush3.bf16.msra.mxu0 %v2134_v14  ;;  %3098 = vmatprep.mubr.msk.bf16.mxu0 %vm232_vm1, %v3618_v36  ;;  %v3227_v36 = vld [vmem:[%s3307_s23 + $0x44] sm:$0xff]  }
  0x67   : > { %v1377_v20 = vor.u32 %v1375_v29, %v1373_v10  ;;  %v1374_v56 = vsel %vm636_vm3, %v1369_v53, %v1373_v10  ;;  %v1395_v22 = vshll.u32 %v3227_v36, 16  ;;  %v1399_v58 = vshrl.u32 %v3227_v36, 16  ;;  %v3240_v29 = vld [vmem:[%s3307_s23 + $0x3c] sm:$0xff]  }
  0x68   : > { %3077 = vmatmul.mubr.msk.bf16.vlgmr.msra.gmra.mrb[40].mxu1 %vm232_vm1, %v1358_v6  ;;  %v2834_v6 = vcombine.low %v3536_v38, %v3483_v1  ;;  %v2077_v53 = vshrl.u32 %v3238_v34, 16  ;;  %v2081_v1 = vshll.u32 %v3240_v29, 16  ;;  %v2835_v38 = vcombine.low %v3486_v2, %v3489_v5 }
  0x69   : > { %3111 = vmatpush3.bf16.msra.mxu1 %v1864_v19  ;;  %3080 = vmatprep.mubr.msk.bf16.mxu1 %vm232_vm1, %v1366_v26  ;;  %v1382_v0 = vsel %vm636_vm3, %v1377_v20, %v1381_v21  ;;  %v1397_v44 = vrot.slane %v1395_v22, 1  ;;  %v2067_v26 = vrot.slane %v2065_v50, 1  ;;  %v2075_v20 = vrot.slane %v2073_v52, 1  ;;  %v3242_v21 = vld [vmem:[%s3307_s23 + $0x44] sm:$0xff]  }
  0x6a   : > { %v2836_v36 = vcombine.low %v3493_v8, %v3526_v27  ;;  %v2085_v5 = vshrl.u32 %v3240_v29, 16  ;;  %v2093_v22 = vshrl.u32 %v3242_v21, 16  ;;  %v2837_v8 = vcombine.low %v3529_v32, %v3543_v49 }
  0x6b   : > { %v2071_v4 = vor.u32 %v2069_v12, %v2067_v26  ;;  %v2079_v57 = vor.u32 %v2077_v53, %v2075_v20  ;;  %v2101_v32 = vshrl.u32 %v3244_v13, 16  ;;  %v2105_v49 = vshll.u32 %v3246_v39, 16 }
  0x6d   : > { %3099 = vmatmul.mubr.msk.bf16.gmra.mrb[44].mxu0 %vm232_vm1, %v3633_v54  ;;  %v1393_v54 = vor.u32 %v1391_v17, %v1389_v37  ;;  %v2089_v17 = vshll.u32 %v3242_v21, 16  ;;  %v2076_v2 = vsel %vm636_vm3, %v2071_v4, %v2075_v20  ;;  %v2107_v46 = vrot.slane %v2105_v49, 1 }
  0x6e   : > { %3102 = vmatprep.mubr.msk.bf16.mxu0 %vm232_vm1, %v3644_v43  ;;  %v2046_v43 = vrot.slane %v2044_v33, 1  ;;  %v2838_v33 = vcombine.low %v3563_v3, %v3573_v7  ;;  %v2839_v3 = vcombine.low %v3578_v15, %v3589_v48  ;;  %v2840_v7 = vcombine.low %v3600_v30, %v3622_v40 }
  0x6f   : > { %v1398_v55 = vsel %vm636_vm3, %v1393_v54, %v1397_v44  ;;  %v2091_v27 = vrot.slane %v2089_v17, 1  ;;  %v3255_v15 = vmov 0   ;;  %v3256_v48 = vmov 0.0|0.0  }
  0x70   : > { %3081 = vmatmul.mubr.msk.bf16.gmra.mrb[44].mxu1 %vm232_vm1, %v1374_v56  ;;  %v2047_v59 = vor.u32 %v2046_v43, %v2042_v45  ;;  %v2083_v56 = vrot.slane %v2081_v1, 1  ;;  %v2103_v43 = vor.u32 %v2101_v32, %v2099_v31  ;;  %2562 = vst.msk [vmem:[%s3765_s11] sm:$0xf] %vm2561_vm4, %v3255_v15  ;;  %2563 = vst.msk [vmem:[%s3765_s11 + $0x4] sm:$0xf] %vm2561_vm4, %v3255_v15 }
  0x71   : > { %3084 = vmatprep.mubr.msk.bf16.mxu1 %vm232_vm1, %v1382_v0  ;;  %v2095_v54 = vor.u32 %v2093_v22, %v2091_v27  ;;  %2564 = vst.msk [vmem:[%s3765_s11 + $0x8] sm:$0xf] %vm2561_vm4, %v3255_v15  ;;  %2565 = vst.msk [vmem:[%s3765_s11 + $0x4c] sm:$0xf] %vm2561_vm4, %v3255_v15 }
  0x72   : > { %v2052_v14 = vsel %vm636_vm3, %v2047_v59, %v2051_v63  ;;  %v2084_v0 = vsel %vm636_vm3, %v2079_v57, %v2083_v56  ;;  %v2087_v37 = vor.u32 %v2085_v5, %v2083_v56  ;;  %2566 = vst.msk [vmem:[%s3765_s11 + $0x50] sm:$0xf] %vm2561_vm4, %v3255_v15  ;;  %2567 = vst.msk [vmem:[%s3765_s11 + $0x54] sm:$0xf] %vm2561_vm4, %v3255_v15 }
  0x73   : > { %v2100_v45 = vsel %vm636_vm3, %v2095_v54, %v2099_v31  ;;  %2633 = vst.msk [vmem:[%s3765_s11 + $0x10] sm:$0xf] %vm2561_vm4, %v3256_v48  ;;  %2635 = vst.msk [vmem:[%s3765_s11 + $0x18] sm:$0xf] %vm2561_vm4, %v3256_v48 }
  0x74   : > { %2637 = vst.msk [vmem:[%s3765_s11 + $0x20] sm:$0xf] %vm2561_vm4, %v3256_v48  ;;  %2639 = vst.msk [vmem:[%s3765_s11 + $0x28] sm:$0xf] %vm2561_vm4, %v3256_v48 }
  0x75   : > { %3103 = vmatmul.mubr.msk.bf16.gmra.mrb[48].mxu0 %vm232_vm1, %v3649_v24  ;;  %v1401_v24 = vor.u32 %v1399_v58, %v1397_v44  ;;  %v2092_v44 = vsel %vm636_vm3, %v2087_v37, %v2091_v27  ;;  %2641 = vst.msk [vmem:[%s3765_s11 + $0x30] sm:$0xf] %vm2561_vm4, %v3256_v48  ;;  %2643 = vst.msk [vmem:[%s3765_s11 + $0x38] sm:$0xf] %vm2561_vm4, %v3256_v48 }
  0x76   : > { %3106 = vmatprep.mubr.msk.bf16.mxu0 %vm232_vm1, %v3662_v23  ;;  %v2061_v23 = vshrl.u32 %v3234_v47, 16  ;;  %v2108_v47 = vsel %vm636_vm3, %v2103_v43, %v2107_v46  ;;  %2645 = vst.msk [vmem:[%s3765_s11 + $0x40] sm:$0xf] %vm2561_vm4, %v3256_v48  ;;  %2647 = vst.msk [vmem:[%s3765_s11 + $0x48] sm:$0xf] %vm2561_vm4, %v3256_v48 }
  0x77   : > { %v1406_v28 = vsel %vm636_vm3, %v1401_v24, %v1405_v42 }
  0x78   : > { %3085 = vmatmul.mubr.msk.bf16.gmra.mrb[48].mxu1 %vm232_vm1, %v1390_v61  ;;  %v2063_v19 = vor.u32 %v2061_v23, %v2059_v16  ;;  %v2841_v61 = vcombine.low %v3625_v41, %v3629_v60 }
  0x79   : > { %3088 = vmatprep.mubr.msk.bf16.mxu1 %vm232_vm1, %v1398_v55 }
  0x7a   : > { %v2068_v10 = vsel %vm636_vm3, %v2063_v19, %v2067_v26 }
  0x7d   : > { %3107 = vmatmul.mubr.msk.bf16.gmra.mrb[52].mxu0 %vm232_vm1, %v3666_v35  ;;  %v2060_v35 = vsel %vm636_vm3, %v2055_v18, %v2059_v16 }
  0x7e   : > { %3130 = vmatprep.mubr.msk.bf16.mxu0 %vm232_vm1, %v2052_v14 }
  0x80   : > { %3089 = vmatmul.mubr.msk.bf16.gmra.mrb[52].mxu1 %vm232_vm1, %v1406_v28 }
  0x81   : > { %3112 = vmatprep.mubr.msk.bf16.mxu1 %vm232_vm1, %v2834_v6 }
  0x85   : > { %3131 = vmatmul.mubr.msk.bf16.vlgmr.msra.gmra.mrb[56].mxu0 %vm232_vm1, %v2060_v35 }
  0x86   : > { %3134 = vmatprep.mubr.msk.bf16.mxu0 %vm232_vm1, %v2068_v10 }
  0x88   : > { %3113 = vmatmul.mubr.msk.bf16.vlgmr.msra.gmra.mrb[56].mxu1 %vm232_vm1, %v2835_v38 }
  0x89   : > { %3116 = vmatprep.mubr.msk.bf16.mxu1 %vm232_vm1, %v2836_v36 }
  0x8d   : > { %3135 = vmatmul.mubr.msk.bf16.gmra.mrb[60].mxu0 %vm232_vm1, %v2076_v2 }
  0x8e   : > { %3138 = vmatprep.mubr.msk.bf16.mxu0 %vm232_vm1, %v2084_v0 }
  0x90   : > { %3117 = vmatmul.mubr.msk.bf16.gmra.mrb[60].mxu1 %vm232_vm1, %v2837_v8 }
  0x91   : > { %3120 = vmatprep.mubr.msk.bf16.mxu1 %vm232_vm1, %v2838_v33 }
  0x95   : > { %3139 = vmatmul.mubr.msk.bf16.gmra.mrb[64].mxu0 %vm232_vm1, %v2092_v44 }
  0x96   : > { %3142 = vmatprep.mubr.msk.bf16.mxu0 %vm232_vm1, %v2100_v45 }
  0x98   : > { %3121 = vmatmul.mubr.msk.bf16.gmra.mrb[64].mxu1 %vm232_vm1, %v2839_v3 }
  0x99   : > { %3124 = vmatprep.mubr.msk.bf16.mxu1 %vm232_vm1, %v2840_v7 }
  0x9d   : > { %3143 = vmatmul.mubr.msk.bf16.gmra.mrb[68].mxu0 %vm232_vm1, %v2108_v47 }
  0xa0   : > { %3125 = vmatmul.mubr.msk.bf16.gmra.mrb[68].mxu1 %vm232_vm1, %v2841_v61 }
  0xe8   : > { %v2988_v30 = vpop.f32.mrb[0].mxu0 }
  0xe9   : > { %v295_v40 = vpop.f32.mrb[1].mxu0 }
  0xea   : > { %v2989_v41 = vpop.f32.mrb[2].mxu0 }
  0xeb   : > { %v298_v60 = vpop.f32.mrb[3].mxu0  ;;  %v2996_v58 = vpop.f32.mrb[0].mxu1 }
  0xec   : > { %v327_v62 = vpop.f32.mrb[1].mxu1 }
  0xed   : > { %v2997_v55 = vpop.f32.mrb[2].mxu1 }
  0xee   : > { %v330_v59 = vpop.f32.mrb[3].mxu1 }
  0xf0   : > { %v2992_v63 = vpop.f32.mrb[4].mxu0 }
  0xf1   : > { %v311_v9 = vpop.f32.mrb[5].mxu0 }
  0xf2   : > { %v2993_v51 = vpop.f32.mrb[6].mxu0 }
  0xf3   : > { %v314_v24 = vpop.f32.mrb[7].mxu0  ;;  %v3000_v42 = vpop.f32.mrb[4].mxu1 }
  0xf4   : > { %v343_v11 = vpop.f32.mrb[5].mxu1 }
  0xf5   : > { %v3001_v14 = vpop.f32.mrb[6].mxu1 }
  0xf6   : > { %v346_v23 = vpop.f32.mrb[7].mxu1 }
  0xf8   : > { %v3024_v50 = vpop.f32.mrb[8].mxu0 }
  0xf9   : > { %v766_v16 = vpop.f32.mrb[9].mxu0 }
  0xfa   : > { %v3025_v34 = vpop.f32.mrb[10].mxu0 }
  0xfb   : > { %v769_v28 = vpop.f32.mrb[11].mxu0  ;;  %v3006_v6 = vpop.f32.mrb[8].mxu1 }
  0xfc   : > { %v520_v18 = vadd.f32 %v3006_v6, %v2988_v30  ;;  %v511_v19 = vpop.f32.mrb[9].mxu1 }
  0xfd   : > { %v512_v26 = vadd.f32 %v511_v19, %v295_v40  ;;  %v3007_v29 = vpop.f32.mrb[10].mxu1 }
  0xfe   : > { %v831_v52 = vadd.f32 %v3024_v50, %v520_v18  ;;  %v514_v35 = vpop.f32.mrb[11].mxu1 }
  0xff   : > { %v829_v12 = vadd.f32 %v766_v16, %v512_v26 }
 0x100   : > { %v3028_v10 = vpop.f32.mrb[12].mxu0 }
 0x101   : > { %v782_v53 = vpop.f32.mrb[13].mxu0 }
 0x102   : > { %v3029_v1 = vpop.f32.mrb[14].mxu0 }
 0x103   : > { %v785_v38 = vpop.f32.mrb[15].mxu0  ;;  %v3010_v20 = vpop.f32.mrb[12].mxu1 }
 0x104   : > { %v536_v21 = vadd.f32 %v3010_v20, %v2992_v63  ;;  %v527_v36 = vpop.f32.mrb[13].mxu1 }
 0x105   : > { %v528_v4 = vadd.f32 %v527_v36, %v311_v9  ;;  %v3011_v57 = vpop.f32.mrb[14].mxu1 }
 0x106   : > { %v835_v56 = vadd.f32 %v3028_v10, %v536_v21  ;;  %v530_v13 = vpop.f32.mrb[15].mxu1 }
 0x107   : > { %v833_v17 = vadd.f32 %v782_v53, %v528_v4 }
 0x108   : > { %v3032_v2 = vpop.f32.mrb[16].mxu0 }
 0x109   : > { %v798_v5 = vpop.f32.mrb[17].mxu0 }
 0x10a   : > { %v3033_v0 = vpop.f32.mrb[18].mxu0 }
 0x10b   : > { %v801_v22 = vpop.f32.mrb[19].mxu0  ;;  %v3014_v25 = vpop.f32.mrb[16].mxu1 }
 0x10c   : > { %v552_v8 = vadd.f32 %v3014_v25, %v2996_v58  ;;  %v543_v27 = vpop.f32.mrb[17].mxu1 }
 0x10d   : > { %v544_v33 = vadd.f32 %v543_v27, %v327_v62  ;;  %v3015_v37 = vpop.f32.mrb[18].mxu1 }
 0x10e   : > { %v839_v39 = vadd.f32 %v3032_v2, %v552_v8  ;;  %v546_v54 = vpop.f32.mrb[19].mxu1 }
 0x10f   : > { %v837_v31 = vadd.f32 %v798_v5, %v544_v33 }
 0x110   : > { %v3036_v44 = vpop.f32.mrb[20].mxu0 }
 0x111   : > { %v814_v32 = vpop.f32.mrb[21].mxu0 }
 0x112   : > { %v3037_v49 = vpop.f32.mrb[22].mxu0 }
 0x113   : > { %v817_v45 = vpop.f32.mrb[23].mxu0  ;;  %v3018_v3 = vpop.f32.mrb[20].mxu1 }
 0x114   : > { %v568_v7 = vadd.f32 %v3018_v3, %v3000_v42  ;;  %v559_v43 = vpop.f32.mrb[21].mxu1 }
 0x115   : > { %v560_v46 = vadd.f32 %v559_v43, %v343_v11  ;;  %v3019_v47 = vpop.f32.mrb[22].mxu1 }
 0x116   : > { %v843_v61 = vadd.f32 %v3036_v44, %v568_v7  ;;  %v562_v15 = vpop.f32.mrb[23].mxu1 }
 0x117   : > { %v841_v48 = vadd.f32 %v814_v32, %v560_v46 }
 0x118   : > { %v3060_v30 = vpop.f32.mrb[24].mxu0 }
 0x119   : > { %v1198_v40 = vpop.f32.mrb[25].mxu0 }
 0x11a   : > { %v3061_v41 = vpop.f32.mrb[26].mxu0 }
 0x11b   : > { %v1201_v60 = vpop.f32.mrb[27].mxu0  ;;  %v3042_v58 = vpop.f32.mrb[24].mxu1 }
 0x11c   : > { %v1113_v62 = vadd.f32 %v3042_v58, %v831_v52  ;;  %v1048_v55 = vpop.f32.mrb[25].mxu1 }
 0x11d   : > { %v1111_v59 = vadd.f32 %v1048_v55, %v829_v12  ;;  %v3043_v63 = vpop.f32.mrb[26].mxu1 }
 0x11e   : > { %v1263_v9 = vadd.f32 %v3060_v30, %v1113_v62  ;;  %v1051_v51 = vpop.f32.mrb[27].mxu1 }
 0x11f   : > { %v1261_v24 = vadd.f32 %v1198_v40, %v1111_v59 }
 0x120   : > { %v3064_v14 = vpop.f32.mrb[28].mxu0 }
 0x121   : > { %v1214_v42 = vpop.f32.mrb[29].mxu0 }
 0x122   : > { %v3065_v23 = vpop.f32.mrb[30].mxu0 }
 0x123   : > { %v1217_v11 = vpop.f32.mrb[31].mxu0  ;;  %v3046_v50 = vpop.f32.mrb[28].mxu1 }
 0x124   : > { %v1117_v16 = vadd.f32 %v3046_v50, %v835_v56  ;;  %v1064_v34 = vpop.f32.mrb[29].mxu1 }
 0x125   : > { %v1115_v28 = vadd.f32 %v1064_v34, %v833_v17  ;;  %v3047_v6 = vpop.f32.mrb[30].mxu1 }
 0x126   : > { %v1267_v18 = vadd.f32 %v3064_v14, %v1117_v16  ;;  %v1067_v19 = vpop.f32.mrb[31].mxu1 }
 0x127   : > { %v1265_v26 = vadd.f32 %v1214_v42, %v1115_v28 }
 0x128   : > { %v3068_v29 = vpop.f32.mrb[32].mxu0 }
 0x129   : > { %v1230_v52 = vpop.f32.mrb[33].mxu0 }
 0x12a   : > { %v3069_v35 = vpop.f32.mrb[34].mxu0 }
 0x12b   : > { %v1233_v12 = vpop.f32.mrb[35].mxu0  ;;  %v3050_v10 = vpop.f32.mrb[32].mxu1 }
 0x12c   : > { %v1121_v53 = vadd.f32 %v3050_v10, %v839_v39  ;;  %v1080_v1 = vpop.f32.mrb[33].mxu1 }
 0x12d   : > { %v1119_v38 = vadd.f32 %v1080_v1, %v837_v31  ;;  %v3051_v20 = vpop.f32.mrb[34].mxu1 }
 0x12e   : > { %v1271_v21 = vadd.f32 %v3068_v29, %v1121_v53  ;;  %v1083_v36 = vpop.f32.mrb[35].mxu1 }
 0x12f   : > { %v1269_v4 = vadd.f32 %v1230_v52, %v1119_v38 }
 0x130   : > { %v3072_v57 = vpop.f32.mrb[36].mxu0 }
 0x131   : > { %v1246_v56 = vpop.f32.mrb[37].mxu0 }
 0x132   : > { %v3073_v13 = vpop.f32.mrb[38].mxu0 }
 0x133   : > { %v1249_v17 = vpop.f32.mrb[39].mxu0  ;;  %v3054_v2 = vpop.f32.mrb[36].mxu1 }
 0x134   : > { %v1125_v5 = vadd.f32 %v3054_v2, %v843_v61  ;;  %v1096_v0 = vpop.f32.mrb[37].mxu1  ;;  %v3802_v17 = vld [vmem:[%s3835_s2] ss:$0 sm:$0xff] }
 0x135   : > { %v1123_v22 = vadd.f32 %v1096_v0, %v841_v48  ;;  %v3055_v25 = vpop.f32.mrb[38].mxu1 }
 0x136   : > { %v1275_v8 = vadd.f32 %v3072_v57, %v1125_v5  ;;  %v1099_v27 = vpop.f32.mrb[39].mxu1 }
 0x137   : > { %v1273_v33 = vadd.f32 %v1246_v56, %v1123_v22 }
 0x138   : > { %v3096_v37 = vpop.f32.mrb[40].mxu0 }
 0x139   : > { %v1750_v39 = vpop.f32.mrb[41].mxu0 }
 0x13a   : > { %v3097_v54 = vpop.f32.mrb[42].mxu0 }
 0x13b   : > { %v1753_v31 = vpop.f32.mrb[43].mxu0  ;;  %v3078_v44 = vpop.f32.mrb[40].mxu1 }
 0x13c   : > { %v1533_v32 = vadd.f32 %v3078_v44, %v1263_v9  ;;  %v1468_v49 = vpop.f32.mrb[41].mxu1 }
 0x13d   : > { %v1531_v45 = vadd.f32 %v1468_v49, %v1261_v24  ;;  %v3079_v3 = vpop.f32.mrb[42].mxu1 }
 0x13e   : > { %v1815_v7 = vadd.f32 %v3096_v37, %v1533_v32  ;;  %v1471_v43 = vpop.f32.mrb[43].mxu1 }
 0x13f   : > { %v1813_v46 = vadd.f32 %v1750_v39, %v1531_v45 }
 0x140   : > { %v3100_v47 = vpop.f32.mrb[44].mxu0 }
 0x141   : > { %v1766_v61 = vpop.f32.mrb[45].mxu0 }
 0x142   : > { %v3101_v15 = vpop.f32.mrb[46].mxu0 }
 0x143   : > { %v1769_v48 = vpop.f32.mrb[47].mxu0  ;;  %v3082_v30 = vpop.f32.mrb[44].mxu1 }
 0x144   : > { %v1537_v40 = vadd.f32 %v3082_v30, %v1267_v18  ;;  %v1484_v41 = vpop.f32.mrb[45].mxu1 }
 0x145   : > { %v1535_v60 = vadd.f32 %v1484_v41, %v1265_v26  ;;  %v3083_v58 = vpop.f32.mrb[46].mxu1 }
 0x146   : > { %v1819_v62 = vadd.f32 %v3100_v47, %v1537_v40  ;;  %v1487_v55 = vpop.f32.mrb[47].mxu1 }
 0x147   : > { %v1817_v59 = vadd.f32 %v1766_v61, %v1535_v60 }
 0x148   : > { %v3104_v63 = vpop.f32.mrb[48].mxu0 }
 0x149   : > { %v1782_v9 = vpop.f32.mrb[49].mxu0 }
 0x14a   : > { %v3105_v51 = vpop.f32.mrb[50].mxu0 }
 0x14b   : > { %v1785_v24 = vpop.f32.mrb[51].mxu0  ;;  %v3086_v14 = vpop.f32.mrb[48].mxu1 }
 0x14c   : > { %v1541_v42 = vadd.f32 %v3086_v14, %v1271_v21  ;;  %v1500_v23 = vpop.f32.mrb[49].mxu1 }
 0x14d   : > { %v1539_v11 = vadd.f32 %v1500_v23, %v1269_v4  ;;  %v3087_v50 = vpop.f32.mrb[50].mxu1 }
 0x14e   : > { %v1823_v16 = vadd.f32 %v3104_v63, %v1541_v42  ;;  %v1503_v34 = vpop.f32.mrb[51].mxu1 }
 0x14f   : > { %v1821_v28 = vadd.f32 %v1782_v9, %v1539_v11 }
 0x150   : > { %v3108_v6 = vpop.f32.mrb[52].mxu0 }
 0x151   : > { %v1798_v18 = vpop.f32.mrb[53].mxu0 }
 0x152   : > { %v3109_v19 = vpop.f32.mrb[54].mxu0 }
 0x153   : > { %v1801_v26 = vpop.f32.mrb[55].mxu0  ;;  %v3090_v29 = vpop.f32.mrb[52].mxu1 }
 0x154   : > { %v1545_v52 = vadd.f32 %v3090_v29, %v1275_v8  ;;  %v1516_v35 = vpop.f32.mrb[53].mxu1 }
 0x155   : > { %v1543_v12 = vadd.f32 %v1516_v35, %v1273_v33  ;;  %v3091_v10 = vpop.f32.mrb[54].mxu1 }
 0x156   : > { %v3795_v53 = vadd.f32 %v3108_v6, %v1545_v52  ;;  %v1519_v1 = vpop.f32.mrb[55].mxu1 }
 0x157   : > { %v3797_v38 = vadd.f32 %v1798_v18, %v1543_v12 }
 0x158   : > { %v3132_v20 = vpop.f32.mrb[56].mxu0 }
 0x159   : > { %v2170_v21 = vpop.f32.mrb[57].mxu0 }
 0x15a   : > { %v3133_v36 = vpop.f32.mrb[58].mxu0 }
 0x15b   : > { %v2173_v4 = vpop.f32.mrb[59].mxu0  ;;  %v3114_v57 = vpop.f32.mrb[56].mxu1 }
 0x15c   : > { %v1965_v56 = vadd.f32 %v3114_v57, %v1815_v7  ;;  %v1900_v13 = vpop.f32.mrb[57].mxu1 }
 0x15d   : > { %v1963_v2 = vadd.f32 %v1900_v13, %v1813_v46  ;;  %v3115_v5 = vpop.f32.mrb[58].mxu1 }
 0x15e   : > { %v2235_v0 = vadd.f32 %v3132_v20, %v1965_v56  ;;  %v1903_v22 = vpop.f32.mrb[59].mxu1 }
 0x15f   : > { %v2233_v25 = vadd.f32 %v2170_v21, %v1963_v2 }
 0x160   : > { %v3136_v8 = vpop.f32.mrb[60].mxu0  ;;  %v2258_v27 = vadd.f32 %v3802_v17, %v2235_v0 }
 0x161   : > { %v2186_v33 = vpop.f32.mrb[61].mxu0  ;;  %v2256_v37 = vadd.f32 %v3802_v17, %v2233_v25 }
 0x162   : > { %v3137_v39 = vpop.f32.mrb[62].mxu0  ;;  %v2274_v54 = vmax.f32 %v2258_v27, 0.0 }
 0x163   : > { %v2189_v31 = vpop.f32.mrb[63].mxu0  ;;  %v2272_v44 = vmax.f32 %v2256_v37, 0.0  ;;  %v3118_v32 = vpop.f32.mrb[60].mxu1 }
 0x164   : > { %v2889_v49 = vpack.c.bf16 %v2274_v54, %v2274_v54  ;;  %v1969_v45 = vadd.f32 %v3118_v32, %v1819_v62  ;;  %v1916_v3 = vpop.f32.mrb[61].mxu1 }
 0x165   : > { %v2887_v7 = vpack.c.bf16 %v2272_v44, %v2272_v44  ;;  %v1967_v43 = vadd.f32 %v1916_v3, %v1817_v59  ;;  %v3119_v46 = vpop.f32.mrb[62].mxu1 }
 0x166   : > { %2634 = vst.msk [vmem:[%s3765_s11 + $0x14] sm:$0xf] %vm2561_vm4, %v2889_v49  ;;  %v2239_v47 = vadd.f32 %v3136_v8, %v1969_v45  ;;  %v1919_v61 = vpop.f32.mrb[63].mxu1 }
 0x167   : > { %2632 = vst.msk [vmem:[%s3765_s11 + $0xc] sm:$0xf] %vm2561_vm4, %v2887_v7  ;;  %v2237_v15 = vadd.f32 %v2186_v33, %v1967_v43 }
 0x168   : > { %v3140_v48 = vpop.f32.mrb[64].mxu0  ;;  %v2262_v30 = vadd.f32 %v3802_v17, %v2239_v47 }
 0x169   : > { %v2202_v40 = vpop.f32.mrb[65].mxu0  ;;  %v2260_v41 = vadd.f32 %v3802_v17, %v2237_v15 }
 0x16a   : > { %v3141_v60 = vpop.f32.mrb[66].mxu0  ;;  %v2278_v58 = vmax.f32 %v2262_v30, 0.0 }
 0x16b   : > { %v2205_v62 = vpop.f32.mrb[67].mxu0  ;;  %v2276_v55 = vmax.f32 %v2260_v41, 0.0  ;;  %v3122_v59 = vpop.f32.mrb[64].mxu1 }
 0x16c   : > { %v2893_v63 = vpack.c.bf16 %v2278_v58, %v2278_v58  ;;  %v1973_v9 = vadd.f32 %v3122_v59, %v1823_v16  ;;  %v1932_v51 = vpop.f32.mrb[65].mxu1 }
 0x16d   : > { %v2891_v24 = vpack.c.bf16 %v2276_v55, %v2276_v55  ;;  %v1971_v14 = vadd.f32 %v1932_v51, %v1821_v28  ;;  %v3123_v42 = vpop.f32.mrb[66].mxu1 }
 0x16e   : > { %2638 = vst.msk [vmem:[%s3765_s11 + $0x24] sm:$0xf] %vm2561_vm4, %v2893_v63  ;;  %v2243_v23 = vadd.f32 %v3140_v48, %v1973_v9  ;;  %v1935_v11 = vpop.f32.mrb[67].mxu1 }
 0x16f   : > { %2636 = vst.msk [vmem:[%s3765_s11 + $0x1c] sm:$0xf] %vm2561_vm4, %v2891_v24  ;;  %v2241_v50 = vadd.f32 %v2202_v40, %v1971_v14 }
 0x170   : > { %v3144_v34 = vpop.f32.mrb[68].mxu0  ;;  %v2266_v6 = vadd.f32 %v3802_v17, %v2243_v23 }
 0x171   : > { %v2218_v18 = vpop.f32.mrb[69].mxu0  ;;  %v2264_v19 = vadd.f32 %v3802_v17, %v2241_v50 }
 0x172   : > { %v3145_v16 = vpop.f32.mrb[70].mxu0  ;;  %v2282_v26 = vmax.f32 %v2266_v6, 0.0 }
 0x173   : > { %v2221_v29 = vpop.f32.mrb[71].mxu0  ;;  %v2280_v28 = vmax.f32 %v2264_v19, 0.0  ;;  %v3126_v52 = vpop.f32.mrb[68].mxu1 }
 0x174   : > { %v2897_v35 = vpack.c.bf16 %v2282_v26, %v2282_v26  ;;  %v1977_v12 = vadd.f32 %v3126_v52, %v3795_v53  ;;  %v1948_v10 = vpop.f32.mrb[69].mxu1 }
 0x175   : > { %v2895_v1 = vpack.c.bf16 %v2280_v28, %v2280_v28  ;;  %v1975_v20 = vadd.f32 %v1948_v10, %v3797_v38  ;;  %v3127_v21 = vpop.f32.mrb[70].mxu1 }
 0x176   : > { %2642 = vst.msk [vmem:[%s3765_s11 + $0x34] sm:$0xf] %vm2561_vm4, %v2897_v35  ;;  %v2247_v36 = vadd.f32 %v3144_v34, %v1977_v12  ;;  %v1951_v4 = vpop.f32.mrb[71].mxu1 }
 0x177   : > { %2640 = vst.msk [vmem:[%s3765_s11 + $0x2c] sm:$0xf] %vm2561_vm4, %v2895_v1  ;;  %v2245_v57 = vadd.f32 %v2218_v18, %v1975_v20 }
 0x178   : > { %v2270_v56 = vadd.f32 %v3802_v17, %v2247_v36 }
 0x179   : > { %v2268_v13 = vadd.f32 %v3802_v17, %v2245_v57 }
 0x17a   : > { %v2286_v2 = vmax.f32 %v2270_v56, 0.0 }
 0x17b   : > { %v2284_v53 = vmax.f32 %v2268_v13, 0.0 }
 0x17c   : > { %v2901_v5 = vpack.c.bf16 %v2286_v2, %v2286_v2 }
 0x17d   : > { %v2899_v0 = vpack.c.bf16 %v2284_v53, %v2284_v53 }
 0x17e   : > { %2646 = vst.msk [vmem:[%s3765_s11 + $0x44] sm:$0xf] %vm2561_vm4, %v2901_v5 }
 0x17f   : > { %2644 = vst.msk [vmem:[%s3765_s11 + $0x3c] sm:$0xf] %vm2561_vm4, %v2899_v0 }
 0x180 PF: > { %s13_s12 = sadd.s32 1, %s3253_s12  }
 0x181   : > { %p10_p4 = scmp.ge.s32.totalorder %s13_s12, 4  }
 0x183   :  { %12 = sbr.rel (!%p10_p4) target bundleno = 1 (0x1), region = 70 }

// kernel: two_block_model.5
= control target key start
LH: loop header
LB: loop body
LE: loop exit
PB: predicated region body
PF: predicated region fallthrough
CT: control target
= control target key end

     0   :  { %s3390_s15 = smov 0   ;;  %s3959_s0 = inlined_call_operand.vmem [shape: bf16[2,176,8], index: 0, kind: input, shape index: {}]   ;;  %s3960_s1 = inlined_call_operand.vmem [shape: bf16[9,8,8], index: 1, kind: input, shape index: {}]   ;;  %s3961_s2 = inlined_call_operand.vmem [shape: f32[1,8], index: 2, kind: input, shape index: {}]   ;;  %s3962_s3 = inlined_call_operand.vmem [shape: bf16[2,176,8], index: 3, kind: input, shape index: {}]   ;;  %s3963_s4 = inlined_call_operand.vmem [shape: bf16[2,176,8], index: 4, kind: output, shape index: {}]  }
   0x1 LB: > { %s2810_s16 = sadd.s32 4294967295, %s3361_s15   ;;  %p2814_p0 = scmp.ge.s32.totalorder %s3361_s15, 1  ;;  %s3361_s15 = sphi %s3390_s15, %s14_s15  }
   0x2   : > { %p172_p1 = scmp.lt.s32.totalorder %s3361_s15, 3 }
   0x4   : > { %p173_p2 = pnand %p2814_p0, %p172_p1 }
   0x5   : > { %v2818_v0 = vld [vmem:[%s3960_s1 + $0x4] sm:$0xf] (!%p173_p2)  ;;  %vm304_vm0 = vcmask (!%p173_p2), 1043456   ;;  %p203_p3 = scmp.lt.s32.totalorder (!%p173_p2), %s2810_s16, 1  ;;  %v236_v2 = vld [vmem:[%s3960_s1] sm:$0xf] (!%p173_p2) }
   0x6   : > { %176 = sbr.rel (%p173_p2) target bundleno = 386 (0x182), region = 36  ;;  %3257 = vmatprep.subr.msk.bf16.mxu1 (!%p173_p2), %vm304_vm0, %v2818_v0  ;;  %3256 = vmatprep.subr.msk.bf16.mxu0 (!%p173_p2), %vm304_vm0, %v2818_v0  ;;  %v306_v1 = vsel (!%p173_p2), %vm304_vm0, %v2818_v0, 0  ;;  %v2852_v3 = vld [vmem:[%s3960_s1 + $0x8] sm:$0xf] (!%p173_p2)  ;;  %vm279_vm1 = vcmask (!%p173_p2), 64512   ;;  %v522_v29 = vsel (!%p173_p2), %vm304_vm0, %v236_v2, 0 }
   0x7   : > { %3255 = vmatpush3.bf16.msra.mxu1 (!%p173_p2), %v306_v1  ;;  %3093 = vmatpush3.bf16.msra.mxu0 (!%p173_p2), %v306_v1  ;;  %v777_v16 = vsel (!%p173_p2), %vm304_vm0, %v2852_v3, 0  ;;  %v2888_v17 = vld [vmem:[%s3960_s1 + $0x10] sm:$0xf] (!%p173_p2)  ;;  %vm416_vm2 = vsmask.f32 (!%p173_p2), 4352  ;;  %vm2656_vm4 = vcmask (!%p173_p2), 60416  }
   0x8   : > { %3258 = vmatprep.subr.msk.bf16.mxu1 (!%p173_p2), %vm304_vm0, %v236_v2  ;;  %3259 = vmatprep.subr.msk.bf16.mxu0 (!%p173_p2), %vm304_vm0, %v2852_v3  ;;  %v3443_v35 = vld [vmem:[%s3960_s1 + $0xc] sm:$0xf] (!%p173_p2)  ;;  %vm683_vm3 = vsmask.f32 (!%p173_p2), 7424  ;;  %v1209_v50 = vsel (!%p173_p2), %vm304_vm0, %v2888_v17, 0 }
   0xd   : > { %s3965_s16 = smov (!%p203_p3, %s2810_s16), 1 }
   0xe   : > { %s3412_s23 = smul.u32 88, %s3965_s16 }
  0x10   : > { %s3418_s26 = scalar_lea.vmem %s3959_s0, %s3412_s23  ;;  %s3875_s16 = scalar_lea.vmem %s3963_s4, %s3412_s23 }
  0x11   : > { %v219_v4 = vld [vmem:[%s3418_s26] sm:$0x8]  ;;  %v220_v5 = vld [vmem:[%s3418_s26 + $0x4] sm:$0xf]  ;;  %v221_v6 = vld [vmem:[%s3418_s26 + $0x8] sm:$0xf]  ;;  %s3917_s19 = scalar_lea.vmem %s3962_s3, %s3412_s23 }
  0x12   : > { %v222_v7 = vld [vmem:[%s3418_s26 + $0xc] sm:$0xf]  ;;  %v223_v8 = vld [vmem:[%s3418_s26 + $0x10] sm:$0xf]  ;;  %v224_v9 = vld [vmem:[%s3418_s26 + $0x14] sm:$0xf]  ;;  %v2819_v10 = vcombine.low %v220_v5, %v221_v6  ;;  %v2835_v11 = vcombine.low %v219_v4, %v220_v5 }
  0x13   : > { %v2820_v12 = vcombine.low %v222_v7, %v223_v8  ;;  %v2836_v13 = vcombine.low %v221_v6, %v222_v7  ;;  %v2837_v14 = vcombine.low %v223_v8, %v224_v9  ;;  %v225_v15 = vld [vmem:[%s3418_s26 + $0x18] sm:$0xf]  ;;  %v228_v20 = vld [vmem:[%s3418_s26 + $0x24] sm:$0xf]  ;;  %v229_v21 = vld [vmem:[%s3418_s26 + $0x28] sm:$0xf] }
  0x14   : > { %3094 = vmatprep.mubr.msk.bf16.mxu0 %vm279_vm1, %v2819_v10  ;;  %v418_v18 = vshrl.u32 %v2835_v11, 16  ;;  %v421_v19 = vshll.u32 %v2835_v11, 16  ;;  %v226_v24 = vld [vmem:[%s3418_s26 + $0x1c] sm:$0xf]  ;;  %v230_v25 = vld [vmem:[%s3418_s26 + $0x2c] sm:$0xf]  ;;  %v2823_v27 = vcombine.low %v228_v20, %v229_v21  ;;  %v2821_v48 = vcombine.low %v224_v9, %v225_v15 }
  0x15   : > { %v426_v22 = vshrl.u32 %v2836_v13, 16  ;;  %v429_v23 = vshll.u32 %v2836_v13, 16  ;;  %3095 = vmatmul.mubr.msk.bf16.vlgmr.msra.gmra.mrb[0].mxu0 %vm279_vm1, %v2820_v12  ;;  %v231_v26 = vld [vmem:[%s3418_s26 + $0x30] sm:$0xf]  ;;  %v2838_v28 = vcombine.low %v225_v15, %v226_v24  ;;  %v435_v32 = vshrl.u32 %v2837_v14, 16  ;;  %v3294_v45 = vld [vmem:[%s3418_s26 + $0x4] sm:$0xff]  }
  0x16   : > { %3129 = vmatpush3.bf16.msra.mxu0 %v777_v16  ;;  %v420_v30 = vrot.slane %v418_v18, 3  ;;  %v423_v31 = vrot.slane %v421_v19, 4  ;;  %v438_v33 = vshll.u32 %v2837_v14, 16  ;;  %v227_v34 = vld [vmem:[%s3418_s26 + $0x20] sm:$0xf]  ;;  %v2824_v39 = vcombine.low %v230_v25, %v231_v26  ;;  %3102 = vmatprep.mubr.msk.bf16.mxu1 %vm279_vm1, %v2823_v27  ;;  %v3295_v46 = vld [vmem:[%s3418_s26 + $0xc] sm:$0xff]  }
  0x17   : > { %3261 = vmatprep.subr.msk.bf16.mxu0 %vm304_vm0, %v2888_v17  ;;  %v428_v36 = vrot.slane %v426_v22, 3  ;;  %v431_v37 = vrot.slane %v429_v23, 4  ;;  %v232_v38 = vld [vmem:[%s3418_s26 + $0x34] sm:$0xf]  ;;  %v3449_v40 = vld [vmem:[%s3418_s26 + $0x38] sm:$0xf]  ;;  %v2822_v43 = vcombine.low %v226_v24, %v227_v34  ;;  %v2839_v53 = vcombine.low %v227_v34, %v228_v20  ;;  %3098 = vmatprep.mubr.msk.bf16.mxu0 %vm279_vm1, %v2821_v48 }
  0x18   : > { %v3452_v41 = vld [vmem:[%s3418_s26 + $0x3c] sm:$0xf]  ;;  %v3455_v42 = vld [vmem:[%s3418_s26 + $0x40] sm:$0xf]  ;;  %v444_v44 = vshrl.u32 %v2838_v28, 16  ;;  %3103 = vmatmul.mubr.msk.bf16.vlgmr.msra.gmra.mrb[0].mxu1 %vm279_vm1, %v2824_v39  ;;  %v447_v47 = vshll.u32 %v2838_v28, 16  ;;  %v2825_v49 = vcombine.low %v232_v38, %v3449_v40  ;;  %v424_v55 = vor.u32 %v423_v31, %v420_v30 }
  0x19   : > { %3111 = vmatpush3.bf16.msra.mxu1 %v522_v29  ;;  %v437_v51 = vrot.slane %v435_v32, 3  ;;  %v440_v52 = vrot.slane %v438_v33, 4  ;;  %v2826_v54 = vcombine.low %v3452_v41, %v3455_v42  ;;  %v432_v56 = vor.u32 %v431_v37, %v428_v36  ;;  %v3296_v58 = vld [vmem:[%s3418_s26 + $0x14] sm:$0xff]   ;;  %v3297_v63 = vld [vmem:[%s3418_s26 + $0x1c] sm:$0xff]   ;;  %v3298_v0 = vld [vmem:[%s3418_s26 + $0x24] sm:$0xff]  }
  0x1a   : > { %3260 = vmatprep.subr.msk.bf16.mxu1 %vm304_vm0, %v3443_v35  ;;  %3106 = vmatprep.mubr.msk.bf16.mxu1 %vm279_vm1, %v2825_v49  ;;  %v685_v57 = vshrl.u32 %v3294_v45, 16  ;;  %v687_v59 = vshll.u32 %v3294_v45, 16  ;;  %v692_v60 = vshll.u32 %v3295_v46, 16  ;;  %v696_v61 = vshrl.u32 %v3295_v46, 16  ;;  %v3474_v13 = vld [vmem:[%s3418_s26 + $0x2c] sm:$0xff]   ;;  %v3300_v30 = vld [vmem:[%s3418_s26 + $0x34] sm:$0xff]  }
  0x1b   : > { %v446_v62 = vrot.slane %v444_v44, 3  ;;  %v2840_v1 = vcombine.low %v229_v21, %v230_v25  ;;  %v433_v2 = vsel %vm416_vm2, %v424_v55, %v432_v56  ;;  %v700_v3 = vshll.u32 %v3296_v58, 16  ;;  %v3489_v31 = vld [vmem:[%s3960_s1 + $0x18] sm:$0xf]  ;;  %v3505_v48 = vld [vmem:[%s3960_s1 + $0x14] sm:$0xf] }
  0x1c   : > { %v449_v4 = vrot.slane %v447_v47, 4  ;;  %v689_v5 = vrot.slane %v687_v59, 1  ;;  %v694_v6 = vrot.slane %v692_v60, 1  ;;  %v704_v7 = vshrl.u32 %v3296_v58, 16  ;;  %v892_v59 = vld [vmem:[%s3418_s26 + $0x8] sm:$0x8] }
  0x1d   : > { %3099 = vmatmul.mubr.msk.bf16.gmra.mrb[4].mxu0 %vm279_vm1, %v2822_v43  ;;  %v708_v8 = vshll.u32 %v3297_v63, 16  ;;  %v2841_v9 = vcombine.low %v231_v26, %v232_v38  ;;  %v453_v10 = vshrl.u32 %v2839_v53, 16  ;;  %v456_v11 = vshll.u32 %v2839_v53, 16  ;;  %v3497_v43 = vld [vmem:[%s3418_s26 + $0x3c] sm:$0xff]   ;;  %v3515_v60 = vld [vmem:[%s3418_s26 + $0xc] sm:$0xf] }
  0x1e   : > { %v702_v12 = vrot.slane %v700_v3, 1  ;;  %v690_v14 = vor.u32 %v689_v5, %v685_v57  ;;  %v698_v15 = vor.u32 %v696_v61, %v694_v6  ;;  %v716_v17 = vshll.u32 %v3298_v0, 16 }
  0x1f   : > { %v710_v16 = vrot.slane %v708_v8, 1  ;;  %v441_v18 = vor.u32 %v440_v52, %v437_v51  ;;  %v462_v19 = vshrl.u32 %v2840_v1, 16  ;;  %v712_v21 = vshrl.u32 %v3297_v63, 16  ;;  %v3520_v63 = vld [vmem:[%s3418_s26 + $0x10] sm:$0xf] }
  0x20   : > { %3107 = vmatmul.mubr.msk.bf16.gmra.mrb[4].mxu1 %vm279_vm1, %v2826_v54  ;;  %v706_v20 = vor.u32 %v704_v7, %v702_v12  ;;  %v465_v22 = vshll.u32 %v2840_v1, 16  ;;  %v695_v23 = vsel %vm683_vm3, %v690_v14, %v694_v6  ;;  %v703_v24 = vsel %vm683_vm3, %v698_v15, %v702_v12  ;;  %v3302_v8 = vld [vmem:[%s3418_s26 + $0x44] ss:$0 sps:$4 sm:$0x11]   ;;  %v3536_v12 = vld [vmem:[%s3418_s26 + $0x18] sm:$0xf] }
  0x21   : > { %3112 = vmatprep.mubr.msk.bf16.mxu1 %vm279_vm1, %v433_v2  ;;  %v450_v25 = vor.u32 %v449_v4, %v446_v62  ;;  %3130 = vmatprep.mubr.msk.bf16.mxu0 %vm279_vm1, %v695_v23  ;;  %v1059_v26 = vsel %vm304_vm0, %v3443_v35, 0  ;;  %v720_v28 = vshrl.u32 %v3298_v0, 16  ;;  %v724_v29 = vshll.u32 %v3474_v13, 16  ;;  %v3523_v0 = vld [vmem:[%s3418_s26 + $0x14] sm:$0xf] }
  0x22   : > { %v711_v27 = vsel %vm683_vm3, %v706_v20, %v710_v16  ;;  %v455_v32 = vrot.slane %v453_v10, 3  ;;  %v458_v33 = vrot.slane %v456_v11, 4  ;;  %v2842_v34 = vcombine.low %v3449_v40, %v3452_v41  ;;  %v3550_v23 = vld [vmem:[%s3418_s26 + $0x24] sm:$0xf] }
  0x23   : > { %v718_v35 = vrot.slane %v716_v17, 1  ;;  %v464_v36 = vrot.slane %v462_v19, 3  ;;  %v471_v37 = vshrl.u32 %v2841_v9, 16  ;;  %v442_v38 = vsel %vm416_vm2, %v432_v56, %v441_v18 }
  0x24   : > { %v714_v39 = vor.u32 %v712_v21, %v710_v16  ;;  %v467_v44 = vrot.slane %v465_v22, 4  ;;  %v451_v45 = vsel %vm416_vm2, %v441_v18, %v450_v25  ;;  %v726_v47 = vrot.slane %v724_v29, 1  ;;  %v3547_v22 = vld [vmem:[%s3418_s26 + $0x20] sm:$0xf]  ;;  %v3558_v29 = vld [vmem:[%s3418_s26 + $0x2c] sm:$0xf] }
  0x25   : > { %3131 = vmatmul.mubr.msk.bf16.vlgmr.msra.gmra.mrb[8].mxu0 %vm279_vm1, %v703_v24  ;;  %v722_v46 = vor.u32 %v720_v28, %v718_v35  ;;  %v474_v40 = vshll.u32 %v2841_v9, 16  ;;  %v732_v41 = vshll.u32 %v3300_v30, 16  ;;  %v459_v49 = vor.u32 %v458_v33, %v455_v32  ;;  %v3555_v28 = vld [vmem:[%s3418_s26 + $0x28] sm:$0xf] }
  0x26   : > { %3165 = vmatpush3.bf16.msra.mxu0 %v1209_v50  ;;  %3134 = vmatprep.mubr.msk.bf16.mxu0 %vm279_vm1, %v711_v27  ;;  %v728_v50 = vshrl.u32 %v3474_v13, 16  ;;  %v480_v51 = vshrl.u32 %v2842_v34, 16  ;;  %v719_v52 = vsel %vm683_vm3, %v714_v39, %v718_v35  ;;  %v483_v53 = vshll.u32 %v2842_v34, 16  ;;  %v3539_v13 = vld [vmem:[%s3418_s26 + $0x1c] sm:$0xf] }
  0x27   : > { %3263 = vmatprep.subr.msk.bf16.mxu0 %vm304_vm0, %v3489_v31  ;;  %v736_v54 = vshrl.u32 %v3300_v30, 16  ;;  %v740_v55 = vshll.u32 %v3497_v43, 16  ;;  %v468_v56 = vor.u32 %v467_v44, %v464_v36  ;;  %v727_v57 = vsel %vm683_vm3, %v722_v46, %v726_v47  ;;  %v3561_v30 = vld [vmem:[%s3418_s26 + $0x30] sm:$0xf] }
  0x28   : > { %3113 = vmatmul.mubr.msk.bf16.vlgmr.msra.gmra.mrb[8].mxu1 %vm279_vm1, %v442_v38  ;;  %v473_v58 = vrot.slane %v471_v37, 3  ;;  %v476_v61 = vrot.slane %v474_v40, 4  ;;  %v734_v62 = vrot.slane %v732_v41, 1  ;;  %v2843_v1 = vcombine.low %v3455_v42, %v3455_v42 }
  0x29   : > { %3147 = vmatpush3.bf16.msra.mxu1 %v1059_v26  ;;  %3116 = vmatprep.mubr.msk.bf16.mxu1 %vm279_vm1, %v451_v45  ;;  %v460_v2 = vsel %vm416_vm2, %v450_v25, %v459_v49  ;;  %v730_v3 = vor.u32 %v728_v50, %v726_v47  ;;  %v482_v4 = vrot.slane %v480_v51, 3  ;;  %v485_v5 = vrot.slane %v483_v53, 4  ;;  %v3581_v53 = vld [vmem:[%s3418_s26 + $0x3c] sm:$0xf] }
  0x2a   : > { %3262 = vmatprep.subr.msk.bf16.mxu1 %vm304_vm0, %v3505_v48  ;;  %v738_v6 = vor.u32 %v736_v54, %v734_v62  ;;  %v742_v7 = vrot.slane %v740_v55, 1  ;;  %v2871_v9 = vcombine.low %v892_v59, %v3515_v60  ;;  %v469_v10 = vsel %vm416_vm2, %v459_v49, %v468_v56 }
  0x2b   : > { %v2872_v42 = vcombine.low %v3520_v63, %v3523_v0  ;;  %v477_v11 = vor.u32 %v476_v61, %v473_v58  ;;  %v735_v14 = vsel %vm683_vm3, %v730_v3, %v734_v62  ;;  %v489_v15 = vshrl.u32 %v2843_v1, 16  ;;  %v3591_v58 = vld [vmem:[%s3418_s26 + $0x44] sm:$0xf] }
  0x2c   : > { %v492_v16 = vshll.u32 %v2843_v1, 16  ;;  %v744_v17 = vshrl.u32 %v3497_v43, 16  ;;  %v486_v18 = vor.u32 %v485_v5, %v482_v4  ;;  %v743_v19 = vsel %vm683_vm3, %v738_v6, %v742_v7  ;;  %v3570_v43 = vld [vmem:[%s3418_s26 + $0x34] sm:$0xf]  ;;  %v3594_v1 = vld [vmem:[%s3418_s26 + $0x18] sm:$0xf] }
  0x2d   : > { %3135 = vmatmul.mubr.msk.bf16.gmra.mrb[12].mxu0 %vm279_vm1, %v719_v52  ;;  %v748_v20 = vshll.u32 %v3302_v8, 16  ;;  %v955_v21 = vshrl.u32 %v2871_v9, 16  ;;  %v2873_v24 = vcombine.low %v3536_v12, %v3539_v13  ;;  %v958_v25 = vshll.u32 %v2871_v9, 16  ;;  %v3578_v52 = vld [vmem:[%s3418_s26 + $0x38] sm:$0xf] }
  0x2e   : > { %3138 = vmatprep.mubr.msk.bf16.mxu0 %vm279_vm1, %v727_v57  ;;  %v963_v26 = vshrl.u32 %v2872_v42, 16  ;;  %v966_v27 = vshll.u32 %v2872_v42, 16  ;;  %v478_v32 = vsel %vm416_vm2, %v468_v56, %v477_v11  ;;  %v491_v33 = vrot.slane %v489_v15, 3  ;;  %v3588_v57 = vld [vmem:[%s3418_s26 + $0x40] sm:$0xf] }
  0x2f   : > { %v494_v34 = vrot.slane %v492_v16, 4  ;;  %v2874_v35 = vcombine.low %v3547_v22, %v3550_v23  ;;  %v487_v36 = vsel %vm416_vm2, %v477_v11, %v486_v18  ;;  %v746_v37 = vor.u32 %v744_v17, %v742_v7  ;;  %v3600_v5 = vld [vmem:[%s3418_s26 + $0x20] sm:$0xf]  ;;  %v3604_v8 = vld [vmem:[%s3418_s26 + $0x24] sm:$0xf] }
  0x30   : > { %3117 = vmatmul.mubr.msk.bf16.gmra.mrb[12].mxu1 %vm279_vm1, %v460_v2  ;;  %v750_v38 = vrot.slane %v748_v20, 1  ;;  %v957_v39 = vrot.slane %v955_v21, 3  ;;  %v960_v44 = vrot.slane %v958_v25, 4  ;;  %v965_v45 = vrot.slane %v963_v26, 3  ;;  %v3597_v2 = vld [vmem:[%s3418_s26 + $0x1c] sm:$0xf] }
  0x31   : > { %3120 = vmatprep.mubr.msk.bf16.mxu1 %vm279_vm1, %v469_v10  ;;  %v968_v46 = vrot.slane %v966_v27, 4  ;;  %v972_v47 = vshrl.u32 %v2873_v24, 16  ;;  %v975_v40 = vshll.u32 %v2873_v24, 16  ;;  %v2875_v41 = vcombine.low %v3555_v28, %v3558_v29  ;;  %v3634_v26 = vld [vmem:[%s3960_s1 + $0x20] sm:$0xf] }
  0x32   : > { %v981_v49 = vshrl.u32 %v2874_v35, 16  ;;  %v984_v50 = vshll.u32 %v2874_v35, 16  ;;  %v2876_v51 = vcombine.low %v3561_v30, %v3570_v43  ;;  %v495_v54 = vor.u32 %v494_v34, %v491_v33  ;;  %v3637_v27 = vld [vmem:[%s3418_s26 + $0x28] sm:$0xf] }
  0x33   : > { %v751_v55 = vsel %vm683_vm3, %v746_v37, %v750_v38  ;;  %v2889_v56 = vcombine.low %v3515_v60, %v3520_v63  ;;  %v961_v59 = vor.u32 %v960_v44, %v957_v39  ;;  %v969_v61 = vor.u32 %v968_v46, %v965_v45  ;;  %v3643_v35 = vld [vmem:[%s3418_s26 + $0x48] sm:$0xf]  ;;  %v1594_v37 = vld [vmem:[%s3418_s26 + $0x10] sm:$0x8]  ;;  %v3647_v38 = vld [vmem:[%s3418_s26 + $0x14] sm:$0xf] }
  0x34   : > { %v974_v62 = vrot.slane %v972_v47, 3  ;;  %v977_v3 = vrot.slane %v975_v40, 4  ;;  %v990_v4 = vshrl.u32 %v2875_v41, 16  ;;  %v983_v6 = vrot.slane %v981_v49, 3  ;;  %v3654_v49 = vld [vmem:[%s3418_s26 + $0x30] sm:$0xf] }
  0x35   : > { %3139 = vmatmul.mubr.msk.bf16.gmra.mrb[16].mxu0 %vm279_vm1, %v735_v14  ;;  %v986_v60 = vrot.slane %v984_v50, 4  ;;  %v993_v63 = vshll.u32 %v2875_v41, 16  ;;  %v999_v7 = vshrl.u32 %v2876_v51, 16  ;;  %v496_v9 = vsel %vm416_vm2, %v486_v18, %v495_v54 }
  0x36   : > { %3142 = vmatprep.mubr.msk.bf16.mxu0 %vm279_vm1, %v743_v19  ;;  %v3610_v10 = vsel %vm304_vm0, %v3505_v48, 0  ;;  %v1761_v42 = vsel %vm304_vm0, %v3489_v31, 0  ;;  %v2877_v11 = vcombine.low %v3578_v52, %v3581_v53  ;;  %v970_v14 = vsel %vm416_vm2, %v961_v59, %v969_v61 }
  0x37   : > { %v2890_v15 = vcombine.low %v3523_v0, %v3536_v12  ;;  %v1002_v16 = vshll.u32 %v2876_v51, 16  ;;  %v2878_v17 = vcombine.low %v3588_v57, %v3591_v58  ;;  %v978_v18 = vor.u32 %v977_v3, %v974_v62  ;;  %v3674_v3 = vld [vmem:[%s3418_s26 + $0x34] sm:$0xf] }
  0x38   : > { %3121 = vmatmul.mubr.msk.bf16.gmra.mrb[16].mxu1 %vm279_vm1, %v478_v32  ;;  %v2891_v48 = vcombine.low %v3539_v13, %v3547_v22  ;;  %v2925_v31 = vcombine.low %v3594_v1, %v3597_v2  ;;  %v2926_v19 = vcombine.low %v3600_v5, %v3604_v8  ;;  %v3628_v0 = vor.u32 %v986_v60, %v983_v6  ;;  %v3640_v32 = vld [vmem:[%s3418_s26 + $0x2c] sm:$0xf] }
  0x39   : > { %3124 = vmatprep.mubr.msk.bf16.mxu1 %vm279_vm1, %v487_v36  ;;  %v992_v12 = vrot.slane %v990_v4, 3  ;;  %v995_v20 = vrot.slane %v993_v63, 4  ;;  %v1001_v21 = vrot.slane %v999_v7, 3  ;;  %v1008_v24 = vshrl.u32 %v2877_v11, 16  ;;  %v3684_v7 = vld [vmem:[%s3418_s26 + $0x38] sm:$0xf] }
  0x3a   : > { %v1011_v13 = vshll.u32 %v2877_v11, 16  ;;  %v1665_v22 = vshrl.u32 %v2925_v31, 16  ;;  %v1668_v25 = vshll.u32 %v2925_v31, 16  ;;  %v1004_v33 = vrot.slane %v1002_v16, 4 }
  0x3b   : > { %v1017_v34 = vshrl.u32 %v2878_v17, 16  ;;  %v1020_v36 = vshll.u32 %v2878_v17, 16  ;;  %v1674_v45 = vshrl.u32 %v2926_v19, 16  ;;  %v979_v46 = vsel %vm416_vm2, %v969_v61, %v978_v18 }
  0x3c   : > { %v1667_v39 = vrot.slane %v1665_v22, 3  ;;  %v1670_v44 = vrot.slane %v1668_v25, 4  ;;  %v996_v47 = vor.u32 %v995_v20, %v992_v12  ;;  %v2892_v40 = vcombine.low %v3550_v23, %v3555_v28 }
  0x3d   : > { %3143 = vmatmul.mubr.msk.bf16.gmra.mrb[20].mxu0 %vm279_vm1, %v751_v55  ;;  %v1677_v41 = vshll.u32 %v2926_v19, 16  ;;  %v988_v50 = vsel %vm416_vm2, %v978_v18, %v3628_v0  ;;  %v1010_v51 = vrot.slane %v1008_v24, 3  ;;  %v1013_v54 = vrot.slane %v1011_v13, 4  ;;  %v3660_v55 = vld [vmem:[%s3418_s26 + $0xc] sm:$0xff]  }
  0x3e   : > { %3166 = vmatprep.mubr.msk.bf16.mxu0 %vm279_vm1, %v2889_v56  ;;  %v3665_v56 = vld [vmem:[%s3960_s1 + $0x1c] sm:$0xf]  ;;  %v1676_v23 = vrot.slane %v1674_v45, 3  ;;  %v1019_v28 = vrot.slane %v1017_v34, 3  ;;  %v3667_v59 = vor.u32 %v1670_v44, %v1667_v39  ;;  %v2927_v62 = vcombine.low %v3637_v27, %v3640_v32  ;;  %v3726_v34 = vld [vmem:[%s3418_s26 + $0x14] sm:$0xff]  }
  0x3f   : > { %v1679_v61 = vrot.slane %v1677_v41, 4  ;;  %v3676_v4 = vor.u32 %v1004_v33, %v1001_v21  ;;  %v1022_v6 = vrot.slane %v1020_v36, 4  ;;  %v3680_v60 = vcombine.low %v3643_v35, %v3643_v35  ;;  %v3736_v41 = vld [vmem:[%s3418_s26 + $0x4c] sm:$0xf] }
  0x40   : > { %3125 = vmatmul.mubr.msk.bf16.gmra.mrb[20].mxu1 %vm279_vm1, %v496_v9  ;;  %v1387_v63 = vshrl.u32 %v3660_v55, 16  ;;  %v2924_v9 = vcombine.low %v1594_v37, %v3647_v38  ;;  %v1683_v11 = vshrl.u32 %v2927_v62, 16  ;;  %v2893_v16 = vcombine.low %v3558_v29, %v3561_v30  ;;  %v3711_v30 = vld [vmem:[%s3418_s26 + $0x44] sm:$0xf] }
  0x41   : > { %3148 = vmatprep.mubr.msk.bf16.mxu1 %vm279_vm1, %v970_v14  ;;  %v1686_v14 = vshll.u32 %v2927_v62, 16  ;;  %v2894_v17 = vcombine.low %v3570_v43, %v3578_v52  ;;  %v2928_v18 = vcombine.low %v3654_v49, %v3674_v3  ;;  %v2895_v31 = vcombine.low %v3581_v53, %v3588_v57 }
  0x42   : > { %v1685_v19 = vrot.slane %v1683_v11, 3  ;;  %v997_v43 = vsel %vm416_vm2, %v3628_v0, %v996_v47  ;;  %v1006_v52 = vsel %vm416_vm2, %v996_v47, %v3676_v4  ;;  %v1026_v57 = vshrl.u32 %v3680_v60, 16 }
  0x43   : > { %v1688_v29 = vrot.slane %v1686_v14, 4  ;;  %v1692_v12 = vshrl.u32 %v2928_v18, 16  ;;  %v1695_v53 = vshll.u32 %v2928_v18, 16  ;;  %v1657_v20 = vshrl.u32 %v2924_v9, 16 }
  0x44   : > { %v1660_v13 = vshll.u32 %v2924_v9, 16  ;;  %v1029_v33 = vshll.u32 %v3680_v60, 16  ;;  %v1014_v44 = vor.u32 %v1013_v54, %v1010_v51  ;;  %v1389_v45 = vshll.u32 %v3660_v55, 16  ;;  %v3740_v60 = vld [vmem:[%s3418_s26 + $0x50] sm:$0xf] }
  0x45   : > { %3167 = vmatmul.mubr.msk.bf16.vlgmr.msra.gmra.mrb[24].mxu0 %vm279_vm1, %v2890_v15  ;;  %v3689_v15 = vld [vmem:[%s3418_s26 + $0x3c] sm:$0xf]  ;;  %v1689_v21 = vor.u32 %v1688_v29, %v1685_v19  ;;  %v1694_v0 = vrot.slane %v1692_v12, 3  ;;  %v1697_v22 = vrot.slane %v1695_v53, 4  ;;  %v1659_v9 = vrot.slane %v1657_v20, 3 }
  0x46   : > { %3201 = vmatpush3.bf16.msra.mxu0 %v1761_v42  ;;  %3170 = vmatprep.mubr.msk.bf16.mxu0 %vm279_vm1, %v2891_v48  ;;  %v1680_v42 = vor.u32 %v1679_v61, %v1676_v23  ;;  %v3700_v48 = vld [vmem:[%s3418_s26 + $0x40] sm:$0xf]  ;;  %v2929_v24 = vcombine.low %v3684_v7, %v3689_v15  ;;  %v1662_v51 = vrot.slane %v1660_v13, 4  ;;  %v1394_v11 = vshll.u32 %v3726_v34, 16 }
  0x47   : > { %3265 = vmatprep.subr.msk.bf16.mxu0 %vm304_vm0, %v3634_v26  ;;  %v2930_v25 = vcombine.low %v3700_v48, %v3711_v30  ;;  %v1028_v18 = vrot.slane %v1026_v57, 3  ;;  %v1031_v19 = vrot.slane %v1029_v33, 4  ;;  %v2932_v29 = vcombine.low %v3740_v60, %v3740_v60  ;;  %v3326_v33 = vld [vmem:[%s3418_s26 + $0x1c] sm:$0xff]  }
  0x48   : > { %3149 = vmatmul.mubr.msk.bf16.vlgmr.msra.gmra.mrb[24].mxu1 %vm279_vm1, %v979_v46  ;;  %v3729_v36 = vsel %vm416_vm2, %v1680_v42, %v1689_v21  ;;  %v1701_v37 = vshrl.u32 %v2929_v24, 16  ;;  %v1704_v39 = vshll.u32 %v2929_v24, 16  ;;  %v1698_v46 = vor.u32 %v1697_v22, %v1694_v0 }
  0x49   : > { %3183 = vmatpush3.bf16.msra.mxu1 %v3610_v10  ;;  %3152 = vmatprep.mubr.msk.bf16.mxu1 %vm279_vm1, %v988_v50  ;;  %v3708_v10 = vsel %vm416_vm2, %v3667_v59, %v1680_v42  ;;  %v1710_v47 = vshrl.u32 %v2930_v25, 16  ;;  %v1023_v50 = vor.u32 %v1022_v6, %v1019_v28  ;;  %v1713_v62 = vshll.u32 %v2930_v25, 16 }
  0x4a   : > { %3264 = vmatprep.subr.msk.bf16.mxu1 %vm304_vm0, %v3665_v56  ;;  %v1703_v23 = vrot.slane %v1701_v37, 3  ;;  %v1706_v61 = vrot.slane %v1704_v39, 4  ;;  %v3744_v54 = vsel %vm416_vm2, %v1689_v21, %v1698_v46  ;;  %v1015_v6 = vsel %vm416_vm2, %v3676_v4, %v1014_v44 }
  0x4b   : > { %v1712_v42 = vrot.slane %v1710_v47, 3  ;;  %v1024_v20 = vsel %vm416_vm2, %v1014_v44, %v1023_v50  ;;  %v1391_v21 = vrot.slane %v1389_v45, 1  ;;  %v1663_v4 = vor.u32 %v1662_v51, %v1659_v9  ;;  %v3327_v47 = vld [vmem:[%s3418_s26 + $0x24] sm:$0xff]  }
  0x4c   : > { %v1707_v14 = vor.u32 %v1706_v61, %v1703_v23  ;;  %v1728_v57 = vshrl.u32 %v2932_v29, 16  ;;  %v1731_v0 = vshll.u32 %v2932_v29, 16  ;;  %v2896_v25 = vcombine.low %v3591_v58, %v3643_v35 }
  0x4d   : > { %3171 = vmatmul.mubr.msk.bf16.gmra.mrb[28].mxu0 %vm279_vm1, %v2892_v40  ;;  %v3733_v40 = vld [vmem:[%s3418_s26 + $0x48] sm:$0xf]  ;;  %v1396_v44 = vrot.slane %v1394_v11, 1  ;;  %v1392_v45 = vor.u32 %v1391_v21, %v1387_v63  ;;  %v1402_v58 = vshll.u32 %v3326_v33, 16  ;;  %v1398_v55 = vshrl.u32 %v3726_v34, 16  ;;  %v3331_v34 = vld [vmem:[%s3418_s26 + $0x34] sm:$0xff]  }
  0x4e   : > { %3174 = vmatprep.mubr.msk.bf16.mxu0 %vm279_vm1, %v2893_v16  ;;  %v1715_v16 = vrot.slane %v1713_v62, 4  ;;  %v2931_v28 = vcombine.low %v3733_v40, %v3736_v41  ;;  %v1730_v22 = vrot.slane %v1728_v57, 3  ;;  %v1733_v39 = vrot.slane %v1731_v0, 4 }
  0x4f   : > { %v1406_v63 = vshrl.u32 %v3326_v33, 16  ;;  %v1410_v9 = vshll.u32 %v3327_v47, 16  ;;  %v1404_v51 = vrot.slane %v1402_v58, 1  ;;  %v1400_v11 = vor.u32 %v1398_v55, %v1396_v44 }
  0x50   : > { %3153 = vmatmul.mubr.msk.bf16.gmra.mrb[28].mxu1 %vm279_vm1, %v997_v43  ;;  %v3755_v43 = vsel %vm416_vm2, %v1698_v46, %v1707_v14  ;;  %v1719_v12 = vshrl.u32 %v2931_v28, 16  ;;  %v1722_v53 = vshll.u32 %v2931_v28, 16  ;;  %v1672_v46 = vsel %vm416_vm2, %v1663_v4, %v3667_v59  ;;  %v3340_v4 = vld [vmem:[%s3418_s26 + $0x14] sm:$0xff]  }
  0x51   : > { %3156 = vmatprep.mubr.msk.bf16.mxu1 %vm279_vm1, %v1006_v52  ;;  %v1716_v52 = vor.u32 %v1715_v16, %v1712_v42  ;;  %v1734_v61 = vor.u32 %v1733_v39, %v1730_v22  ;;  %v1397_v59 = vsel %vm683_vm3, %v1392_v45, %v1396_v44  ;;  %v3329_v42 = vld [vmem:[%s3418_s26 + $0x2c] sm:$0xff]   ;;  %v1412_v16 = vrot.slane %v1410_v9, 1 }
  0x52   : > { %v1721_v13 = vrot.slane %v1719_v12, 3  ;;  %v1418_v28 = vshll.u32 %v3329_v42, 16  ;;  %v1422_v29 = vshrl.u32 %v3329_v42, 16  ;;  %v3333_v12 = vld [vmem:[%s3418_s26 + $0x3c] sm:$0xff]   ;;  %v2091_v33 = vshll.u32 %v3340_v4, 16  ;;  %v3344_v9 = vld [vmem:[%s3418_s26 + $0x2c] sm:$0xff]  }
  0x53   : > { %v3760_v24 = vsel %vm416_vm2, %v1707_v14, %v1716_v52  ;;  %v2181_v14 = vsel %vm304_vm0, %v3634_v26, 0  ;;  %v1434_v57 = vshll.u32 %v3333_v12, 16  ;;  %v2089_v45 = vshrl.u32 %v3340_v4, 16 }
  0x55   : > { %3175 = vmatmul.mubr.msk.bf16.gmra.mrb[32].mxu0 %vm279_vm1, %v2894_v17  ;;  %v1724_v17 = vrot.slane %v1722_v53, 4 }
  0x56   : > { %3178 = vmatprep.mubr.msk.bf16.mxu0 %vm279_vm1, %v2895_v31  ;;  %v1032_v31 = vor.u32 %v1031_v19, %v1028_v18  ;;  %v1414_v18 = vshrl.u32 %v3327_v47, 16  ;;  %v1911_v19 = vsel %vm304_vm0, %v3665_v56, 0  ;;  %v3342_v47 = vld [vmem:[%s3418_s26 + $0x24] sm:$0xff]  }
  0x57   : > { %v1725_v37 = vor.u32 %v1724_v17, %v1721_v13  ;;  %v1430_v13 = vshrl.u32 %v3331_v34, 16  ;;  %v1438_v17 = vshrl.u32 %v3333_v12, 16  ;;  %v2116_v12 = vshrl.u32 %v3344_v9, 16 }
  0x58   : > { %3157 = vmatmul.mubr.msk.bf16.gmra.mrb[32].mxu1 %vm279_vm1, %v1015_v6  ;;  %v1033_v62 = vsel %vm416_vm2, %v1023_v50, %v1032_v31  ;;  %v1408_v50 = vor.u32 %v1406_v63, %v1404_v51  ;;  %v1405_v6 = vsel %vm683_vm3, %v1400_v11, %v1404_v51  ;;  %v1416_v53 = vor.u32 %v1414_v18, %v1412_v16  ;;  %v3337_v31 = vld [vmem:[%s3418_s26 + $0x4c] ss:$0 sps:$4 sm:$0x11]  }
  0x59   : > { %3160 = vmatprep.mubr.msk.bf16.mxu1 %vm279_vm1, %v1024_v20  ;;  %v3773_v23 = vsel %vm416_vm2, %v1716_v52, %v1725_v37  ;;  %v3777_v35 = vsel %vm416_vm2, %v1725_v37, %v1734_v61  ;;  %v1426_v52 = vshll.u32 %v3331_v34, 16  ;;  %v1436_v37 = vrot.slane %v1434_v57, 1  ;;  %v3346_v34 = vld [vmem:[%s3418_s26 + $0x34] sm:$0xff]  }
  0x5a   : > { %v1413_v26 = vsel %vm683_vm3, %v1408_v50, %v1412_v16  ;;  %v2104_v51 = vshll.u32 %v3342_v47, 16  ;;  %v2112_v50 = vshll.u32 %v3344_v9, 16 }
  0x5b   : > { %v1428_v21 = vrot.slane %v1426_v52, 1  ;;  %v2120_v52 = vshll.u32 %v3346_v34, 16 }
  0x5c   : > { %v2106_v16 = vrot.slane %v2104_v51, 1 }
  0x5d   : > { %3179 = vmatmul.mubr.msk.bf16.gmra.mrb[36].mxu0 %vm279_vm1, %v2896_v25  ;;  %v3341_v25 = vld [vmem:[%s3418_s26 + $0x1c] sm:$0xff]   ;;  %v1432_v39 = vor.u32 %v1430_v13, %v1428_v21  ;;  %v3352_v13 = vld [vmem:[%s3418_s26 + $0x4c] sm:$0xff]  }
  0x5e   : > { %3202 = vmatprep.mubr.msk.bf16.mxu0 %vm279_vm1, %v1672_v46  ;;  %v2096_v46 = vshll.u32 %v3341_v25, 16  ;;  %v2100_v11 = vshrl.u32 %v3341_v25, 16  ;;  %v2144_v25 = vshll.u32 %v3352_v13, 16 }
  0x5f   : > { %v1437_v61 = vsel %vm683_vm3, %v1432_v39, %v1436_v37  ;;  %v3354_v39 = vld [vmem:[%s3418_s26 + $0x54] ss:$0 sps:$4 sm:$0x11]  }
  0x60   : > { %3161 = vmatmul.mubr.msk.bf16.gmra.mrb[36].mxu1 %vm279_vm1, %v1033_v62  ;;  %v1450_v62 = vshll.u32 %v3337_v31, 16  ;;  %v2098_v63 = vrot.slane %v2096_v46, 1  ;;  %v2146_v31 = vrot.slane %v2144_v25, 1 }
  0x61   : > { %3184 = vmatprep.mubr.msk.bf16.mxu1 %vm279_vm1, %v1397_v59 }
  0x62   : > { %v1452_v42 = vrot.slane %v1450_v62, 1  ;;  %v2102_v18 = vor.u32 %v2100_v11, %v2098_v63 }
  0x65   : > { %3203 = vmatmul.mubr.msk.bf16.vlgmr.msra.gmra.mrb[40].mxu0 %vm279_vm1, %v3708_v10  ;;  %v1420_v10 = vrot.slane %v1418_v28, 1 }
  0x66   : > { %3237 = vmatpush3.bf16.msra.mxu0 %v2181_v14  ;;  %3206 = vmatprep.mubr.msk.bf16.mxu0 %vm279_vm1, %v3729_v36  ;;  %v3335_v36 = vld [vmem:[%s3418_s26 + $0x44] sm:$0xff]  }
  0x67   : > { %v1424_v20 = vor.u32 %v1422_v29, %v1420_v10  ;;  %v1421_v56 = vsel %vm683_vm3, %v1416_v53, %v1420_v10  ;;  %v1442_v22 = vshll.u32 %v3335_v36, 16  ;;  %v1446_v58 = vshrl.u32 %v3335_v36, 16  ;;  %v3348_v29 = vld [vmem:[%s3418_s26 + $0x3c] sm:$0xff]  }
  0x68   : > { %3185 = vmatmul.mubr.msk.bf16.vlgmr.msra.gmra.mrb[40].mxu1 %vm279_vm1, %v1405_v6  ;;  %v2942_v6 = vcombine.low %v3647_v38, %v3594_v1  ;;  %v2124_v53 = vshrl.u32 %v3346_v34, 16  ;;  %v2128_v1 = vshll.u32 %v3348_v29, 16  ;;  %v2943_v38 = vcombine.low %v3597_v2, %v3600_v5 }
  0x69   : > { %3219 = vmatpush3.bf16.msra.mxu1 %v1911_v19  ;;  %3188 = vmatprep.mubr.msk.bf16.mxu1 %vm279_vm1, %v1413_v26  ;;  %v1429_v0 = vsel %vm683_vm3, %v1424_v20, %v1428_v21  ;;  %v1444_v44 = vrot.slane %v1442_v22, 1  ;;  %v2114_v26 = vrot.slane %v2112_v50, 1  ;;  %v2122_v20 = vrot.slane %v2120_v52, 1  ;;  %v3350_v21 = vld [vmem:[%s3418_s26 + $0x44] sm:$0xff]  }
  0x6a   : > { %v2944_v36 = vcombine.low %v3604_v8, %v3637_v27  ;;  %v2132_v5 = vshrl.u32 %v3348_v29, 16  ;;  %v2140_v22 = vshrl.u32 %v3350_v21, 16  ;;  %v2945_v8 = vcombine.low %v3640_v32, %v3654_v49 }
  0x6b   : > { %v2118_v4 = vor.u32 %v2116_v12, %v2114_v26  ;;  %v2126_v57 = vor.u32 %v2124_v53, %v2122_v20  ;;  %v2148_v32 = vshrl.u32 %v3352_v13, 16  ;;  %v2152_v49 = vshll.u32 %v3354_v39, 16 }
  0x6d   : > { %3207 = vmatmul.mubr.msk.bf16.gmra.mrb[44].mxu0 %vm279_vm1, %v3744_v54  ;;  %v1440_v54 = vor.u32 %v1438_v17, %v1436_v37  ;;  %v2136_v17 = vshll.u32 %v3350_v21, 16  ;;  %v2123_v2 = vsel %vm683_vm3, %v2118_v4, %v2122_v20  ;;  %v2154_v46 = vrot.slane %v2152_v49, 1 }
  0x6e   : > { %3210 = vmatprep.mubr.msk.bf16.mxu0 %vm279_vm1, %v3755_v43  ;;  %v2093_v43 = vrot.slane %v2091_v33, 1  ;;  %v2946_v33 = vcombine.low %v3674_v3, %v3684_v7  ;;  %v2947_v3 = vcombine.low %v3689_v15, %v3700_v48  ;;  %v2948_v7 = vcombine.low %v3711_v30, %v3733_v40 }
  0x6f   : > { %v1445_v55 = vsel %vm683_vm3, %v1440_v54, %v1444_v44  ;;  %v2138_v27 = vrot.slane %v2136_v17, 1  ;;  %v3363_v15 = vmov 0   ;;  %v3364_v40 = vmov 0.0|0.0  }
  0x70   : > { %3189 = vmatmul.mubr.msk.bf16.gmra.mrb[44].mxu1 %vm279_vm1, %v1421_v56  ;;  %v2094_v59 = vor.u32 %v2093_v43, %v2089_v45  ;;  %v2130_v56 = vrot.slane %v2128_v1, 1  ;;  %v2150_v43 = vor.u32 %v2148_v32, %v2146_v31  ;;  %2657 = vst.msk [vmem:[%s3875_s16] sm:$0xf] %vm2656_vm4, %v3363_v15  ;;  %2658 = vst.msk [vmem:[%s3875_s16 + $0x4] sm:$0xf] %vm2656_vm4, %v3363_v15 }
  0x71   : > { %3192 = vmatprep.mubr.msk.bf16.mxu1 %vm279_vm1, %v1429_v0  ;;  %v2142_v54 = vor.u32 %v2140_v22, %v2138_v27  ;;  %2659 = vst.msk [vmem:[%s3875_s16 + $0x8] sm:$0xf] %vm2656_vm4, %v3363_v15  ;;  %2660 = vst.msk [vmem:[%s3875_s16 + $0x4c] sm:$0xf] %vm2656_vm4, %v3363_v15 }
  0x72   : > { %v2099_v14 = vsel %vm683_vm3, %v2094_v59, %v2098_v63  ;;  %v2131_v0 = vsel %vm683_vm3, %v2126_v57, %v2130_v56  ;;  %v2134_v37 = vor.u32 %v2132_v5, %v2130_v56  ;;  %2661 = vst.msk [vmem:[%s3875_s16 + $0x50] sm:$0xf] %vm2656_vm4, %v3363_v15  ;;  %2662 = vst.msk [vmem:[%s3875_s16 + $0x54] sm:$0xf] %vm2656_vm4, %v3363_v15 }
  0x73   : > { %v2147_v45 = vsel %vm683_vm3, %v2142_v54, %v2146_v31  ;;  %2728 = vst.msk [vmem:[%s3875_s16 + $0x10] sm:$0xf] %vm2656_vm4, %v3364_v40  ;;  %2730 = vst.msk [vmem:[%s3875_s16 + $0x18] sm:$0xf] %vm2656_vm4, %v3364_v40 }
  0x74   : > { %2732 = vst.msk [vmem:[%s3875_s16 + $0x20] sm:$0xf] %vm2656_vm4, %v3364_v40  ;;  %2734 = vst.msk [vmem:[%s3875_s16 + $0x28] sm:$0xf] %vm2656_vm4, %v3364_v40 }
  0x75   : > { %3211 = vmatmul.mubr.msk.bf16.gmra.mrb[48].mxu0 %vm279_vm1, %v3760_v24  ;;  %v1448_v24 = vor.u32 %v1446_v58, %v1444_v44  ;;  %v2139_v44 = vsel %vm683_vm3, %v2134_v37, %v2138_v27  ;;  %2736 = vst.msk [vmem:[%s3875_s16 + $0x30] sm:$0xf] %vm2656_vm4, %v3364_v40  ;;  %2738 = vst.msk [vmem:[%s3875_s16 + $0x38] sm:$0xf] %vm2656_vm4, %v3364_v40 }
  0x76   : > { %3214 = vmatprep.mubr.msk.bf16.mxu0 %vm279_vm1, %v3773_v23  ;;  %v2108_v23 = vshrl.u32 %v3342_v47, 16  ;;  %v2155_v47 = vsel %vm683_vm3, %v2150_v43, %v2154_v46  ;;  %2740 = vst.msk [vmem:[%s3875_s16 + $0x40] sm:$0xf] %vm2656_vm4, %v3364_v40  ;;  %2742 = vst.msk [vmem:[%s3875_s16 + $0x48] sm:$0xf] %vm2656_vm4, %v3364_v40 }
  0x77   : > { %v1453_v28 = vsel %vm683_vm3, %v1448_v24, %v1452_v42 }
  0x78   : > { %3193 = vmatmul.mubr.msk.bf16.gmra.mrb[48].mxu1 %vm279_vm1, %v1437_v61  ;;  %v2110_v19 = vor.u32 %v2108_v23, %v2106_v16  ;;  %v2949_v61 = vcombine.low %v3736_v41, %v3740_v60 }
  0x79   : > { %3196 = vmatprep.mubr.msk.bf16.mxu1 %vm279_vm1, %v1445_v55 }
  0x7a   : > { %v2115_v10 = vsel %vm683_vm3, %v2110_v19, %v2114_v26 }
  0x7d   : > { %3215 = vmatmul.mubr.msk.bf16.gmra.mrb[52].mxu0 %vm279_vm1, %v3777_v35  ;;  %v2107_v35 = vsel %vm683_vm3, %v2102_v18, %v2106_v16 }
  0x7e   : > { %3238 = vmatprep.mubr.msk.bf16.mxu0 %vm279_vm1, %v2099_v14 }
  0x80   : > { %3197 = vmatmul.mubr.msk.bf16.gmra.mrb[52].mxu1 %vm279_vm1, %v1453_v28 }
  0x81   : > { %3220 = vmatprep.mubr.msk.bf16.mxu1 %vm279_vm1, %v2942_v6 }
  0x85   : > { %3239 = vmatmul.mubr.msk.bf16.vlgmr.msra.gmra.mrb[56].mxu0 %vm279_vm1, %v2107_v35 }
  0x86   : > { %3242 = vmatprep.mubr.msk.bf16.mxu0 %vm279_vm1, %v2115_v10 }
  0x88   : > { %3221 = vmatmul.mubr.msk.bf16.vlgmr.msra.gmra.mrb[56].mxu1 %vm279_vm1, %v2943_v38 }
  0x89   : > { %3224 = vmatprep.mubr.msk.bf16.mxu1 %vm279_vm1, %v2944_v36 }
  0x8d   : > { %3243 = vmatmul.mubr.msk.bf16.gmra.mrb[60].mxu0 %vm279_vm1, %v2123_v2 }
  0x8e   : > { %3246 = vmatprep.mubr.msk.bf16.mxu0 %vm279_vm1, %v2131_v0 }
  0x90   : > { %3225 = vmatmul.mubr.msk.bf16.gmra.mrb[60].mxu1 %vm279_vm1, %v2945_v8 }
  0x91   : > { %3228 = vmatprep.mubr.msk.bf16.mxu1 %vm279_vm1, %v2946_v33 }
  0x95   : > { %3247 = vmatmul.mubr.msk.bf16.gmra.mrb[64].mxu0 %vm279_vm1, %v2139_v44 }
  0x96   : > { %3250 = vmatprep.mubr.msk.bf16.mxu0 %vm279_vm1, %v2147_v45 }
  0x98   : > { %3229 = vmatmul.mubr.msk.bf16.gmra.mrb[64].mxu1 %vm279_vm1, %v2947_v3 }
  0x99   : > { %3232 = vmatprep.mubr.msk.bf16.mxu1 %vm279_vm1, %v2948_v7 }
  0x9d   : > { %3251 = vmatmul.mubr.msk.bf16.gmra.mrb[68].mxu0 %vm279_vm1, %v2155_v47 }
  0xa0   : > { %3233 = vmatmul.mubr.msk.bf16.gmra.mrb[68].mxu1 %vm279_vm1, %v2949_v61 }
  0xe8   : > { %v3096_v48 = vpop.f32.mrb[0].mxu0 }
  0xe9   : > { %v342_v30 = vpop.f32.mrb[1].mxu0 }
  0xea   : > { %v3097_v41 = vpop.f32.mrb[2].mxu0 }
  0xeb   : > { %v345_v60 = vpop.f32.mrb[3].mxu0  ;;  %v3104_v58 = vpop.f32.mrb[0].mxu1 }
  0xec   : > { %v374_v62 = vpop.f32.mrb[1].mxu1 }
  0xed   : > { %v3105_v55 = vpop.f32.mrb[2].mxu1 }
  0xee   : > { %v377_v59 = vpop.f32.mrb[3].mxu1 }
  0xf0   : > { %v3100_v63 = vpop.f32.mrb[4].mxu0 }
  0xf1   : > { %v358_v9 = vpop.f32.mrb[5].mxu0 }
  0xf2   : > { %v3101_v51 = vpop.f32.mrb[6].mxu0 }
  0xf3   : > { %v361_v24 = vpop.f32.mrb[7].mxu0  ;;  %v3108_v42 = vpop.f32.mrb[4].mxu1 }
  0xf4   : > { %v390_v11 = vpop.f32.mrb[5].mxu1 }
  0xf5   : > { %v3109_v14 = vpop.f32.mrb[6].mxu1 }
  0xf6   : > { %v393_v23 = vpop.f32.mrb[7].mxu1 }
  0xf8   : > { %v3132_v50 = vpop.f32.mrb[8].mxu0 }
  0xf9   : > { %v813_v16 = vpop.f32.mrb[9].mxu0 }
  0xfa   : > { %v3133_v34 = vpop.f32.mrb[10].mxu0 }
  0xfb   : > { %v816_v28 = vpop.f32.mrb[11].mxu0  ;;  %v3114_v6 = vpop.f32.mrb[8].mxu1 }
  0xfc   : > { %v567_v18 = vadd.f32 %v3114_v6, %v3096_v48  ;;  %v558_v19 = vpop.f32.mrb[9].mxu1 }
  0xfd   : > { %v559_v26 = vadd.f32 %v558_v19, %v342_v30  ;;  %v3115_v29 = vpop.f32.mrb[10].mxu1 }
  0xfe   : > { %v878_v52 = vadd.f32 %v3132_v50, %v567_v18  ;;  %v561_v35 = vpop.f32.mrb[11].mxu1 }
  0xff   : > { %v876_v12 = vadd.f32 %v813_v16, %v559_v26 }
 0x100   : > { %v3136_v10 = vpop.f32.mrb[12].mxu0 }
 0x101   : > { %v829_v53 = vpop.f32.mrb[13].mxu0 }
 0x102   : > { %v3137_v1 = vpop.f32.mrb[14].mxu0 }
 0x103   : > { %v832_v38 = vpop.f32.mrb[15].mxu0  ;;  %v3118_v20 = vpop.f32.mrb[12].mxu1 }
 0x104   : > { %v583_v21 = vadd.f32 %v3118_v20, %v3100_v63  ;;  %v574_v36 = vpop.f32.mrb[13].mxu1 }
 0x105   : > { %v575_v4 = vadd.f32 %v574_v36, %v358_v9  ;;  %v3119_v57 = vpop.f32.mrb[14].mxu1 }
 0x106   : > { %v882_v56 = vadd.f32 %v3136_v10, %v583_v21  ;;  %v577_v13 = vpop.f32.mrb[15].mxu1 }
 0x107   : > { %v880_v17 = vadd.f32 %v829_v53, %v575_v4 }
 0x108   : > { %v3140_v2 = vpop.f32.mrb[16].mxu0 }
 0x109   : > { %v845_v5 = vpop.f32.mrb[17].mxu0 }
 0x10a   : > { %v3141_v0 = vpop.f32.mrb[18].mxu0 }
 0x10b   : > { %v848_v22 = vpop.f32.mrb[19].mxu0  ;;  %v3122_v25 = vpop.f32.mrb[16].mxu1 }
 0x10c   : > { %v599_v8 = vadd.f32 %v3122_v25, %v3104_v58  ;;  %v590_v27 = vpop.f32.mrb[17].mxu1 }
 0x10d   : > { %v591_v33 = vadd.f32 %v590_v27, %v374_v62  ;;  %v3123_v37 = vpop.f32.mrb[18].mxu1 }
 0x10e   : > { %v886_v39 = vadd.f32 %v3140_v2, %v599_v8  ;;  %v593_v54 = vpop.f32.mrb[19].mxu1 }
 0x10f   : > { %v884_v31 = vadd.f32 %v845_v5, %v591_v33 }
 0x110   : > { %v3144_v44 = vpop.f32.mrb[20].mxu0 }
 0x111   : > { %v861_v32 = vpop.f32.mrb[21].mxu0 }
 0x112   : > { %v3145_v49 = vpop.f32.mrb[22].mxu0 }
 0x113   : > { %v864_v45 = vpop.f32.mrb[23].mxu0  ;;  %v3126_v3 = vpop.f32.mrb[20].mxu1 }
 0x114   : > { %v615_v7 = vadd.f32 %v3126_v3, %v3108_v42  ;;  %v606_v43 = vpop.f32.mrb[21].mxu1 }
 0x115   : > { %v607_v46 = vadd.f32 %v606_v43, %v390_v11  ;;  %v3127_v47 = vpop.f32.mrb[22].mxu1 }
 0x116   : > { %v890_v61 = vadd.f32 %v3144_v44, %v615_v7  ;;  %v609_v15 = vpop.f32.mrb[23].mxu1 }
 0x117   : > { %v888_v48 = vadd.f32 %v861_v32, %v607_v46 }
 0x118   : > { %v3168_v30 = vpop.f32.mrb[24].mxu0 }
 0x119   : > { %v1245_v40 = vpop.f32.mrb[25].mxu0 }
 0x11a   : > { %v3169_v41 = vpop.f32.mrb[26].mxu0 }
 0x11b   : > { %v1248_v60 = vpop.f32.mrb[27].mxu0  ;;  %v3150_v58 = vpop.f32.mrb[24].mxu1 }
 0x11c   : > { %v1160_v62 = vadd.f32 %v3150_v58, %v878_v52  ;;  %v1095_v55 = vpop.f32.mrb[25].mxu1 }
 0x11d   : > { %v1158_v59 = vadd.f32 %v1095_v55, %v876_v12  ;;  %v3151_v63 = vpop.f32.mrb[26].mxu1 }
 0x11e   : > { %v1310_v9 = vadd.f32 %v3168_v30, %v1160_v62  ;;  %v1098_v51 = vpop.f32.mrb[27].mxu1 }
 0x11f   : > { %v1308_v24 = vadd.f32 %v1245_v40, %v1158_v59 }
 0x120   : > { %v3172_v14 = vpop.f32.mrb[28].mxu0 }
 0x121   : > { %v1261_v42 = vpop.f32.mrb[29].mxu0 }
 0x122   : > { %v3173_v23 = vpop.f32.mrb[30].mxu0 }
 0x123   : > { %v1264_v11 = vpop.f32.mrb[31].mxu0  ;;  %v3154_v50 = vpop.f32.mrb[28].mxu1 }
 0x124   : > { %v1164_v16 = vadd.f32 %v3154_v50, %v882_v56  ;;  %v1111_v34 = vpop.f32.mrb[29].mxu1 }
 0x125   : > { %v1162_v28 = vadd.f32 %v1111_v34, %v880_v17  ;;  %v3155_v6 = vpop.f32.mrb[30].mxu1 }
 0x126   : > { %v1314_v18 = vadd.f32 %v3172_v14, %v1164_v16  ;;  %v1114_v19 = vpop.f32.mrb[31].mxu1 }
 0x127   : > { %v1312_v26 = vadd.f32 %v1261_v42, %v1162_v28 }
 0x128   : > { %v3176_v29 = vpop.f32.mrb[32].mxu0 }
 0x129   : > { %v1277_v52 = vpop.f32.mrb[33].mxu0 }
 0x12a   : > { %v3177_v35 = vpop.f32.mrb[34].mxu0 }
 0x12b   : > { %v1280_v12 = vpop.f32.mrb[35].mxu0  ;;  %v3158_v10 = vpop.f32.mrb[32].mxu1 }
 0x12c   : > { %v1168_v53 = vadd.f32 %v3158_v10, %v886_v39  ;;  %v1127_v1 = vpop.f32.mrb[33].mxu1 }
 0x12d   : > { %v1166_v38 = vadd.f32 %v1127_v1, %v884_v31  ;;  %v3159_v20 = vpop.f32.mrb[34].mxu1 }
 0x12e   : > { %v1318_v21 = vadd.f32 %v3176_v29, %v1168_v53  ;;  %v1130_v36 = vpop.f32.mrb[35].mxu1 }
 0x12f   : > { %v1316_v4 = vadd.f32 %v1277_v52, %v1166_v38 }
 0x130   : > { %v3180_v57 = vpop.f32.mrb[36].mxu0 }
 0x131   : > { %v1293_v56 = vpop.f32.mrb[37].mxu0 }
 0x132   : > { %v3181_v13 = vpop.f32.mrb[38].mxu0 }
 0x133   : > { %v1296_v17 = vpop.f32.mrb[39].mxu0  ;;  %v3162_v2 = vpop.f32.mrb[36].mxu1 }
 0x134   : > { %v1172_v5 = vadd.f32 %v3162_v2, %v890_v61  ;;  %v1143_v0 = vpop.f32.mrb[37].mxu1  ;;  %v3923_v2 = vld [vmem:[%s3961_s2] ss:$0 sm:$0xff] }
 0x135   : > { %v1170_v22 = vadd.f32 %v1143_v0, %v888_v48  ;;  %v3163_v25 = vpop.f32.mrb[38].mxu1 }
 0x136   : > { %v1322_v8 = vadd.f32 %v3180_v57, %v1172_v5  ;;  %v1146_v27 = vpop.f32.mrb[39].mxu1 }
 0x137   : > { %v1320_v33 = vadd.f32 %v1293_v56, %v1170_v22  ;;  %v2321_v56 = vld [vmem:[%s3917_s19 + $0xc] ss:$8 sps:$4 sm:$0xff]  }
 0x138   : > { %v3204_v37 = vpop.f32.mrb[40].mxu0  ;;  %v2337_v25 = vunpack.c.h.bf16 %v2321_v56 }
 0x139   : > { %v1797_v39 = vpop.f32.mrb[41].mxu0 }
 0x13a   : > { %v3205_v54 = vpop.f32.mrb[42].mxu0 }
 0x13b   : > { %v1800_v31 = vpop.f32.mrb[43].mxu0  ;;  %v3186_v44 = vpop.f32.mrb[40].mxu1 }
 0x13c   : > { %v1580_v32 = vadd.f32 %v3186_v44, %v1310_v9  ;;  %v1515_v49 = vpop.f32.mrb[41].mxu1 }
 0x13d   : > { %v1578_v45 = vadd.f32 %v1515_v49, %v1308_v24  ;;  %v3187_v3 = vpop.f32.mrb[42].mxu1 }
 0x13e   : > { %v1862_v7 = vadd.f32 %v3204_v37, %v1580_v32  ;;  %v1518_v43 = vpop.f32.mrb[43].mxu1 }
 0x13f   : > { %v1860_v46 = vadd.f32 %v1797_v39, %v1578_v45 }
 0x140   : > { %v3208_v47 = vpop.f32.mrb[44].mxu0 }
 0x141   : > { %v1813_v61 = vpop.f32.mrb[45].mxu0 }
 0x142   : > { %v3209_v15 = vpop.f32.mrb[46].mxu0 }
 0x143   : > { %v1816_v48 = vpop.f32.mrb[47].mxu0  ;;  %v3190_v30 = vpop.f32.mrb[44].mxu1 }
 0x144   : > { %v1584_v40 = vadd.f32 %v3190_v30, %v1314_v18  ;;  %v1531_v41 = vpop.f32.mrb[45].mxu1 }
 0x145   : > { %v1582_v60 = vadd.f32 %v1531_v41, %v1312_v26  ;;  %v3191_v58 = vpop.f32.mrb[46].mxu1 }
 0x146   : > { %v1866_v62 = vadd.f32 %v3208_v47, %v1584_v40  ;;  %v1534_v55 = vpop.f32.mrb[47].mxu1 }
 0x147   : > { %v1864_v59 = vadd.f32 %v1813_v61, %v1582_v60 }
 0x148   : > { %v3212_v63 = vpop.f32.mrb[48].mxu0 }
 0x149   : > { %v1829_v9 = vpop.f32.mrb[49].mxu0 }
 0x14a   : > { %v3213_v51 = vpop.f32.mrb[50].mxu0 }
 0x14b   : > { %v1832_v24 = vpop.f32.mrb[51].mxu0  ;;  %v3194_v14 = vpop.f32.mrb[48].mxu1 }
 0x14c   : > { %v1588_v42 = vadd.f32 %v3194_v14, %v1318_v21  ;;  %v1547_v23 = vpop.f32.mrb[49].mxu1 }
 0x14d   : > { %v1586_v11 = vadd.f32 %v1547_v23, %v1316_v4  ;;  %v3195_v50 = vpop.f32.mrb[50].mxu1 }
 0x14e   : > { %v3905_v16 = vadd.f32 %v3212_v63, %v1588_v42  ;;  %v1550_v34 = vpop.f32.mrb[51].mxu1  ;;  %v2329_v50 = vld [vmem:[%s3917_s19 + $0x2c] ss:$8 sps:$4 sm:$0xff]  }
 0x14f   : > { %v3907_v28 = vadd.f32 %v1829_v9, %v1586_v11 }
 0x150   : > { %v3216_v6 = vpop.f32.mrb[52].mxu0 }
 0x151   : > { %v1845_v18 = vpop.f32.mrb[53].mxu0 }
 0x152   : > { %v3217_v19 = vpop.f32.mrb[54].mxu0 }
 0x153   : > { %v1848_v26 = vpop.f32.mrb[55].mxu0  ;;  %v3198_v29 = vpop.f32.mrb[52].mxu1 }
 0x154   : > { %v1592_v52 = vadd.f32 %v3198_v29, %v1322_v8  ;;  %v1563_v35 = vpop.f32.mrb[53].mxu1 }
 0x155   : > { %v1590_v12 = vadd.f32 %v1563_v35, %v1320_v33  ;;  %v3199_v10 = vpop.f32.mrb[54].mxu1  ;;  %v2335_v33 = vunpack.c.l.bf16 %v2321_v56 }
 0x156   : > { %v3909_v53 = vadd.f32 %v3216_v6, %v1592_v52  ;;  %v1566_v1 = vpop.f32.mrb[55].mxu1 }
 0x157   : > { %v3911_v38 = vadd.f32 %v1845_v18, %v1590_v12  ;;  %v2345_v12 = vunpack.c.h.bf16 %v2329_v50 }
 0x158   : > { %v3240_v20 = vpop.f32.mrb[56].mxu0 }
 0x159   : > { %v2217_v21 = vpop.f32.mrb[57].mxu0 }
 0x15a   : > { %v3241_v36 = vpop.f32.mrb[58].mxu0 }
 0x15b   : > { %v2220_v4 = vpop.f32.mrb[59].mxu0  ;;  %v3222_v57 = vpop.f32.mrb[56].mxu1 }
 0x15c   : > { %v2012_v13 = vadd.f32 %v3222_v57, %v1862_v7  ;;  %v1947_v17 = vpop.f32.mrb[57].mxu1  ;;  %v2325_v7 = vld [vmem:[%s3917_s19 + $0x1c] ss:$8 sps:$4 sm:$0xff]  }
 0x15d   : > { %v2010_v5 = vadd.f32 %v1947_v17, %v1860_v46  ;;  %v3223_v0 = vpop.f32.mrb[58].mxu1  ;;  %v2341_v41 = vunpack.c.h.bf16 %v2325_v7  ;;  %v2339_v63 = vunpack.c.l.bf16 %v2325_v7 }
 0x15e   : > { %v2282_v22 = vadd.f32 %v3240_v20, %v2012_v13  ;;  %v1950_v8 = vpop.f32.mrb[59].mxu1  ;;  %v2333_v0 = vld [vmem:[%s3917_s19 + $0x3c] ss:$8 sps:$4 sm:$0xff]  }
 0x15f   : > { %v2280_v27 = vadd.f32 %v2217_v21, %v2010_v5  ;;  %v2343_v21 = vunpack.c.l.bf16 %v2329_v50 }
 0x160   : > { %v3244_v37 = vpop.f32.mrb[60].mxu0  ;;  %v2305_v39 = vadd.f32 %v3923_v2, %v2282_v22 }
 0x161   : > { %v2233_v54 = vpop.f32.mrb[61].mxu0  ;;  %v2303_v31 = vadd.f32 %v3923_v2, %v2280_v27 }
 0x162   : > { %v3245_v44 = vpop.f32.mrb[62].mxu0  ;;  %v2353_v32 = vadd.f32 %v2337_v25, %v2305_v39 }
 0x163   : > { %v2236_v49 = vpop.f32.mrb[63].mxu0  ;;  %v2351_v45 = vadd.f32 %v2335_v33, %v2303_v31  ;;  %v3226_v3 = vpop.f32.mrb[60].mxu1  ;;  %v2349_v31 = vunpack.c.h.bf16 %v2333_v0 }
 0x164   : > { %v2369_v43 = vmax.f32 %v2353_v32, 0.0  ;;  %v2016_v46 = vadd.f32 %v3226_v3, %v1866_v62  ;;  %v1963_v47 = vpop.f32.mrb[61].mxu1 }
 0x165   : > { %v2367_v61 = vmax.f32 %v2351_v45, 0.0  ;;  %v2014_v15 = vadd.f32 %v1963_v47, %v1864_v59  ;;  %v3227_v48 = vpop.f32.mrb[62].mxu1  ;;  %v2347_v45 = vunpack.c.l.bf16 %v2333_v0 }
 0x166   : > { %v2997_v30 = vpack.c.bf16 %v2369_v43, %v2369_v43  ;;  %v2286_v40 = vadd.f32 %v3244_v37, %v2016_v46  ;;  %v1966_v60 = vpop.f32.mrb[63].mxu1 }
 0x167   : > { %v2995_v58 = vpack.c.bf16 %v2367_v61, %v2367_v61  ;;  %v2284_v55 = vadd.f32 %v2233_v54, %v2014_v15 }
 0x168   : > { %v3248_v9 = vpop.f32.mrb[64].mxu0  ;;  %2729 = vst.msk [vmem:[%s3875_s16 + $0x14] sm:$0xf] %vm2656_vm4, %v2997_v30  ;;  %v2309_v51 = vadd.f32 %v3923_v2, %v2286_v40 }
 0x169   : > { %v2249_v24 = vpop.f32.mrb[65].mxu0  ;;  %2727 = vst.msk [vmem:[%s3875_s16 + $0xc] sm:$0xf] %vm2656_vm4, %v2995_v58  ;;  %v2307_v62 = vadd.f32 %v3923_v2, %v2284_v55 }
 0x16a   : > { %v3249_v59 = vpop.f32.mrb[66].mxu0  ;;  %v2357_v14 = vadd.f32 %v2341_v41, %v2309_v51 }
 0x16b   : > { %v2252_v42 = vpop.f32.mrb[67].mxu0  ;;  %v2355_v23 = vadd.f32 %v2339_v63, %v2307_v62  ;;  %v3230_v11 = vpop.f32.mrb[64].mxu1 }
 0x16c   : > { %v2373_v34 = vmax.f32 %v2357_v14, 0.0  ;;  %v2020_v6 = vadd.f32 %v3230_v11, %v3905_v16  ;;  %v1979_v18 = vpop.f32.mrb[65].mxu1 }
 0x16d   : > { %v2371_v19 = vmax.f32 %v2355_v23, 0.0  ;;  %v2018_v26 = vadd.f32 %v1979_v18, %v3907_v28  ;;  %v3231_v29 = vpop.f32.mrb[66].mxu1 }
 0x16e   : > { %v3001_v52 = vpack.c.bf16 %v2373_v34, %v2373_v34  ;;  %v2290_v35 = vadd.f32 %v3248_v9, %v2020_v6  ;;  %v1982_v10 = vpop.f32.mrb[67].mxu1 }
 0x16f   : > { %v2999_v1 = vpack.c.bf16 %v2371_v19, %v2371_v19  ;;  %v2288_v20 = vadd.f32 %v2249_v24, %v2018_v26 }
 0x170   : > { %v3252_v36 = vpop.f32.mrb[68].mxu0  ;;  %2733 = vst.msk [vmem:[%s3875_s16 + $0x24] sm:$0xf] %vm2656_vm4, %v3001_v52  ;;  %v2313_v4 = vadd.f32 %v3923_v2, %v2290_v35 }
 0x171   : > { %v2265_v16 = vpop.f32.mrb[69].mxu0  ;;  %2731 = vst.msk [vmem:[%s3875_s16 + $0x1c] sm:$0xf] %vm2656_vm4, %v2999_v1  ;;  %v2311_v57 = vadd.f32 %v3923_v2, %v2288_v20 }
 0x172   : > { %v3253_v28 = vpop.f32.mrb[70].mxu0  ;;  %v2361_v56 = vadd.f32 %v2345_v12, %v2313_v4 }
 0x173   : > { %v2268_v13 = vpop.f32.mrb[71].mxu0  ;;  %v2359_v17 = vadd.f32 %v2343_v21, %v2311_v57  ;;  %v3234_v5 = vpop.f32.mrb[68].mxu1 }
 0x174   : > { %v2377_v22 = vmax.f32 %v2361_v56, 0.0  ;;  %v2024_v25 = vadd.f32 %v3234_v5, %v3909_v53  ;;  %v1995_v8 = vpop.f32.mrb[69].mxu1 }
 0x175   : > { %v2375_v27 = vmax.f32 %v2359_v17, 0.0  ;;  %v2022_v33 = vadd.f32 %v1995_v8, %v3911_v38  ;;  %v3235_v37 = vpop.f32.mrb[70].mxu1 }
 0x176   : > { %v3005_v39 = vpack.c.bf16 %v2377_v22, %v2377_v22  ;;  %v2294_v54 = vadd.f32 %v3252_v36, %v2024_v25  ;;  %v1998_v44 = vpop.f32.mrb[71].mxu1 }
 0x177   : > { %v3003_v32 = vpack.c.bf16 %v2375_v27, %v2375_v27  ;;  %v2292_v49 = vadd.f32 %v2265_v16, %v2022_v33 }
 0x178   : > { %2737 = vst.msk [vmem:[%s3875_s16 + $0x34] sm:$0xf] %vm2656_vm4, %v3005_v39  ;;  %v2317_v3 = vadd.f32 %v3923_v2, %v2294_v54 }
 0x179   : > { %2735 = vst.msk [vmem:[%s3875_s16 + $0x2c] sm:$0xf] %vm2656_vm4, %v3003_v32  ;;  %v2315_v53 = vadd.f32 %v3923_v2, %v2292_v49 }
 0x17a   : > { %v2365_v7 = vadd.f32 %v2349_v31, %v2317_v3 }
 0x17b   : > { %v2363_v38 = vadd.f32 %v2347_v45, %v2315_v53 }
 0x17c   : > { %v2381_v43 = vmax.f32 %v2365_v7, 0.0 }
 0x17d   : > { %v2379_v46 = vmax.f32 %v2363_v38, 0.0 }
 0x17e   : > { %v3009_v47 = vpack.c.bf16 %v2381_v43, %v2381_v43 }
 0x17f   : > { %v3007_v61 = vpack.c.bf16 %v2379_v46, %v2379_v46 }
 0x180   : > { %2741 = vst.msk [vmem:[%s3875_s16 + $0x44] sm:$0xf] %vm2656_vm4, %v3009_v47 }
 0x181   : > { %2739 = vst.msk [vmem:[%s3875_s16 + $0x3c] sm:$0xf] %vm2656_vm4, %v3007_v61 }
 0x182 PF: > { %s14_s15 = sadd.s32 1, %s3361_s15  }
 0x183   : > { %p11_p4 = scmp.ge.s32.totalorder %s14_s15, 4  }
 0x185   :  { %13 = sbr.rel (!%p11_p4) target bundleno = 1 (0x1), region = 77 }

// kernel: two_block_model.4
= control target key start
LH: loop header
LB: loop body
LE: loop exit
PB: predicated region body
PF: predicated region fallthrough
CT: control target
= control target key end

     0   :  { %s3582_s21 = smov 0   ;;  %s4021_s0 = inlined_call_operand.vmem [shape: bf16[2,608,4], index: 0, kind: input, shape index: {}]   ;;  %s4022_s1 = inlined_call_operand.vmem [shape: bf16[9,4,8], index: 1, kind: input, shape index: {}]   ;;  %s4023_s2 = inlined_call_operand.vmem [shape: f32[1,8], index: 2, kind: input, shape index: {}]   ;;  %s4024_s3 = inlined_call_operand.vmem [shape: bf16[4,8], index: 3, kind: input, shape index: {}]   ;;  %s4025_s4 = inlined_call_operand.vmem [shape: f32[1,8], index: 4, kind: input, shape index: {}]   ;;  %s4026_s5 = inlined_call_operand.vmem [shape: bf16[2,176,8], index: 5, kind: output, shape index: {0}]   ;;  %s4027_s6 = inlined_call_operand.vmem [shape: bf16[2,176,8], index: 6, kind: output, shape index: {1}]  }
   0x1 LB: > { %s2931_s22 = sadd.s32 4294967295, %s3543_s21   ;;  %p2935_p0 = scmp.ge.s32.totalorder %s3543_s21, 1  ;;  %s3543_s21 = sphi %s3582_s21, %s17_s21  }
   0x2   : > { %p215_p1 = scmp.lt.s32.totalorder %s3543_s21, 3 }
   0x4   : > { %p216_p2 = pnand %p2935_p0, %p215_p1 }
   0x5   : > { %v2939_v0 = vld [vmem:[%s4022_s1 + $0x2] sm:$0x3] (!%p216_p2)  ;;  %vm366_vm0 = vcmask (!%p216_p2), 1041408   ;;  %v282_v1 = vld [vmem:[%s4022_s1] sm:$0x3] (!%p216_p2)  ;;  %p250_p3 = scmp.lt.s32.totalorder (!%p216_p2), %s2931_s22, 1 }
   0x6   : > { %219 = sbr.rel (%p216_p2) target bundleno = 393 (0x189), region = 40  ;;  %3440 = vmatprep.subr.msk.bf16.mxu0 (!%p216_p2), %vm366_vm0, %v2939_v0  ;;  %v368_v2 = vsel (!%p216_p2), %vm366_vm0, %v2939_v0, 0  ;;  %3441 = vmatprep.subr.msk.bf16.mxu1 (!%p216_p2), %vm366_vm0, %v282_v1  ;;  %v532_v3 = vsel (!%p216_p2), %vm366_vm0, %v282_v1, 0  ;;  %v2972_v4 = vld [vmem:[%s4022_s1 + $0x4] sm:$0x3] (!%p216_p2)  ;;  %vm341_vm1 = vcmask (!%p216_p2), 31744  }
   0x7   : > { %3261 = vmatpush3.bf16.msra.mxu0 (!%p216_p2), %v368_v2  ;;  %3279 = vmatpush3.bf16.msra.mxu1 (!%p216_p2), %v532_v3  ;;  %v2990_v5 = vld [vmem:[%s4022_s1 + $0x6] sm:$0x3] (!%p216_p2)  ;;  %v787_v9 = vsel (!%p216_p2), %vm366_vm0, %v2972_v4, 0  ;;  %v3007_v10 = vld [vmem:[%s4022_s1 + $0x8] sm:$0x3] (!%p216_p2)  ;;  %vm2546_vm3 = vcmask (!%p216_p2), 60416  }
   0x8   : > { %3442 = vmatprep.subr.msk.bf16.mxu0 (!%p216_p2), %vm366_vm0, %v2972_v4  ;;  %3443 = vmatprep.subr.msk.bf16.mxu1 (!%p216_p2), %vm366_vm0, %v2990_v5  ;;  %v985_v12 = vsel (!%p216_p2), %vm366_vm0, %v2990_v5, 0  ;;  %v3630_v13 = vld [vmem:[%s4022_s1 + $0xa] sm:$0x3] (!%p216_p2)  ;;  %vm693_vm2 = vsmask.f32 (!%p216_p2), 7424  ;;  %v1183_v48 = vsel (!%p216_p2), %vm366_vm0, %v3007_v10, 0 }
   0x9   : > { %v3677_v55 = vld [vmem:[%s4022_s1 + $0xc] sm:$0x3] (!%p216_p2)  ;;  %v1453_v56 = vsel (!%p216_p2), %vm366_vm0, %v3630_v13, 0  ;;  %v3689_v62 = vld [vmem:[%s4022_s1 + $0xe] sm:$0x3] (!%p216_p2) }
   0xd   : > { %s4029_s22 = smov (!%p250_p3, %s2931_s22), 1 }
   0xe   : > { %s3450_s7 = smul.u32 304, %s4029_s22 }
   0xf   : > { %s3451_s25 = smul.u32 88, %s4029_s22 }
  0x10   : > { %s3614_s10 = scalar_lea.vmem %s4021_s0, %s3450_s7 }
  0x11   : > { %v3462_v6 = vld [vmem:[%s3614_s10 + $0x4c] sm:$0xff]   ;;  %v3463_v7 = vld [vmem:[%s3614_s10] sm:$0xff]   ;;  %v3464_v8 = vld [vmem:[%s3614_s10 + $0x54] sm:$0xff]   ;;  %s3881_s28 = scalar_lea.vmem %s4026_s5, %s3451_s25  ;;  %s3916_s7 = scalar_lea.vmem %s4027_s6, %s3451_s25 }
  0x12   : > { %3262 = vmatprep.mubr.msk.bf16.mxu0 %vm341_vm1, %v3462_v6  ;;  %3280 = vmatprep.mubr.msk.bf16.mxu1 %vm341_vm1, %v3463_v7  ;;  %v3465_v11 = vld [vmem:[%s3614_s10 + $0x8] sm:$0xff]   ;;  %v3466_v14 = vld [vmem:[%s3614_s10 + $0x5c] sm:$0xff]   ;;  %v3467_v15 = vld [vmem:[%s3614_s10 + $0x10] sm:$0xff]  }
  0x13   : > { %3263 = vmatmul.mubr.msk.bf16.vlgmr.msra.gmra.mrb[0].mxu0 %vm341_vm1, %v3464_v8  ;;  %3281 = vmatmul.mubr.msk.bf16.vlgmr.msra.gmra.mrb[0].mxu1 %vm341_vm1, %v3465_v11  ;;  %v3468_v16 = vld [vmem:[%s3614_s10 + $0x64] sm:$0xff]   ;;  %v3469_v17 = vld [vmem:[%s3614_s10 + $0x18] sm:$0xff]   ;;  %v3470_v18 = vld [vmem:[%s3614_s10 + $0x6c] sm:$0xff]  }
  0x14   : > { %3297 = vmatpush3.bf16.msra.mxu0 %v787_v9  ;;  %3315 = vmatpush3.bf16.msra.mxu1 %v985_v12  ;;  %v3471_v19 = vld [vmem:[%s3614_s10 + $0x20] sm:$0xff]   ;;  %v3472_v20 = vld [vmem:[%s3614_s10 + $0x74] sm:$0xff]   ;;  %v3473_v21 = vld [vmem:[%s3614_s10 + $0x28] sm:$0xff]  }
  0x15   : > { %3266 = vmatprep.mubr.msk.bf16.mxu0 %vm341_vm1, %v3466_v14  ;;  %3284 = vmatprep.mubr.msk.bf16.mxu1 %vm341_vm1, %v3467_v15  ;;  %v3474_v22 = vld [vmem:[%s3614_s10 + $0x7c] sm:$0xff]   ;;  %v3479_v24 = vld [vmem:[%s3614_s10 + $0x8] sm:$0xff]   ;;  %v3475_v25 = vld [vmem:[%s3614_s10 + $0x30] sm:$0xff]  }
  0x16   : > { %3444 = vmatprep.subr.msk.bf16.mxu0 %vm366_vm0, %v3007_v10  ;;  %3445 = vmatprep.subr.msk.bf16.mxu1 %vm366_vm0, %v3630_v13  ;;  %v3478_v23 = vld [vmem:[%s3614_s10] sm:$0xff]   ;;  %v702_v28 = vshll.u32 %v3479_v24, 16  ;;  %v3480_v30 = vld [vmem:[%s3614_s10 + $0x10] sm:$0xff]   ;;  %v3483_v34 = vld [vmem:[%s3614_s10 + $0x18] sm:$0xff]   ;;  %v706_v36 = vshrl.u32 %v3479_v24, 16 }
  0x17   : > { %v695_v26 = vshrl.u32 %v3478_v23, 16  ;;  %v697_v27 = vshll.u32 %v3478_v23, 16  ;;  %v3476_v31 = vld [vmem:[%s3614_s10 + $0x84] sm:$0xff]   ;;  %v3477_v35 = vld [vmem:[%s3614_s10 + $0x38] sm:$0xff]   ;;  %v710_v37 = vshll.u32 %v3480_v30, 16  ;;  %v714_v40 = vshrl.u32 %v3480_v30, 16 }
  0x18   : > { %v704_v32 = vrot.slane %v702_v28, 1  ;;  %v3481_v39 = vld [vmem:[%s3614_s10 + $0x98] sm:$0xff]   ;;  %v718_v41 = vshll.u32 %v3483_v34, 16  ;;  %v3484_v42 = vld [vmem:[%s3614_s10 + $0x20] sm:$0xff]   ;;  %v3487_v45 = vld [vmem:[%s3614_s10 + $0x28] sm:$0xff]   ;;  %v722_v52 = vshrl.u32 %v3483_v34, 16 }
  0x19   : > { %v699_v29 = vrot.slane %v697_v27, 1  ;;  %v712_v44 = vrot.slane %v710_v37, 1  ;;  %v726_v49 = vshll.u32 %v3484_v42, 16  ;;  %v3482_v51 = vld [vmem:[%s3614_s10 + $0xa0] sm:$0xff]   ;;  %v730_v53 = vshrl.u32 %v3484_v42, 16  ;;  %v3485_v58 = vld [vmem:[%s3614_s10 + $0xa8] sm:$0xff]  }
  0x1a   : > { %v708_v43 = vor.u32 %v706_v36, %v704_v32  ;;  %v720_v47 = vrot.slane %v718_v41, 1  ;;  %v734_v54 = vshll.u32 %v3487_v45, 16  ;;  %v3488_v60 = vld [vmem:[%s3614_s10 + $0x30] sm:$0xff]   ;;  %v3491_v1 = vld [vmem:[%s3614_s10 + $0x38] sm:$0xff]   ;;  %v738_v5 = vshrl.u32 %v3487_v45, 16  ;;  %v3493_v23 = vld [vmem:[%s3614_s10 + $0xc8] sm:$0xff]  }
  0x1b   : > { %3267 = vmatmul.mubr.msk.bf16.gmra.mrb[4].mxu0 %vm341_vm1, %v3468_v16  ;;  %3285 = vmatmul.mubr.msk.bf16.gmra.mrb[4].mxu1 %vm341_vm1, %v3469_v17  ;;  %v700_v33 = vor.u32 %v699_v29, %v695_v26  ;;  %v716_v46 = vor.u32 %v714_v40, %v712_v44  ;;  %v728_v59 = vrot.slane %v726_v49, 1  ;;  %v742_v2 = vshll.u32 %v3488_v60, 16  ;;  %v3486_v4 = vld [vmem:[%s3614_s10 + $0xb0] sm:$0xff]   ;;  %v3489_v7 = vld [vmem:[%s3614_s10 + $0xb8] sm:$0xff]   ;;  %v3498_v16 = vld [vmem:[%s3614_s10 + $0xa0] sm:$0xff]  }
  0x1c   : > { %3270 = vmatprep.mubr.msk.bf16.mxu0 %vm341_vm1, %v3470_v18  ;;  %3288 = vmatprep.mubr.msk.bf16.mxu1 %vm341_vm1, %v3471_v19  ;;  %v713_v50 = vsel %vm693_vm2, %v708_v43, %v712_v44  ;;  %v724_v61 = vor.u32 %v722_v52, %v720_v47  ;;  %v736_v0 = vrot.slane %v734_v54, 1  ;;  %v746_v8 = vshrl.u32 %v3488_v60, 16  ;;  %v3492_v10 = vld [vmem:[%s3614_s10 + $0x40] ss:$0 sps:$4 sm:$0x11]   ;;  %v3497_v11 = vld [vmem:[%s3614_s10 + $0x98] sm:$0xff]  }
  0x1d   : > { %v705_v38 = vsel %vm693_vm2, %v700_v33, %v704_v32  ;;  %v721_v57 = vsel %vm693_vm2, %v716_v46, %v720_v47  ;;  %v732_v63 = vor.u32 %v730_v53, %v728_v59  ;;  %v750_v9 = vshll.u32 %v3491_v1, 16  ;;  %v3490_v18 = vld [vmem:[%s3614_s10 + $0xc0] sm:$0xff]   ;;  %v3499_v29 = vld [vmem:[%s3614_s10 + $0xa8] sm:$0xff]   ;;  %v3494_v30 = vld [vmem:[%s3614_s10 + $0xd0] sm:$0xff]  }
  0x1e   : > { %v729_v3 = vsel %vm693_vm2, %v724_v61, %v728_v59  ;;  %v744_v12 = vrot.slane %v742_v2, 1  ;;  %v740_v13 = vor.u32 %v738_v5, %v736_v0  ;;  %v1363_v17 = vshll.u32 %v3497_v11, 16  ;;  %v3502_v33 = vld [vmem:[%s3614_s10 + $0xb0] sm:$0xff]   ;;  %v3503_v41 = vld [vmem:[%s3614_s10 + $0xb8] sm:$0xff]   ;;  %v3506_v45 = vld [vmem:[%s3614_s10 + $0xc0] sm:$0xff]  }
  0x1f   : > { %v737_v6 = vsel %vm693_vm2, %v732_v63, %v736_v0  ;;  %v752_v15 = vrot.slane %v750_v9, 1  ;;  %v1361_v24 = vshrl.u32 %v3497_v11, 16  ;;  %v1368_v26 = vshll.u32 %v3498_v16, 16  ;;  %v3735_v46 = vld [vmem:[%s3614_s10 + $0xec] sm:$0xff]   ;;  %v3741_v52 = vld [vmem:[%s3614_s10 + $0xf4] sm:$0xff]   ;;  %v3764_v2 = vld [vmem:[%s3614_s10 + $0x104] sm:$0xff]  }
  0x20   : > { %v748_v14 = vor.u32 %v746_v8, %v744_v12  ;;  %v745_v19 = vsel %vm693_vm2, %v740_v13, %v744_v12  ;;  %v1372_v36 = vshrl.u32 %v3498_v16, 16  ;;  %v1376_v37 = vshll.u32 %v3499_v29, 16  ;;  %v3076_v54 = vld [vmem:[%s4022_s1 + $0x10] sm:$0x3]  ;;  %v3507_v60 = vld [vmem:[%s3614_s10 + $0xc8] sm:$0xff]  }
  0x21   : > { %v1370_v32 = vrot.slane %v1368_v26, 1  ;;  %v1384_v40 = vshll.u32 %v3502_v33, 16  ;;  %v1651_v44 = vsel %vm366_vm0, %v3677_v55, 0  ;;  %v1849_v49 = vsel %vm366_vm0, %v3689_v62, 0  ;;  %v3510_v0 = vld [vmem:[%s3614_s10 + $0xd0] sm:$0xff]  }
  0x22   : > { %v1378_v43 = vrot.slane %v1376_v37, 1  ;;  %v1388_v53 = vshrl.u32 %v3502_v33, 16  ;;  %v1404_v5 = vshrl.u32 %v3506_v45, 16  ;;  %v1416_v8 = vshll.u32 %v3510_v0, 16  ;;  %v3513_v26 = vld [vmem:[%s3614_s10 + $0x10] sm:$0xff]   ;;  %v3528_v37 = vld [vmem:[%s3614_s10 + $0x8] sm:$0xff]  }
  0x23   : > { %3271 = vmatmul.mubr.msk.bf16.gmra.mrb[8].mxu0 %vm341_vm1, %v3472_v20  ;;  %3289 = vmatmul.mubr.msk.bf16.gmra.mrb[8].mxu1 %vm341_vm1, %v3473_v21  ;;  %v754_v20 = vshrl.u32 %v3491_v1, 16  ;;  %v758_v21 = vshll.u32 %v3492_v10, 16  ;;  %v1374_v42 = vor.u32 %v1372_v36, %v1370_v32  ;;  %v3760_v1 = vld [vmem:[%s3614_s10 + $0xfc] sm:$0xff]   ;;  %v3511_v11 = vld [vmem:[%s3614_s10 + $0xd8] ss:$0 sps:$4 sm:$0x11]  }
  0x24   : > { %3274 = vmatprep.mubr.msk.bf16.mxu0 %vm341_vm1, %v3474_v22  ;;  %3292 = vmatprep.mubr.msk.bf16.mxu1 %vm341_vm1, %v3475_v25  ;;  %v753_v22 = vsel %vm693_vm2, %v748_v14, %v752_v15  ;;  %v1365_v25 = vrot.slane %v1363_v17, 1  ;;  %v1418_v13 = vrot.slane %v1416_v8, 1  ;;  %v3776_v14 = vld [vmem:[%s3614_s10 + $0x10c] sm:$0xff]   ;;  %v1420_v17 = vshrl.u32 %v3510_v0, 16  ;;  %v3522_v36 = vld [vmem:[%s3614_s10 + $0x74] sm:$0xff]  }
  0x25   : > { %v756_v27 = vor.u32 %v754_v20, %v752_v15  ;;  %v760_v28 = vrot.slane %v758_v21, 1  ;;  %v3779_v15 = vld [vmem:[%s3614_s10 + $0x114] sm:$0xff]   ;;  %v3519_v33 = vld [vmem:[%s3614_s10 + $0x6c] sm:$0xff]  }
  0x26   : > { %v1422_v20 = vor.u32 %v1420_v17, %v1418_v13 }
  0x27   : > { %v761_v34 = vsel %vm693_vm2, %v756_v27, %v760_v28  ;;  %v3515_v27 = vld [vmem:[%s3614_s10 + $0x5c] sm:$0xff]   ;;  %v2119_v28 = vsel %vm366_vm0, %v3076_v54, 0 }
  0x2b   : > { %3275 = vmatmul.mubr.msk.bf16.gmra.mrb[12].mxu0 %vm341_vm1, %v3476_v31  ;;  %3293 = vmatmul.mubr.msk.bf16.gmra.mrb[12].mxu1 %vm341_vm1, %v3477_v35  ;;  %v1366_v31 = vor.u32 %v1365_v25, %v1361_v24  ;;  %v3722_v35 = vld [vmem:[%s3614_s10 + $0xe4] sm:$0xff]   ;;  %v3514_v25 = vld [vmem:[%s3614_s10 + $0x54] sm:$0xff]  }
  0x2c   : > { %3298 = vmatprep.mubr.msk.bf16.mxu0 %vm341_vm1, %v705_v38  ;;  %3316 = vmatprep.mubr.msk.bf16.mxu1 %vm341_vm1, %v3481_v39  ;;  %v1380_v39 = vshrl.u32 %v3499_v29, 16  ;;  %v3516_v29 = vld [vmem:[%s3614_s10 + $0x18] sm:$0xff]  }
  0x2d   : > { %v1371_v38 = vsel %vm693_vm2, %v1366_v31, %v1370_v32  ;;  %v3518_v31 = vld [vmem:[%s3614_s10 + $0x64] sm:$0xff]  }
  0x2e   : > { %v1382_v47 = vor.u32 %v1380_v39, %v1378_v43  ;;  %v3517_v32 = vld [vmem:[%s3614_s10 + $0x20] sm:$0xff]   ;;  %v2029_v39 = vshll.u32 %v3528_v37, 16 }
  0x33   : > { %3299 = vmatmul.mubr.msk.bf16.vlgmr.msra.gmra.mrb[16].mxu0 %vm341_vm1, %v713_v50  ;;  %3317 = vmatmul.mubr.msk.bf16.vlgmr.msra.gmra.mrb[16].mxu1 %vm341_vm1, %v3482_v51  ;;  %v1392_v50 = vshll.u32 %v3503_v41, 16  ;;  %v1379_v51 = vsel %vm693_vm2, %v1374_v42, %v1378_v43  ;;  %v3524_v42 = vld [vmem:[%s3614_s10 + $0x38] sm:$0xff]   ;;  %v3526_v43 = vld [vmem:[%s3614_s10 + $0x84] sm:$0xff]  }
  0x34   : > { %3333 = vmatpush3.bf16.msra.mxu0 %v1183_v48  ;;  %3351 = vmatpush3.bf16.msra.mxu1 %v1453_v56  ;;  %v1386_v48 = vrot.slane %v1384_v40, 1  ;;  %v1400_v56 = vshll.u32 %v3506_v45, 16  ;;  %v3521_v40 = vld [vmem:[%s3614_s10 + $0x30] sm:$0xff]   ;;  %v2031_v45 = vrot.slane %v2029_v39, 1 }
  0x35   : > { %3302 = vmatprep.mubr.msk.bf16.mxu0 %vm341_vm1, %v721_v57  ;;  %3320 = vmatprep.mubr.msk.bf16.mxu1 %vm341_vm1, %v3485_v58  ;;  %v2633_v58 = vld [vmem:[%s4024_s3] sm:$0x3]  ;;  %v1394_v59 = vrot.slane %v1392_v50, 1 }
  0x36   : > { %3446 = vmatprep.subr.msk.bf16.mxu0 %vm366_vm0, %v3677_v55  ;;  %3447 = vmatprep.subr.msk.bf16.mxu1 %vm366_vm0, %v3689_v62  ;;  %v1396_v55 = vshrl.u32 %v3503_v41, 16  ;;  %v1387_v57 = vsel %vm693_vm2, %v1382_v47, %v1386_v48  ;;  %v1390_v61 = vor.u32 %v1388_v53, %v1386_v48  ;;  %v1402_v63 = vrot.slane %v1400_v56, 1  ;;  %v3523_v41 = vld [vmem:[%s3614_s10 + $0x7c] sm:$0xff]  }
  0x37   : > { %v3530_v48 = vld [vmem:[%s3614_s10 + $0x18] sm:$0xff]   ;;  %v3525_v53 = vld [vmem:[%s3614_s10 + $0x40] sm:$0xff]  }
  0x38   : > { %v1398_v62 = vor.u32 %v1396_v55, %v1394_v59  ;;  %v1406_v10 = vor.u32 %v1404_v5, %v1402_v63  ;;  %v3527_v55 = vld [vmem:[%s3614_s10 + $0x8c] sm:$0xff]  }
  0x3b   : > { %3303 = vmatmul.mubr.msk.bf16.gmra.mrb[20].mxu0 %vm341_vm1, %v729_v3  ;;  %3321 = vmatmul.mubr.msk.bf16.gmra.mrb[20].mxu1 %vm341_vm1, %v3486_v4  ;;  %v1408_v3 = vshll.u32 %v3507_v60, 16  ;;  %v1395_v4 = vsel %vm693_vm2, %v1390_v61, %v1394_v59  ;;  %v3532_v61 = vld [vmem:[%s3614_s10 + $0x28] sm:$0xff]  }
  0x3c   : > { %3306 = vmatprep.mubr.msk.bf16.mxu0 %vm341_vm1, %v737_v6  ;;  %3324 = vmatprep.mubr.msk.bf16.mxu1 %vm341_vm1, %v3489_v7  ;;  %v1403_v6 = vsel %vm693_vm2, %v1398_v62, %v1402_v63  ;;  %v1412_v7 = vshrl.u32 %v3507_v60, 16  ;;  %v2062_v8 = vshrl.u32 %v3532_v61, 16 }
  0x3d   : > { %v1410_v9 = vrot.slane %v1408_v3, 1  ;;  %v3533_v3 = vld [vmem:[%s3614_s10 + $0x30] sm:$0xff]  }
  0x3f   : > { %v1414_v12 = vor.u32 %v1412_v7, %v1410_v9  ;;  %v1411_v16 = vsel %vm693_vm2, %v1406_v10, %v1410_v9  ;;  %v2066_v9 = vshll.u32 %v3533_v3, 16 }
  0x43   : > { %3307 = vmatmul.mubr.msk.bf16.gmra.mrb[24].mxu0 %vm341_vm1, %v745_v19  ;;  %3325 = vmatmul.mubr.msk.bf16.gmra.mrb[24].mxu1 %vm341_vm1, %v3490_v18  ;;  %v1424_v18 = vshll.u32 %v3511_v11, 16  ;;  %v1419_v19 = vsel %vm693_vm2, %v1414_v12, %v1418_v13  ;;  %v3534_v11 = vld [vmem:[%s3614_s10 + $0x38] sm:$0xff]   ;;  %v2068_v13 = vrot.slane %v2066_v9, 1 }
  0x44   : > { %3310 = vmatprep.mubr.msk.bf16.mxu0 %vm341_vm1, %v753_v22  ;;  %3328 = vmatprep.mubr.msk.bf16.mxu1 %vm341_vm1, %v3493_v23  ;;  %v3790_v22 = vld [vmem:[%s3614_s10 + $0x11c] sm:$0xff]   ;;  %v3512_v23 = vld [vmem:[%s3614_s10 + $0x8] sm:$0xff]   ;;  %v2074_v17 = vshll.u32 %v3534_v11, 16 }
  0x45   : > { %v1426_v21 = vrot.slane %v1424_v18, 1 }
  0x47   : > { %v1427_v24 = vsel %vm693_vm2, %v1422_v20, %v1426_v21  ;;  %v2078_v21 = vshrl.u32 %v3534_v11, 16 }
  0x4b   : > { %3311 = vmatmul.mubr.msk.bf16.gmra.mrb[28].mxu0 %vm341_vm1, %v761_v34  ;;  %3329 = vmatmul.mubr.msk.bf16.gmra.mrb[28].mxu1 %vm341_vm1, %v3494_v30  ;;  %v2642_v30 = vsel %vm366_vm0, %v2633_v58, 0  ;;  %v3520_v34 = vld [vmem:[%s3614_s10 + $0x28] sm:$0xff]  }
  0x4c   : > { %3334 = vmatprep.mubr.msk.bf16.mxu0 %vm341_vm1, %v3722_v35  ;;  %3352 = vmatprep.mubr.msk.bf16.mxu1 %vm341_vm1, %v1371_v38  ;;  %v3529_v38 = vld [vmem:[%s3614_s10 + $0x10] sm:$0xff]  }
  0x4d   : > { %v2034_v47 = vshll.u32 %v3529_v38, 16  ;;  %v2038_v56 = vshrl.u32 %v3529_v38, 16 }
  0x4f   : > { %v2036_v50 = vrot.slane %v2034_v47, 1 }
  0x51   : > { %v2040_v62 = vor.u32 %v2038_v56, %v2036_v50 }
  0x53   : > { %3335 = vmatmul.mubr.msk.bf16.vlgmr.msra.gmra.mrb[32].mxu0 %vm341_vm1, %v3735_v46  ;;  %3353 = vmatmul.mubr.msk.bf16.vlgmr.msra.gmra.mrb[32].mxu1 %vm341_vm1, %v1379_v51  ;;  %v3531_v51 = vld [vmem:[%s3614_s10 + $0x20] sm:$0xff]  }
  0x54   : > { %3369 = vmatpush3.bf16.msra.mxu0 %v1651_v44  ;;  %3387 = vmatpush3.bf16.msra.mxu1 %v1849_v49  ;;  %v2027_v44 = vshrl.u32 %v3528_v37, 16  ;;  %v2050_v59 = vshll.u32 %v3531_v51, 16 }
  0x55   : > { %3338 = vmatprep.mubr.msk.bf16.mxu0 %vm341_vm1, %v3741_v52  ;;  %3356 = vmatprep.mubr.msk.bf16.mxu1 %vm341_vm1, %v1387_v57 }
  0x56   : > { %3448 = vmatprep.subr.msk.bf16.mxu0 %vm366_vm0, %v3076_v54  ;;  %3449 = vmatprep.subr.msk.bf16.mxu1 %vm366_vm0, %v2633_v58  ;;  %v2032_v49 = vor.u32 %v2031_v45, %v2027_v44  ;;  %v2042_v54 = vshll.u32 %v3530_v48, 16  ;;  %v2046_v58 = vshrl.u32 %v3530_v48, 16  ;;  %v2052_v0 = vrot.slane %v2050_v59, 1 }
  0x58   : > { %v2037_v57 = vsel %vm693_vm2, %v2032_v49, %v2036_v50  ;;  %v2044_v60 = vrot.slane %v2042_v54, 1 }
  0x5a   : > { %v2048_v63 = vor.u32 %v2046_v58, %v2044_v60  ;;  %v2045_v5 = vsel %vm693_vm2, %v2040_v62, %v2044_v60 }
  0x5b   : > { %3339 = vmatmul.mubr.msk.bf16.gmra.mrb[36].mxu0 %vm341_vm1, %v3760_v1  ;;  %3357 = vmatmul.mubr.msk.bf16.gmra.mrb[36].mxu1 %vm341_vm1, %v1395_v4  ;;  %v2058_v4 = vshll.u32 %v3532_v61, 16 }
  0x5c   : > { %3342 = vmatprep.mubr.msk.bf16.mxu0 %vm341_vm1, %v3764_v2  ;;  %3360 = vmatprep.mubr.msk.bf16.mxu1 %vm341_vm1, %v1403_v6  ;;  %v2054_v6 = vshrl.u32 %v3531_v51, 16  ;;  %v2053_v7 = vsel %vm693_vm2, %v2048_v63, %v2052_v0 }
  0x5d   : > { %v2060_v10 = vrot.slane %v2058_v4, 1 }
  0x5f   : > { %v2064_v12 = vor.u32 %v2062_v8, %v2060_v10 }
  0x61   : > { %v2069_v20 = vsel %vm693_vm2, %v2064_v12, %v2068_v13 }
  0x63   : > { %3343 = vmatmul.mubr.msk.bf16.gmra.mrb[40].mxu0 %vm341_vm1, %v3776_v14  ;;  %3361 = vmatmul.mubr.msk.bf16.gmra.mrb[40].mxu1 %vm341_vm1, %v1411_v16  ;;  %v3535_v16 = vld [vmem:[%s3614_s10 + $0x40] sm:$0xff]  }
  0x64   : > { %3346 = vmatprep.mubr.msk.bf16.mxu0 %vm341_vm1, %v3779_v15  ;;  %3364 = vmatprep.mubr.msk.bf16.mxu1 %vm341_vm1, %v1419_v19  ;;  %v2070_v19 = vshrl.u32 %v3533_v3, 16 }
  0x6b   : > { %3347 = vmatmul.mubr.msk.bf16.gmra.mrb[44].mxu0 %vm341_vm1, %v3790_v22  ;;  %3365 = vmatmul.mubr.msk.bf16.gmra.mrb[44].mxu1 %vm341_vm1, %v1427_v24  ;;  %v3536_v24 = vld [vmem:[%s3614_s10 + $0x48] ss:$0 sps:$4 sm:$0x11]  }
  0x6c   : > { %3370 = vmatprep.mubr.msk.bf16.mxu0 %vm341_vm1, %v3512_v23  ;;  %3388 = vmatprep.mubr.msk.bf16.mxu1 %vm341_vm1, %v3514_v25  ;;  %v2082_v23 = vshll.u32 %v3535_v16, 16 }
  0x73   : > { %3371 = vmatmul.mubr.msk.bf16.vlgmr.msra.gmra.mrb[48].mxu0 %vm341_vm1, %v3513_v26  ;;  %3389 = vmatmul.mubr.msk.bf16.vlgmr.msra.gmra.mrb[48].mxu1 %vm341_vm1, %v3515_v27  ;;  %v2084_v26 = vrot.slane %v2082_v23, 1 }
  0x74   : > { %3405 = vmatpush3.bf16.msra.mxu0 %v2119_v28  ;;  %3423 = vmatpush3.bf16.msra.mxu1 %v2642_v30  ;;  %v2086_v28 = vshrl.u32 %v3535_v16, 16 }
  0x75   : > { %3374 = vmatprep.mubr.msk.bf16.mxu0 %vm341_vm1, %v3516_v29  ;;  %3392 = vmatprep.mubr.msk.bf16.mxu1 %vm341_vm1, %v3518_v31  ;;  %v2090_v29 = vshll.u32 %v3536_v24, 16 }
  0x77   : > { %v2092_v31 = vrot.slane %v2090_v29, 1 }
  0x7b   : > { %3375 = vmatmul.mubr.msk.bf16.gmra.mrb[52].mxu0 %vm341_vm1, %v3517_v32  ;;  %3393 = vmatmul.mubr.msk.bf16.gmra.mrb[52].mxu1 %vm341_vm1, %v3519_v33 }
  0x7c   : > { %3378 = vmatprep.mubr.msk.bf16.mxu0 %vm341_vm1, %v3520_v34  ;;  %3396 = vmatprep.mubr.msk.bf16.mxu1 %vm341_vm1, %v3522_v36 }
  0x83   : > { %3379 = vmatmul.mubr.msk.bf16.gmra.mrb[56].mxu0 %vm341_vm1, %v3521_v40  ;;  %3397 = vmatmul.mubr.msk.bf16.gmra.mrb[56].mxu1 %vm341_vm1, %v3523_v41 }
  0x84   : > { %3382 = vmatprep.mubr.msk.bf16.mxu0 %vm341_vm1, %v3524_v42  ;;  %3400 = vmatprep.mubr.msk.bf16.mxu1 %vm341_vm1, %v3526_v43  ;;  %v3546_v42 = vmov 0.0|0.0  }
  0x85   : > { %2618 = vst.msk [vmem:[%s3881_s28 + $0x10] sm:$0xf] %vm2546_vm3, %v3546_v42  ;;  %2620 = vst.msk [vmem:[%s3881_s28 + $0x18] sm:$0xf] %vm2546_vm3, %v3546_v42 }
  0x86   : > { %2622 = vst.msk [vmem:[%s3881_s28 + $0x20] sm:$0xf] %vm2546_vm3, %v3546_v42  ;;  %2624 = vst.msk [vmem:[%s3881_s28 + $0x28] sm:$0xf] %vm2546_vm3, %v3546_v42 }
  0x87   : > { %2626 = vst.msk [vmem:[%s3881_s28 + $0x30] sm:$0xf] %vm2546_vm3, %v3546_v42  ;;  %2628 = vst.msk [vmem:[%s3881_s28 + $0x38] sm:$0xf] %vm2546_vm3, %v3546_v42 }
  0x88   : > { %2630 = vst.msk [vmem:[%s3881_s28 + $0x40] sm:$0xf] %vm2546_vm3, %v3546_v42  ;;  %2632 = vst.msk [vmem:[%s3881_s28 + $0x48] sm:$0xf] %vm2546_vm3, %v3546_v42 }
  0x89   : > { %2828 = vst.msk [vmem:[%s3916_s7 + $0x10] sm:$0xf] %vm2546_vm3, %v3546_v42  ;;  %2830 = vst.msk [vmem:[%s3916_s7 + $0x18] sm:$0xf] %vm2546_vm3, %v3546_v42 }
  0x8a   : > { %2832 = vst.msk [vmem:[%s3916_s7 + $0x20] sm:$0xf] %vm2546_vm3, %v3546_v42  ;;  %2834 = vst.msk [vmem:[%s3916_s7 + $0x28] sm:$0xf] %vm2546_vm3, %v3546_v42 }
  0x8b   : > { %3383 = vmatmul.mubr.msk.bf16.gmra.mrb[60].mxu0 %vm341_vm1, %v3525_v53  ;;  %3401 = vmatmul.mubr.msk.bf16.gmra.mrb[60].mxu1 %vm341_vm1, %v3527_v55  ;;  %2836 = vst.msk [vmem:[%s3916_s7 + $0x30] sm:$0xf] %vm2546_vm3, %v3546_v42  ;;  %2838 = vst.msk [vmem:[%s3916_s7 + $0x38] sm:$0xf] %vm2546_vm3, %v3546_v42 }
  0x8c   : > { %3406 = vmatprep.mubr.msk.bf16.mxu0 %vm341_vm1, %v2037_v57  ;;  %3424 = vmatprep.mubr.msk.bf16.mxu1 %vm341_vm1, %v3722_v35  ;;  %v2056_v35 = vor.u32 %v2054_v6, %v2052_v0  ;;  %2840 = vst.msk [vmem:[%s3916_s7 + $0x40] sm:$0xf] %vm2546_vm3, %v3546_v42  ;;  %2842 = vst.msk [vmem:[%s3916_s7 + $0x48] sm:$0xf] %vm2546_vm3, %v3546_v42 }
  0x8e   : > { %v2061_v18 = vsel %vm693_vm2, %v2056_v35, %v2060_v10 }
  0x93   : > { %3407 = vmatmul.mubr.msk.bf16.vlgmr.msra.gmra.mrb[64].mxu0 %vm341_vm1, %v2045_v5  ;;  %3425 = vmatmul.mubr.msk.bf16.vlgmr.msra.gmra.mrb[64].mxu1 %vm341_vm1, %v3735_v46  ;;  %v2076_v46 = vrot.slane %v2074_v17, 1 }
  0x94   : > { %3410 = vmatprep.mubr.msk.bf16.mxu0 %vm341_vm1, %v2053_v7  ;;  %3428 = vmatprep.mubr.msk.bf16.mxu1 %vm341_vm1, %v3741_v52  ;;  %v2072_v52 = vor.u32 %v2070_v19, %v2068_v13 }
  0x95   : > { %v2080_v25 = vor.u32 %v2078_v21, %v2076_v46 }
  0x96   : > { %v2077_v27 = vsel %vm693_vm2, %v2072_v52, %v2076_v46 }
  0x97   : > { %v2085_v30 = vsel %vm693_vm2, %v2080_v25, %v2084_v26 }
  0x9b   : > { %3411 = vmatmul.mubr.msk.bf16.gmra.mrb[68].mxu0 %vm341_vm1, %v2061_v18  ;;  %3429 = vmatmul.mubr.msk.bf16.gmra.mrb[68].mxu1 %vm341_vm1, %v3760_v1  ;;  %v2088_v1 = vor.u32 %v2086_v28, %v2084_v26 }
  0x9c   : > { %3414 = vmatprep.mubr.msk.bf16.mxu0 %vm341_vm1, %v2069_v20  ;;  %3432 = vmatprep.mubr.msk.bf16.mxu1 %vm341_vm1, %v3764_v2 }
  0x9d   : > { %v2093_v2 = vsel %vm693_vm2, %v2088_v1, %v2092_v31 }
  0xa3   : > { %3415 = vmatmul.mubr.msk.bf16.gmra.mrb[72].mxu0 %vm341_vm1, %v2077_v27  ;;  %3433 = vmatmul.mubr.msk.bf16.gmra.mrb[72].mxu1 %vm341_vm1, %v3776_v14 }
  0xa4   : > { %3418 = vmatprep.mubr.msk.bf16.mxu0 %vm341_vm1, %v2085_v30  ;;  %3436 = vmatprep.mubr.msk.bf16.mxu1 %vm341_vm1, %v3779_v15 }
  0xab   : > { %3419 = vmatmul.mubr.msk.bf16.gmra.mrb[76].mxu0 %vm341_vm1, %v2093_v2  ;;  %3437 = vmatmul.mubr.msk.bf16.gmra.mrb[76].mxu1 %vm341_vm1, %v3790_v22  ;;  %v3545_v22 = vmov 0  }
  0xac   : > { %2547 = vst.msk [vmem:[%s3881_s28] sm:$0xf] %vm2546_vm3, %v3545_v22  ;;  %2548 = vst.msk [vmem:[%s3881_s28 + $0x4] sm:$0xf] %vm2546_vm3, %v3545_v22 }
  0xad   : > { %2549 = vst.msk [vmem:[%s3881_s28 + $0x8] sm:$0xf] %vm2546_vm3, %v3545_v22  ;;  %2550 = vst.msk [vmem:[%s3881_s28 + $0x4c] sm:$0xf] %vm2546_vm3, %v3545_v22 }
  0xae   : > { %2551 = vst.msk [vmem:[%s3881_s28 + $0x50] sm:$0xf] %vm2546_vm3, %v3545_v22  ;;  %2552 = vst.msk [vmem:[%s3881_s28 + $0x54] sm:$0xf] %vm2546_vm3, %v3545_v22 }
  0xaf   : > { %2757 = vst.msk [vmem:[%s3916_s7] sm:$0xf] %vm2546_vm3, %v3545_v22  ;;  %2758 = vst.msk [vmem:[%s3916_s7 + $0x4] sm:$0xf] %vm2546_vm3, %v3545_v22 }
  0xb0   : > { %2759 = vst.msk [vmem:[%s3916_s7 + $0x8] sm:$0xf] %vm2546_vm3, %v3545_v22  ;;  %2760 = vst.msk [vmem:[%s3916_s7 + $0x4c] sm:$0xf] %vm2546_vm3, %v3545_v22 }
  0xb1   : > { %2761 = vst.msk [vmem:[%s3916_s7 + $0x50] sm:$0xf] %vm2546_vm3, %v3545_v22  ;;  %2762 = vst.msk [vmem:[%s3916_s7 + $0x54] sm:$0xf] %vm2546_vm3, %v3545_v22 }
  0xe6   : > { %v3264_v32 = vpop.f32.mrb[0].mxu0  ;;  %v3282_v33 = vpop.f32.mrb[0].mxu1 }
  0xe7   : > { %v404_v34 = vpop.f32.mrb[1].mxu0  ;;  %v3872_v14 = vadd.f32 %v3282_v33, %v3264_v32  ;;  %v568_v36 = vpop.f32.mrb[1].mxu1 }
  0xe8   : > { %v3265_v37 = vpop.f32.mrb[2].mxu0  ;;  %v3874_v38 = vadd.f32 %v568_v36, %v404_v34  ;;  %v3283_v40 = vpop.f32.mrb[2].mxu1 }
  0xe9   : > { %v407_v39 = vpop.f32.mrb[3].mxu0  ;;  %v571_v15 = vpop.f32.mrb[3].mxu1 }
  0xee   : > { %v3268_v41 = vpop.f32.mrb[4].mxu0  ;;  %v3286_v43 = vpop.f32.mrb[4].mxu1 }
  0xef   : > { %v420_v44 = vpop.f32.mrb[5].mxu0  ;;  %v593_v45 = vadd.f32 %v3286_v43, %v3268_v41  ;;  %v584_v47 = vpop.f32.mrb[5].mxu1 }
  0xf0   : > { %v3269_v48 = vpop.f32.mrb[6].mxu0  ;;  %v585_v49 = vadd.f32 %v584_v47, %v420_v44  ;;  %v3287_v51 = vpop.f32.mrb[6].mxu1 }
  0xf1   : > { %v423_v50 = vpop.f32.mrb[7].mxu0  ;;  %v587_v53 = vpop.f32.mrb[7].mxu1 }
  0xf6   : > { %v3272_v54 = vpop.f32.mrb[8].mxu0  ;;  %v3290_v55 = vpop.f32.mrb[8].mxu1 }
  0xf7   : > { %v436_v56 = vpop.f32.mrb[9].mxu0  ;;  %v609_v57 = vadd.f32 %v3290_v55, %v3272_v54  ;;  %v600_v58 = vpop.f32.mrb[9].mxu1 }
  0xf8   : > { %v3273_v59 = vpop.f32.mrb[10].mxu0  ;;  %v601_v60 = vadd.f32 %v600_v58, %v436_v56  ;;  %v3291_v62 = vpop.f32.mrb[10].mxu1 }
  0xf9   : > { %v439_v61 = vpop.f32.mrb[11].mxu0  ;;  %v603_v63 = vpop.f32.mrb[11].mxu1 }
  0xfe   : > { %v3276_v0 = vpop.f32.mrb[12].mxu0  ;;  %v3294_v3 = vpop.f32.mrb[12].mxu1 }
  0xff   : > { %v452_v4 = vpop.f32.mrb[13].mxu0  ;;  %v625_v5 = vadd.f32 %v3294_v3, %v3276_v0  ;;  %v616_v6 = vpop.f32.mrb[13].mxu1 }
 0x100   : > { %v3277_v7 = vpop.f32.mrb[14].mxu0  ;;  %v617_v8 = vadd.f32 %v616_v6, %v452_v4  ;;  %v3295_v10 = vpop.f32.mrb[14].mxu1 }
 0x101   : > { %v455_v9 = vpop.f32.mrb[15].mxu0  ;;  %v619_v11 = vpop.f32.mrb[15].mxu1 }
 0x106   : > { %v3300_v35 = vpop.f32.mrb[16].mxu0  ;;  %v3318_v16 = vpop.f32.mrb[16].mxu1 }
 0x107   : > { %v888_v12 = vadd.f32 %v3300_v35, %v3872_v14  ;;  %v823_v13 = vpop.f32.mrb[17].mxu0  ;;  %v1021_v19 = vpop.f32.mrb[17].mxu1 }
 0x108   : > { %v886_v17 = vadd.f32 %v823_v13, %v3874_v38  ;;  %v3301_v18 = vpop.f32.mrb[18].mxu0  ;;  %v3319_v23 = vpop.f32.mrb[18].mxu1 }
 0x109   : > { %v1086_v20 = vadd.f32 %v3318_v16, %v888_v12  ;;  %v826_v21 = vpop.f32.mrb[19].mxu0  ;;  %v1024_v52 = vpop.f32.mrb[19].mxu1 }
 0x10a   : > { %v1084_v46 = vadd.f32 %v1021_v19, %v886_v17 }
 0x10e   : > { %v3304_v24 = vpop.f32.mrb[20].mxu0  ;;  %v3322_v27 = vpop.f32.mrb[20].mxu1 }
 0x10f   : > { %v892_v25 = vadd.f32 %v3304_v24, %v593_v45  ;;  %v839_v26 = vpop.f32.mrb[21].mxu0  ;;  %v1037_v30 = vpop.f32.mrb[21].mxu1 }
 0x110   : > { %v890_v28 = vadd.f32 %v839_v26, %v585_v49  ;;  %v3305_v29 = vpop.f32.mrb[22].mxu0  ;;  %v3323_v2 = vpop.f32.mrb[22].mxu1 }
 0x111   : > { %v1090_v1 = vadd.f32 %v3322_v27, %v892_v25  ;;  %v842_v31 = vpop.f32.mrb[23].mxu0  ;;  %v1040_v33 = vpop.f32.mrb[23].mxu1 }
 0x112   : > { %v1088_v32 = vadd.f32 %v1037_v30, %v890_v28 }
 0x116   : > { %v3308_v34 = vpop.f32.mrb[24].mxu0  ;;  %v3326_v37 = vpop.f32.mrb[24].mxu1 }
 0x117   : > { %v896_v14 = vadd.f32 %v3308_v34, %v609_v57  ;;  %v855_v36 = vpop.f32.mrb[25].mxu0  ;;  %v1053_v40 = vpop.f32.mrb[25].mxu1 }
 0x118   : > { %v894_v38 = vadd.f32 %v855_v36, %v601_v60  ;;  %v3309_v39 = vpop.f32.mrb[26].mxu0  ;;  %v3327_v41 = vpop.f32.mrb[26].mxu1 }
 0x119   : > { %v1094_v15 = vadd.f32 %v3326_v37, %v896_v14  ;;  %v858_v22 = vpop.f32.mrb[27].mxu0  ;;  %v1056_v43 = vpop.f32.mrb[27].mxu1 }
 0x11a   : > { %v1092_v42 = vadd.f32 %v1053_v40, %v894_v38 }
 0x11e   : > { %v3312_v44 = vpop.f32.mrb[28].mxu0  ;;  %v3330_v48 = vpop.f32.mrb[28].mxu1 }
 0x11f   : > { %v900_v45 = vadd.f32 %v3312_v44, %v625_v5  ;;  %v871_v47 = vpop.f32.mrb[29].mxu0  ;;  %v1069_v51 = vpop.f32.mrb[29].mxu1 }
 0x120   : > { %v898_v49 = vadd.f32 %v871_v47, %v617_v8  ;;  %v3313_v50 = vpop.f32.mrb[30].mxu0  ;;  %v3331_v55 = vpop.f32.mrb[30].mxu1 }
 0x121   : > { %v1098_v53 = vadd.f32 %v3330_v48, %v900_v45  ;;  %v874_v54 = vpop.f32.mrb[31].mxu0  ;;  %v1072_v57 = vpop.f32.mrb[31].mxu1 }
 0x122   : > { %v1096_v56 = vadd.f32 %v1069_v51, %v898_v49 }
 0x126   : > { %v3336_v58 = vpop.f32.mrb[32].mxu0  ;;  %v3354_v61 = vpop.f32.mrb[32].mxu1 }
 0x127   : > { %v1284_v59 = vadd.f32 %v3336_v58, %v1086_v20  ;;  %v1219_v60 = vpop.f32.mrb[33].mxu0  ;;  %v1489_v0 = vpop.f32.mrb[33].mxu1 }
 0x128   : > { %v1282_v62 = vadd.f32 %v1219_v60, %v1084_v46  ;;  %v3337_v63 = vpop.f32.mrb[34].mxu0  ;;  %v3355_v5 = vpop.f32.mrb[34].mxu1 }
 0x129   : > { %v1554_v3 = vadd.f32 %v3354_v61, %v1284_v59  ;;  %v1222_v4 = vpop.f32.mrb[35].mxu0  ;;  %v1492_v7 = vpop.f32.mrb[35].mxu1 }
 0x12a   : > { %v1552_v6 = vadd.f32 %v1489_v0, %v1282_v62 }
 0x12e   : > { %v3340_v8 = vpop.f32.mrb[36].mxu0  ;;  %v3358_v11 = vpop.f32.mrb[36].mxu1 }
 0x12f   : > { %v1288_v9 = vadd.f32 %v3340_v8, %v1090_v1  ;;  %v1235_v10 = vpop.f32.mrb[37].mxu0  ;;  %v1505_v13 = vpop.f32.mrb[37].mxu1 }
 0x130   : > { %v1286_v35 = vadd.f32 %v1235_v10, %v1088_v32  ;;  %v3341_v12 = vpop.f32.mrb[38].mxu0  ;;  %v3359_v18 = vpop.f32.mrb[38].mxu1 }
 0x131   : > { %v1558_v16 = vadd.f32 %v3358_v11, %v1288_v9  ;;  %v1238_v17 = vpop.f32.mrb[39].mxu0  ;;  %v1508_v20 = vpop.f32.mrb[39].mxu1 }
 0x132   : > { %v1556_v19 = vadd.f32 %v1505_v13, %v1286_v35 }
 0x136   : > { %v3344_v21 = vpop.f32.mrb[40].mxu0  ;;  %v3362_v52 = vpop.f32.mrb[40].mxu1 }
 0x137   : > { %v1292_v23 = vadd.f32 %v3344_v21, %v1094_v15  ;;  %v1251_v46 = vpop.f32.mrb[41].mxu0  ;;  %v1521_v26 = vpop.f32.mrb[41].mxu1 }
 0x138   : > { %v1290_v24 = vadd.f32 %v1251_v46, %v1092_v42  ;;  %v3345_v25 = vpop.f32.mrb[42].mxu0  ;;  %v3363_v29 = vpop.f32.mrb[42].mxu1 }
 0x139   : > { %v1562_v27 = vadd.f32 %v3362_v52, %v1292_v23  ;;  %v1254_v28 = vpop.f32.mrb[43].mxu0  ;;  %v1524_v1 = vpop.f32.mrb[43].mxu1 }
 0x13a   : > { %v1560_v30 = vadd.f32 %v1521_v26, %v1290_v24  ;;  %v3959_v28 = vld [vmem:[%s4025_s4] ss:$0 sm:$0xff] }
 0x13e   : > { %v3348_v31 = vpop.f32.mrb[44].mxu0  ;;  %v3366_v33 = vpop.f32.mrb[44].mxu1 }
 0x13f   : > { %v1296_v2 = vadd.f32 %v3348_v31, %v1098_v53  ;;  %v1267_v32 = vpop.f32.mrb[45].mxu0  ;;  %v1537_v36 = vpop.f32.mrb[45].mxu1 }
 0x140   : > { %v1294_v34 = vadd.f32 %v1267_v32, %v1096_v56  ;;  %v3349_v14 = vpop.f32.mrb[46].mxu0  ;;  %v3367_v39 = vpop.f32.mrb[46].mxu1 }
 0x141   : > { %v1566_v37 = vadd.f32 %v3366_v33, %v1296_v2  ;;  %v1270_v38 = vpop.f32.mrb[47].mxu0  ;;  %v1540_v15 = vpop.f32.mrb[47].mxu1 }
 0x142   : > { %v1564_v40 = vadd.f32 %v1537_v36, %v1294_v34 }
 0x146   : > { %v3372_v22 = vpop.f32.mrb[48].mxu0  ;;  %v3390_v43 = vpop.f32.mrb[48].mxu1 }
 0x147   : > { %v1752_v41 = vadd.f32 %v3372_v22, %v1554_v3  ;;  %v1687_v42 = vpop.f32.mrb[49].mxu0  ;;  %v1885_v47 = vpop.f32.mrb[49].mxu1 }
 0x148   : > { %v1750_v44 = vadd.f32 %v1687_v42, %v1552_v6  ;;  %v3373_v45 = vpop.f32.mrb[50].mxu0  ;;  %v3391_v50 = vpop.f32.mrb[50].mxu1 }
 0x149   : > { %v1950_v48 = vadd.f32 %v3390_v43, %v1752_v41  ;;  %v1690_v49 = vpop.f32.mrb[51].mxu0  ;;  %v1888_v53 = vpop.f32.mrb[51].mxu1 }
 0x14a   : > { %v1948_v51 = vadd.f32 %v1885_v47, %v1750_v44 }
 0x14e   : > { %v3376_v54 = vpop.f32.mrb[52].mxu0  ;;  %v3394_v57 = vpop.f32.mrb[52].mxu1 }
 0x14f   : > { %v1756_v55 = vadd.f32 %v3376_v54, %v1558_v16  ;;  %v1703_v56 = vpop.f32.mrb[53].mxu0  ;;  %v1901_v60 = vpop.f32.mrb[53].mxu1 }
 0x150   : > { %v1754_v58 = vadd.f32 %v1703_v56, %v1556_v19  ;;  %v3377_v59 = vpop.f32.mrb[54].mxu0  ;;  %v3395_v63 = vpop.f32.mrb[54].mxu1 }
 0x151   : > { %v1954_v61 = vadd.f32 %v3394_v57, %v1756_v55  ;;  %v1706_v62 = vpop.f32.mrb[55].mxu0  ;;  %v1904_v3 = vpop.f32.mrb[55].mxu1 }
 0x152   : > { %v1952_v0 = vadd.f32 %v1901_v60, %v1754_v58 }
 0x156   : > { %v3380_v4 = vpop.f32.mrb[56].mxu0  ;;  %v3398_v7 = vpop.f32.mrb[56].mxu1 }
 0x157   : > { %v1760_v5 = vadd.f32 %v3380_v4, %v1562_v27  ;;  %v1719_v6 = vpop.f32.mrb[57].mxu0  ;;  %v1917_v10 = vpop.f32.mrb[57].mxu1 }
 0x158   : > { %v1758_v8 = vadd.f32 %v1719_v6, %v1560_v30  ;;  %v3381_v9 = vpop.f32.mrb[58].mxu0  ;;  %v3399_v12 = vpop.f32.mrb[58].mxu1  ;;  %v3964_v30 = vld [vmem:[%s4023_s2] ss:$0 sm:$0xff] }
 0x159   : > { %v3948_v11 = vadd.f32 %v3398_v7, %v1760_v5  ;;  %v1722_v35 = vpop.f32.mrb[59].mxu0  ;;  %v1920_v16 = vpop.f32.mrb[59].mxu1 }
 0x15a   : > { %v3950_v13 = vadd.f32 %v1917_v10, %v1758_v8 }
 0x15e   : > { %v3384_v17 = vpop.f32.mrb[60].mxu0  ;;  %v3402_v20 = vpop.f32.mrb[60].mxu1 }
 0x15f   : > { %v1764_v18 = vadd.f32 %v3384_v17, %v1566_v37  ;;  %v1735_v19 = vpop.f32.mrb[61].mxu0  ;;  %v1933_v46 = vpop.f32.mrb[61].mxu1 }
 0x160   : > { %v1762_v21 = vadd.f32 %v1735_v19, %v1564_v40  ;;  %v3385_v23 = vpop.f32.mrb[62].mxu0  ;;  %v3403_v25 = vpop.f32.mrb[62].mxu1 }
 0x161   : > { %v3952_v52 = vadd.f32 %v3402_v20, %v1764_v18  ;;  %v1738_v24 = vpop.f32.mrb[63].mxu0  ;;  %v1936_v27 = vpop.f32.mrb[63].mxu1 }
 0x162   : > { %v3954_v26 = vadd.f32 %v1933_v46, %v1762_v21 }
 0x166   : > { %v3408_v29 = vpop.f32.mrb[64].mxu0  ;;  %v3426_v2 = vpop.f32.mrb[64].mxu1 }
 0x167   : > { %v2220_v1 = vadd.f32 %v3408_v29, %v1950_v48  ;;  %v2155_v31 = vpop.f32.mrb[65].mxu0  ;;  %v2687_v33 = vadd.f32 %v3426_v2, %v3959_v28  ;;  %v2678_v14 = vpop.f32.mrb[65].mxu1 }
 0x168   : > { %v2218_v32 = vadd.f32 %v2155_v31, %v1948_v51  ;;  %v3409_v34 = vpop.f32.mrb[66].mxu0  ;;  %v2679_v37 = vadd.f32 %v3959_v28, %v2678_v14  ;;  %v3427_v39 = vpop.f32.mrb[66].mxu1 }
 0x169   : > { %v2243_v36 = vadd.f32 %v3964_v30, %v2220_v1  ;;  %v2158_v38 = vpop.f32.mrb[67].mxu0  ;;  %v3156_v15 = vpack.c.bf16 %v2687_v33, %v2687_v33  ;;  %v2681_v22 = vpop.f32.mrb[67].mxu1 }
 0x16a   : > { %v2241_v40 = vadd.f32 %v3964_v30, %v2218_v32  ;;  %v3154_v42 = vpack.c.bf16 %v2679_v37, %v2679_v37 }
 0x16b   : > { %v2259_v41 = vmax.f32 %v2243_v36, 0.0  ;;  %2829 = vst.msk [vmem:[%s3916_s7 + $0x14] sm:$0xf] %vm2546_vm3, %v3156_v15 }
 0x16c   : > { %v2257_v43 = vmax.f32 %v2241_v40, 0.0  ;;  %2827 = vst.msk [vmem:[%s3916_s7 + $0xc] sm:$0xf] %vm2546_vm3, %v3154_v42 }
 0x16d   : > { %v3140_v44 = vpack.c.bf16 %v2259_v41, %v2259_v41 }
 0x16e   : > { %v3138_v45 = vpack.c.bf16 %v2257_v43, %v2257_v43  ;;  %v3412_v47 = vpop.f32.mrb[68].mxu0  ;;  %v3430_v50 = vpop.f32.mrb[68].mxu1 }
 0x16f   : > { %2619 = vst.msk [vmem:[%s3881_s28 + $0x14] sm:$0xf] %vm2546_vm3, %v3140_v44  ;;  %v2224_v48 = vadd.f32 %v3412_v47, %v1954_v61  ;;  %v2171_v49 = vpop.f32.mrb[69].mxu0  ;;  %v2703_v53 = vadd.f32 %v3430_v50, %v3959_v28  ;;  %v2694_v55 = vpop.f32.mrb[69].mxu1 }
 0x170   : > { %2617 = vst.msk [vmem:[%s3881_s28 + $0xc] sm:$0xf] %vm2546_vm3, %v3138_v45  ;;  %v2222_v51 = vadd.f32 %v2171_v49, %v1952_v0  ;;  %v3413_v54 = vpop.f32.mrb[70].mxu0  ;;  %v2695_v57 = vadd.f32 %v3959_v28, %v2694_v55  ;;  %v3431_v59 = vpop.f32.mrb[70].mxu1 }
 0x171   : > { %v2247_v56 = vadd.f32 %v3964_v30, %v2224_v48  ;;  %v2174_v58 = vpop.f32.mrb[71].mxu0  ;;  %v3160_v61 = vpack.c.bf16 %v2703_v53, %v2703_v53  ;;  %v2697_v62 = vpop.f32.mrb[71].mxu1 }
 0x172   : > { %v2245_v60 = vadd.f32 %v3964_v30, %v2222_v51  ;;  %v3158_v3 = vpack.c.bf16 %v2695_v57, %v2695_v57 }
 0x173   : > { %v2263_v63 = vmax.f32 %v2247_v56, 0.0  ;;  %2833 = vst.msk [vmem:[%s3916_s7 + $0x24] sm:$0xf] %vm2546_vm3, %v3160_v61 }
 0x174   : > { %v2261_v0 = vmax.f32 %v2245_v60, 0.0  ;;  %2831 = vst.msk [vmem:[%s3916_s7 + $0x1c] sm:$0xf] %vm2546_vm3, %v3158_v3 }
 0x175   : > { %v3144_v4 = vpack.c.bf16 %v2263_v63, %v2263_v63 }
 0x176   : > { %v3142_v5 = vpack.c.bf16 %v2261_v0, %v2261_v0  ;;  %v3416_v6 = vpop.f32.mrb[72].mxu0  ;;  %v3434_v9 = vpop.f32.mrb[72].mxu1 }
 0x177   : > { %2623 = vst.msk [vmem:[%s3881_s28 + $0x24] sm:$0xf] %vm2546_vm3, %v3144_v4  ;;  %v2228_v7 = vadd.f32 %v3416_v6, %v3948_v11  ;;  %v2187_v8 = vpop.f32.mrb[73].mxu0  ;;  %v2719_v35 = vadd.f32 %v3434_v9, %v3959_v28  ;;  %v2710_v16 = vpop.f32.mrb[73].mxu1 }
 0x178   : > { %2621 = vst.msk [vmem:[%s3881_s28 + $0x1c] sm:$0xf] %vm2546_vm3, %v3142_v5  ;;  %v2226_v10 = vadd.f32 %v2187_v8, %v3950_v13  ;;  %v3417_v12 = vpop.f32.mrb[74].mxu0  ;;  %v2711_v18 = vadd.f32 %v3959_v28, %v2710_v16  ;;  %v3435_v20 = vpop.f32.mrb[74].mxu1 }
 0x179   : > { %v2251_v17 = vadd.f32 %v3964_v30, %v2228_v7  ;;  %v2190_v19 = vpop.f32.mrb[75].mxu0  ;;  %v3164_v21 = vpack.c.bf16 %v2719_v35, %v2719_v35  ;;  %v2713_v23 = vpop.f32.mrb[75].mxu1 }
 0x17a   : > { %v2249_v11 = vadd.f32 %v3964_v30, %v2226_v10  ;;  %v3162_v24 = vpack.c.bf16 %v2711_v18, %v2711_v18 }
 0x17b   : > { %v2267_v46 = vmax.f32 %v2251_v17, 0.0  ;;  %2837 = vst.msk [vmem:[%s3916_s7 + $0x34] sm:$0xf] %vm2546_vm3, %v3164_v21 }
 0x17c   : > { %v2265_v13 = vmax.f32 %v2249_v11, 0.0  ;;  %2835 = vst.msk [vmem:[%s3916_s7 + $0x2c] sm:$0xf] %vm2546_vm3, %v3162_v24 }
 0x17d   : > { %v3148_v25 = vpack.c.bf16 %v2267_v46, %v2267_v46 }
 0x17e   : > { %v3146_v27 = vpack.c.bf16 %v2265_v13, %v2265_v13  ;;  %v3420_v29 = vpop.f32.mrb[76].mxu0  ;;  %v3438_v2 = vpop.f32.mrb[76].mxu1 }
 0x17f   : > { %2627 = vst.msk [vmem:[%s3881_s28 + $0x34] sm:$0xf] %vm2546_vm3, %v3148_v25  ;;  %v2232_v1 = vadd.f32 %v3420_v29, %v3952_v52  ;;  %v2203_v31 = vpop.f32.mrb[77].mxu0  ;;  %v2735_v33 = vadd.f32 %v3438_v2, %v3959_v28  ;;  %v2726_v14 = vpop.f32.mrb[77].mxu1 }
 0x180   : > { %2625 = vst.msk [vmem:[%s3881_s28 + $0x2c] sm:$0xf] %vm2546_vm3, %v3146_v27  ;;  %v2230_v32 = vadd.f32 %v2203_v31, %v3954_v26  ;;  %v3421_v34 = vpop.f32.mrb[78].mxu0  ;;  %v2727_v37 = vadd.f32 %v3959_v28, %v2726_v14  ;;  %v3439_v52 = vpop.f32.mrb[78].mxu1 }
 0x181   : > { %v2255_v36 = vadd.f32 %v3964_v30, %v2232_v1  ;;  %v2206_v38 = vpop.f32.mrb[79].mxu0  ;;  %v3168_v40 = vpack.c.bf16 %v2735_v33, %v2735_v33  ;;  %v2729_v15 = vpop.f32.mrb[79].mxu1 }
 0x182   : > { %v2253_v39 = vadd.f32 %v3964_v30, %v2230_v32  ;;  %v3166_v41 = vpack.c.bf16 %v2727_v37, %v2727_v37 }
 0x183   : > { %v2271_v22 = vmax.f32 %v2255_v36, 0.0  ;;  %2841 = vst.msk [vmem:[%s3916_s7 + $0x44] sm:$0xf] %vm2546_vm3, %v3168_v40 }
 0x184   : > { %v2269_v26 = vmax.f32 %v2253_v39, 0.0  ;;  %2839 = vst.msk [vmem:[%s3916_s7 + $0x3c] sm:$0xf] %vm2546_vm3, %v3166_v41 }
 0x185   : > { %v3152_v42 = vpack.c.bf16 %v2271_v22, %v2271_v22 }
 0x186   : > { %v3150_v43 = vpack.c.bf16 %v2269_v26, %v2269_v26 }
 0x187   : > { %2631 = vst.msk [vmem:[%s3881_s28 + $0x44] sm:$0xf] %vm2546_vm3, %v3152_v42 }
 0x188   : > { %2629 = vst.msk [vmem:[%s3881_s28 + $0x3c] sm:$0xf] %vm2546_vm3, %v3150_v43 }
 0x189 PF: > { %s17_s21 = sadd.s32 1, %s3543_s21  }
 0x18a   : > { %p14_p4 = scmp.ge.s32.totalorder %s17_s21, 4  }
 0x18c   :  { %16 = sbr.rel (!%p14_p4) target bundleno = 1 (0x1), region = 90 }

</bundles_post_ra>
